<compile_context>
chip_gen: v7x
topology: tpu7x:2x2x1
jax: 0.10.0
libtpu: 0.0.40
codegen_flags: <defaults>
</compile_context>

<pallas_src>
import math
from functools import partial

import jax
import jax.numpy as jnp
from jax.experimental import pallas as pl
from jax.experimental.pallas import tpu as pltpu

EPS = 1e-5  # PyTorch default layer_norm_eps


def _layernorm(x, gamma, beta):
    mu = jnp.mean(x, axis=-1, keepdims=True)
    xc = x - mu
    var = jnp.mean(xc * xc, axis=-1, keepdims=True)
    return xc * jax.lax.rsqrt(var + EPS) * gamma + beta


def _gelu_exact(x):
    # PyTorch activation='gelu' uses the exact erf form (approximate='none').
    return 0.5 * x * (1.0 + jax.lax.erf(x * (1.0 / math.sqrt(2.0))))


# ---------------------------------------------------------------------------
# Fused forward kernel: everything stays in VMEM for the whole network.
# All matmul weights arrive pre-transposed to (in_features, out_features).
# Per-layer weights arrive stacked on a leading layer axis and are indexed
# with a static Python layer loop.
# ---------------------------------------------------------------------------
def _fused_kernel(n_layers, n_heads,
                  x_ref, pe_ref, mask_ref, hm_ref,
                  wqkv_ref, bqkv_ref, wo_ref, bo_ref,
                  g1_ref, be1_ref, w1_ref, b1_ref, w2_ref, b2_ref,
                  g2_ref, be2_ref,
                  gf_ref, bf_ref, wdc_ref, bdc_ref, wob_ref, boc_ref,
                  out_ref):
    B, S, D = x_ref.shape
    N = B * S
    dh = D // n_heads
    scale = 1.0 / math.sqrt(dh)

    # pos-emb add; flatten batch into the matmul M dimension.
    x = (x_ref[...] + pe_ref[...]).reshape(N, D)           # (N, D) f32

    for l in range(n_layers):
        # ---- multi-head self-attention ----
        qkv = jnp.dot(x, wqkv_ref[l],
                      preferred_element_type=jnp.float32) + bqkv_ref[l]   # (N, 3D)
        q = qkv[:, :D].reshape(B, S, D)
        k = qkv[:, D:2 * D].reshape(B, S, D)
        v = qkv[:, 2 * D:].reshape(B, S, D)

        # Head separation via 0/1 masks on the feature axis: avoids lane
        # sub-slices and per-head wo transposes; score/context matmuls are
        # batched over B with the standard flash-attention einsum pattern.
        ctx = jnp.zeros((B, S, D), jnp.float32)
        for h in range(n_heads):
            m_h = hm_ref[h]                                  # (1, D) 0/1 mask
            s = jnp.einsum('bqd,bkd->bqk', q * m_h, k,
                           preferred_element_type=jnp.float32) * scale    # (B,S,S)
            s = s - jnp.max(s, axis=-1, keepdims=True)
            p = jnp.exp(s)
            p = p / jnp.sum(p, axis=-1, keepdims=True)
            ctx = ctx + jnp.einsum('bqk,bkd->bqd', p, v,
                                   preferred_element_type=jnp.float32) * m_h

        attn = jnp.dot(ctx.reshape(N, D), wo_ref[l],
                       preferred_element_type=jnp.float32) + bo_ref[l]

        # post-norm: norm1(x + attn)
        x1 = _layernorm(x + attn, g1_ref[l], be1_ref[l])

        # ---- feed-forward (gelu); bf16 operands, f32 accumulation ----
        hdn = jnp.dot(x1.astype(jnp.bfloat16), w1_ref[l],
                      preferred_element_type=jnp.float32) + b1_ref[l]
        hdn = _gelu_exact(hdn)
        y = jnp.dot(hdn.astype(jnp.bfloat16), w2_ref[l],
                    preferred_element_type=jnp.float32) + b2_ref[l]

        x = _layernorm(x1 + y, g2_ref[l], be2_ref[l])

    # ---- final encoder LayerNorm + fused classification heads ----
    xn = _layernorm(x, gf_ref[...], bf_ref[...])
    h2 = jnp.tanh(jnp.dot(xn, wdc_ref[...],
                          preferred_element_type=jnp.float32) + bdc_ref[...])   # (N, 2D)
    logits = jnp.dot(h2, wob_ref[...],
                     preferred_element_type=jnp.float32) + boc_ref[...]          # (N, 2)

    m = mask_ref[...]                                        # (N, 1)
    out_ref[...] = jnp.concatenate(
        [logits[:, 0:1] + (m - 1.0) * 10000.0,               # pred_sum masking
         logits[:, 1:2] * m],                                # pred_seg masking
        axis=1)


@jax.jit
def ext_transformer_encoder(sents_vec, mask, kp):
    B, S, D = sents_vec.shape
    N = B * S
    n_layers = kp["wqkv_t"].shape[0]
    n_heads = kp["head_mask"].shape[0]
    mask2d = mask.reshape(N, 1).astype(jnp.float32)

    out = pl.pallas_call(
        partial(_fused_kernel, n_layers, n_heads),
        out_shape=jax.ShapeDtypeStruct((N, 2), jnp.float32),
        compiler_params=pltpu.CompilerParams(vmem_limit_bytes=32 * 1024 * 1024),
    )(sents_vec, kp["pe"][:S], mask2d, kp["head_mask"],
      kp["wqkv_t"], kp["bqkv"], kp["wo_t"], kp["bo"],
      kp["g1"], kp["be1"], kp["w1_t"], kp["b1"], kp["w2_t"], kp["b2"],
      kp["g2"], kp["be2"],
      kp["gf"], kp["bf"], kp["wd_cat_t"], kp["bd_cat"], kp["wo_blk"], kp["bo_cat"])

    return {"logit_sum": out[:, 0].reshape(B, S),
            "logit_seg": out[:, 1].reshape(B, S)}


# ---------------------------------------------------------------------------
# Host-side parameter packing: pre-transpose to (in, out), stack per-layer
# weights on a leading layer axis, cast FFN weights to bf16, fuse the two
# classification heads, and build the per-head 0/1 feature masks.
# ---------------------------------------------------------------------------
def pack_params(p, n_heads):
    D = p["gf"].shape[-1]
    dh = D // n_heads

    def stack_layers(key, transform=None):
        arrs = [lp[key] for lp in p["layers"]]
        if transform is not None:
            arrs = [transform(a) for a in arrs]
        return jnp.stack(arrs, axis=0)

    head_mask = (jnp.arange(D)[None, :] // dh ==
                 jnp.arange(n_heads)[:, None]).astype(jnp.float32)[:, None, :]  # (H,1,D)

    wo_blk = jnp.zeros((2 * D, 2), jnp.float32)
    wo_blk = wo_blk.at[:D, 0].set(p["wo_sum"][0])
    wo_blk = wo_blk.at[D:, 1].set(p["wo_seg"][0])

    return dict(
        pe=p["pe"],
        head_mask=head_mask,
        wqkv_t=stack_layers("wqkv", lambda a: a.T), bqkv=stack_layers("bqkv"),
        wo_t=stack_layers("wo", lambda a: a.T), bo=stack_layers("bo"),
        g1=stack_layers("g1"), be1=stack_layers("be1"),
        w1_t=stack_layers("w1", lambda a: a.T).astype(jnp.bfloat16),
        b1=stack_layers("b1"),
        w2_t=stack_layers("w2", lambda a: a.T).astype(jnp.bfloat16),
        b2=stack_layers("b2"),
        g2=stack_layers("g2"), be2=stack_layers("be2"),
        gf=p["gf"], bf=p["bf"],
        wd_cat_t=jnp.concatenate([p["wd_sum"].T, p["wd_seg"].T], axis=1),   # (D, 2D)
        bd_cat=jnp.concatenate([p["bd_sum"], p["bd_seg"]], axis=1),         # (1, 2D)
        wo_blk=wo_blk,                                                      # (2D, 2)
        bo_cat=jnp.concatenate([p["bo_sum"], p["bo_seg"]], axis=1),         # (1, 2)
    )


# ---------------------------------------------------------------------------
# Plain-JAX f32 reference (same math, PyTorch weight convention).
# ---------------------------------------------------------------------------
def reference_forward(sents_vec, mask, params, n_heads):
    B, S, D = sents_vec.shape
    dh = D // n_heads
    x = sents_vec + params["pe"][:S][None, :, :]
    for lp in params["layers"]:
        qkv = x @ lp["wqkv"].T + lp["bqkv"]
        q, k, v = qkv[..., :D], qkv[..., D:2 * D], qkv[..., 2 * D:]
        sp = lambda t: t.reshape(B, S, n_heads, dh).transpose(0, 2, 1, 3)
        qh, kh, vh = sp(q), sp(k), sp(v)
        s = jnp.einsum('bhqd,bhkd->bhqk', qh, kh) / math.sqrt(dh)
        p = jax.nn.softmax(s, axis=-1)
        ctx = jnp.einsum('bhqk,bhkd->bhqd', p, vh).transpose(0, 2, 1, 3).reshape(B, S, D)
        attn = ctx @ lp["wo"].T + lp["bo"]
        x1 = _layernorm(x + attn, lp["g1"], lp["be1"])
        hdn = _gelu_exact(x1 @ lp["w1"].T + lp["b1"])
        y = hdn @ lp["w2"].T + lp["b2"]
        x = _layernorm(x1 + y, lp["g2"], lp["be2"])
    xn = _layernorm(x, params["gf"], params["bf"])
    h = jnp.tanh(xn @ params["wd_sum"].T + params["bd_sum"])
    ls = (h @ params["wo_sum"].T + params["bo_sum"])[..., 0] + (mask - 1.0) * 10000.0
    h = jnp.tanh(xn @ params["wd_seg"].T + params["bd_seg"])
    lg = (h @ params["wo_seg"].T + params["bo_seg"])[..., 0] * mask
    return {"logit_sum": ls, "logit_seg": lg}


# ---------------------------------------------------------------------------
# Deterministic synthetic parameter init (shapes from module __init__),
# kept in PyTorch convention (out_features, in_features).
# ---------------------------------------------------------------------------
def init_params(key, d_model, n_layers, d_ff, max_len):
    keys = iter(jax.random.split(key, 256))

    def w(shape, scale=0.05):
        return (scale * jax.random.normal(next(keys), shape)).astype(jnp.float32)

    layers = []
    for _ in range(n_layers):
        layers.append(dict(
            wqkv=w((3 * d_model, d_model)), bqkv=w((1, 3 * d_model), 0.01),
            wo=w((d_model, d_model)), bo=w((1, d_model), 0.01),
            g1=jnp.ones((1, d_model), jnp.float32), be1=jnp.zeros((1, d_model), jnp.float32),
            w1=w((d_ff, d_model)), b1=w((1, d_ff), 0.01),
            w2=w((d_model, d_ff)), b2=w((1, d_model), 0.01),
            g2=jnp.ones((1, d_model), jnp.float32), be2=jnp.zeros((1, d_model), jnp.float32),
        ))

    # Positional encoding buffer (same formula as PositionalEncoding.__init__)
    position = jnp.arange(max_len, dtype=jnp.float32)[:, None]
    div_term = jnp.exp(jnp.arange(0, d_model, 2, dtype=jnp.float32)
                       * -(math.log(10000.0) / d_model))
    pe = jnp.zeros((max_len, d_model), jnp.float32)
    pe = pe.at[:, 0::2].set(jnp.sin(position * div_term))
    pe = pe.at[:, 1::2].set(jnp.cos(position * div_term))

    return dict(
        layers=layers, pe=pe,
        gf=jnp.ones((1, d_model), jnp.float32), bf=jnp.zeros((1, d_model), jnp.float32),
        wd_sum=w((d_model, d_model)), bd_sum=w((1, d_model), 0.01),
        wo_sum=w((1, d_model)), bo_sum=w((1, 1), 0.01),
        wd_seg=w((d_model, d_model)), bd_seg=w((1, d_model), 0.01),
        wo_seg=w((1, d_model)), bo_seg=w((1, 1), 0.01),
    )


if __name__ == "__main__":
    B, S, D = 2, 8, 32           # batch, n_sents, d_model
    N_HEADS, N_LAYERS = 4, 2     # args.n_transformer_head, args.n_transformer_layer
    D_FF = 2048                  # hardcoded d_ff in the module

    key = jax.random.PRNGKey(0)
    kp_key, kx, km = jax.random.split(key, 3)
    params = init_params(kp_key, D, N_LAYERS, D_FF, max_len=64)
    kparams = pack_params(params, N_HEADS)

    sents_vec = jax.random.normal(kx, (B, S, D), jnp.float32)
    mask = (jax.random.uniform(km, (B, S)) > 0.25).astype(jnp.float32)

    out = ext_transformer_encoder(sents_vec, mask, kparams)
    jax.block_until_ready(out)

    ref = reference_forward(sents_vec, mask, params, N_HEADS)
    for name in ("logit_sum", "logit_seg"):
        assert jnp.allclose(out[name], ref[name], atol=5e-2, rtol=5e-2), name

    print("KERNEL_OK")
</pallas_src>

<mosaic_0001>
module attributes {stable_mosaic.version = 11 : i64} {
  func.func @_fused_kernel(%arg0: memref<2x8x32xf32, #tpu.memory_space<vmem>>, %arg1: memref<8x32xf32, #tpu.memory_space<vmem>>, %arg2: memref<16x1xf32, #tpu.memory_space<vmem>>, %arg3: memref<4x1x32xf32, #tpu.memory_space<vmem>>, %arg4: memref<2x32x96xf32, #tpu.memory_space<vmem>>, %arg5: memref<2x1x96xf32, #tpu.memory_space<vmem>>, %arg6: memref<2x32x32xf32, #tpu.memory_space<vmem>>, %arg7: memref<2x1x32xf32, #tpu.memory_space<vmem>>, %arg8: memref<2x1x32xf32, #tpu.memory_space<vmem>>, %arg9: memref<2x1x32xf32, #tpu.memory_space<vmem>>, %arg10: memref<2x32x2048xbf16, #tpu.memory_space<vmem>>, %arg11: memref<2x1x2048xf32, #tpu.memory_space<vmem>>, %arg12: memref<2x2048x32xbf16, #tpu.memory_space<vmem>>, %arg13: memref<2x1x32xf32, #tpu.memory_space<vmem>>, %arg14: memref<2x1x32xf32, #tpu.memory_space<vmem>>, %arg15: memref<2x1x32xf32, #tpu.memory_space<vmem>>, %arg16: memref<1x32xf32, #tpu.memory_space<vmem>>, %arg17: memref<1x32xf32, #tpu.memory_space<vmem>>, %arg18: memref<32x64xf32, #tpu.memory_space<vmem>>, %arg19: memref<1x64xf32, #tpu.memory_space<vmem>>, %arg20: memref<64x2xf32, #tpu.memory_space<vmem>>, %arg21: memref<1x2xf32, #tpu.memory_space<vmem>>, %arg22: memref<16x2xf32, #tpu.memory_space<vmem>>) attributes {dimension_semantics = [], scalar_prefetch = 0 : i64, scratch_operands = 0 : i64, tpu.core_type = #tpu.core_type<tc>} {
    %c0 = arith.constant 0 : index
    %c0_0 = arith.constant 0 : index
    %c0_1 = arith.constant 0 : index
    %0 = vector.load %arg0[%c0, %c0_0, %c0_1] : memref<2x8x32xf32, #tpu.memory_space<vmem>>, vector<2x8x32xf32>
    %c0_2 = arith.constant 0 : index
    %c0_3 = arith.constant 0 : index
    %1 = vector.load %arg1[%c0_2, %c0_3] : memref<8x32xf32, #tpu.memory_space<vmem>>, vector<8x32xf32>
    %2 = vector.shape_cast %1 : vector<8x32xf32> to vector<1x8x32xf32>
    %3 = vector.broadcast %2 : vector<1x8x32xf32> to vector<2x8x32xf32>
    %4 = arith.addf %0, %3 : vector<2x8x32xf32>
    %5 = vector.shape_cast %4 : vector<2x8x32xf32> to vector<16x32xf32>
    %c0_4 = arith.constant 0 : index
    %c0_5 = arith.constant 0 : index
    %c0_6 = arith.constant 0 : index
    %6 = vector.load %arg4[%c0_4, %c0_5, %c0_6] : memref<2x32x96xf32, #tpu.memory_space<vmem>>, vector<1x32x96xf32>
    %7 = vector.shape_cast %6 : vector<1x32x96xf32> to vector<32x96xf32>
    %cst = arith.constant dense<0.000000e+00> : vector<16x96xf32>
    %8 = tpu.matmul %5, %7, %cst {dimension_numbers = #tpu.dot_dimension_numbers<[1], [0], [0], [1], [0, 0, 1, 1], [], []>} : vector<16x32xf32>, vector<32x96xf32>, vector<16x96xf32> -> vector<16x96xf32>
    %c0_7 = arith.constant 0 : index
    %c0_8 = arith.constant 0 : index
    %c0_9 = arith.constant 0 : index
    %9 = vector.load %arg5[%c0_7, %c0_8, %c0_9] : memref<2x1x96xf32, #tpu.memory_space<vmem>>, vector<1x1x96xf32>
    %10 = vector.shape_cast %9 : vector<1x1x96xf32> to vector<1x96xf32>
    %11 = vector.broadcast %10 : vector<1x96xf32> to vector<16x96xf32>
    %12 = arith.addf %8, %11 : vector<16x96xf32>
    %13 = vector.extract_strided_slice %12 {offsets = [0, 0], sizes = [16, 32], strides = [1, 1]} : vector<16x96xf32> to vector<16x32xf32>
    %14 = vector.shape_cast %13 : vector<16x32xf32> to vector<2x8x32xf32>
    %15 = vector.extract_strided_slice %12 {offsets = [0, 32], sizes = [16, 32], strides = [1, 1]} : vector<16x96xf32> to vector<16x32xf32>
    %16 = vector.shape_cast %15 : vector<16x32xf32> to vector<2x8x32xf32>
    %17 = vector.extract_strided_slice %12 {offsets = [0, 64], sizes = [16, 32], strides = [1, 1]} : vector<16x96xf32> to vector<16x32xf32>
    %18 = vector.shape_cast %17 : vector<16x32xf32> to vector<2x8x32xf32>
    %cst_10 = arith.constant 0.000000e+00 : f32
    %19 = vector.broadcast %cst_10 : f32 to vector<2x8x32xf32>
    %c0_11 = arith.constant 0 : index
    %c0_12 = arith.constant 0 : index
    %c0_13 = arith.constant 0 : index
    %20 = vector.load %arg3[%c0_11, %c0_12, %c0_13] : memref<4x1x32xf32, #tpu.memory_space<vmem>>, vector<1x1x32xf32>
    %21 = vector.shape_cast %20 : vector<1x1x32xf32> to vector<1x32xf32>
    %22 = vector.shape_cast %21 : vector<1x32xf32> to vector<1x1x32xf32>
    %23 = vector.broadcast %22 : vector<1x1x32xf32> to vector<2x8x32xf32>
    %24 = arith.mulf %14, %23 : vector<2x8x32xf32>
    "tpu.trace_start"() <{level = 10 : i32, message = "bqd,bkd->bqk"}> : () -> ()
    %cst_14 = arith.constant dense<0.000000e+00> : vector<2x8x8xf32>
    %25 = tpu.matmul %24, %16, %cst_14 {dimension_numbers = #tpu.dot_dimension_numbers<[2], [2], [1], [1], [0, 0, 0, 1, 1, 1], [0], [0]>} : vector<2x8x32xf32>, vector<2x8x32xf32>, vector<2x8x8xf32> -> vector<2x8x8xf32>
    "tpu.trace_stop"() : () -> ()
    %cst_15 = arith.constant 0.353553385 : f32
    %26 = vector.broadcast %cst_15 : f32 to vector<2x8x8xf32>
    %27 = arith.mulf %25, %26 : vector<2x8x8xf32>
    %cst_16 = arith.constant dense<0xFF800000> : vector<2x8xf32>
    %28 = vector.multi_reduction <maximumf>, %27, %cst_16 [2] : vector<2x8x8xf32> to vector<2x8xf32>
    %29 = vector.shape_cast %28 : vector<2x8xf32> to vector<2x8x1xf32>
    %30 = vector.broadcast %29 : vector<2x8x1xf32> to vector<2x8x8xf32>
    %31 = arith.subf %27, %30 : vector<2x8x8xf32>
    %32 = math.exp %31 : vector<2x8x8xf32>
    %cst_17 = arith.constant dense<0.000000e+00> : vector<2x8xf32>
    %33 = vector.multi_reduction <add>, %32, %cst_17 [2] : vector<2x8x8xf32> to vector<2x8xf32>
    %34 = vector.shape_cast %33 : vector<2x8xf32> to vector<2x8x1xf32>
    %35 = vector.broadcast %34 : vector<2x8x1xf32> to vector<2x8x8xf32>
    %36 = arith.divf %32, %35 : vector<2x8x8xf32>
    "tpu.trace_start"() <{level = 10 : i32, message = "bqk,bkd->bqd"}> : () -> ()
    %cst_18 = arith.constant dense<0.000000e+00> : vector<2x8x32xf32>
    %37 = tpu.matmul %36, %18, %cst_18 {dimension_numbers = #tpu.dot_dimension_numbers<[2], [1], [1], [2], [0, 0, 0, 1, 1, 2], [0], [0]>} : vector<2x8x8xf32>, vector<2x8x32xf32>, vector<2x8x32xf32> -> vector<2x8x32xf32>
    "tpu.trace_stop"() : () -> ()
    %38 = vector.shape_cast %21 : vector<1x32xf32> to vector<1x1x32xf32>
    %39 = vector.broadcast %38 : vector<1x1x32xf32> to vector<2x8x32xf32>
    %40 = arith.mulf %37, %39 : vector<2x8x32xf32>
    %41 = arith.addf %19, %40 : vector<2x8x32xf32>
    %c1 = arith.constant 1 : index
    %c0_19 = arith.constant 0 : index
    %c0_20 = arith.constant 0 : index
    %42 = vector.load %arg3[%c1, %c0_19, %c0_20] : memref<4x1x32xf32, #tpu.memory_space<vmem>>, vector<1x1x32xf32>
    %43 = vector.shape_cast %42 : vector<1x1x32xf32> to vector<1x32xf32>
    %44 = vector.shape_cast %43 : vector<1x32xf32> to vector<1x1x32xf32>
    %45 = vector.broadcast %44 : vector<1x1x32xf32> to vector<2x8x32xf32>
    %46 = arith.mulf %14, %45 : vector<2x8x32xf32>
    "tpu.trace_start"() <{level = 10 : i32, message = "bqd,bkd->bqk"}> : () -> ()
    %cst_21 = arith.constant dense<0.000000e+00> : vector<2x8x8xf32>
    %47 = tpu.matmul %46, %16, %cst_21 {dimension_numbers = #tpu.dot_dimension_numbers<[2], [2], [1], [1], [0, 0, 0, 1, 1, 1], [0], [0]>} : vector<2x8x32xf32>, vector<2x8x32xf32>, vector<2x8x8xf32> -> vector<2x8x8xf32>
    "tpu.trace_stop"() : () -> ()
    %cst_22 = arith.constant 0.353553385 : f32
    %48 = vector.broadcast %cst_22 : f32 to vector<2x8x8xf32>
    %49 = arith.mulf %47, %48 : vector<2x8x8xf32>
    %cst_23 = arith.constant dense<0xFF800000> : vector<2x8xf32>
    %50 = vector.multi_reduction <maximumf>, %49, %cst_23 [2] : vector<2x8x8xf32> to vector<2x8xf32>
    %51 = vector.shape_cast %50 : vector<2x8xf32> to vector<2x8x1xf32>
    %52 = vector.broadcast %51 : vector<2x8x1xf32> to vector<2x8x8xf32>
    %53 = arith.subf %49, %52 : vector<2x8x8xf32>
    %54 = math.exp %53 : vector<2x8x8xf32>
    %cst_24 = arith.constant dense<0.000000e+00> : vector<2x8xf32>
    %55 = vector.multi_reduction <add>, %54, %cst_24 [2] : vector<2x8x8xf32> to vector<2x8xf32>
    %56 = vector.shape_cast %55 : vector<2x8xf32> to vector<2x8x1xf32>
    %57 = vector.broadcast %56 : vector<2x8x1xf32> to vector<2x8x8xf32>
    %58 = arith.divf %54, %57 : vector<2x8x8xf32>
    "tpu.trace_start"() <{level = 10 : i32, message = "bqk,bkd->bqd"}> : () -> ()
    %cst_25 = arith.constant dense<0.000000e+00> : vector<2x8x32xf32>
    %59 = tpu.matmul %58, %18, %cst_25 {dimension_numbers = #tpu.dot_dimension_numbers<[2], [1], [1], [2], [0, 0, 0, 1, 1, 2], [0], [0]>} : vector<2x8x8xf32>, vector<2x8x32xf32>, vector<2x8x32xf32> -> vector<2x8x32xf32>
    "tpu.trace_stop"() : () -> ()
    %60 = vector.shape_cast %43 : vector<1x32xf32> to vector<1x1x32xf32>
    %61 = vector.broadcast %60 : vector<1x1x32xf32> to vector<2x8x32xf32>
    %62 = arith.mulf %59, %61 : vector<2x8x32xf32>
    %63 = arith.addf %41, %62 : vector<2x8x32xf32>
    %c2 = arith.constant 2 : index
    %c0_26 = arith.constant 0 : index
    %c0_27 = arith.constant 0 : index
    %64 = vector.load %arg3[%c2, %c0_26, %c0_27] : memref<4x1x32xf32, #tpu.memory_space<vmem>>, vector<1x1x32xf32>
    %65 = vector.shape_cast %64 : vector<1x1x32xf32> to vector<1x32xf32>
    %66 = vector.shape_cast %65 : vector<1x32xf32> to vector<1x1x32xf32>
    %67 = vector.broadcast %66 : vector<1x1x32xf32> to vector<2x8x32xf32>
    %68 = arith.mulf %14, %67 : vector<2x8x32xf32>
    "tpu.trace_start"() <{level = 10 : i32, message = "bqd,bkd->bqk"}> : () -> ()
    %cst_28 = arith.constant dense<0.000000e+00> : vector<2x8x8xf32>
    %69 = tpu.matmul %68, %16, %cst_28 {dimension_numbers = #tpu.dot_dimension_numbers<[2], [2], [1], [1], [0, 0, 0, 1, 1, 1], [0], [0]>} : vector<2x8x32xf32>, vector<2x8x32xf32>, vector<2x8x8xf32> -> vector<2x8x8xf32>
    "tpu.trace_stop"() : () -> ()
    %cst_29 = arith.constant 0.353553385 : f32
    %70 = vector.broadcast %cst_29 : f32 to vector<2x8x8xf32>
    %71 = arith.mulf %69, %70 : vector<2x8x8xf32>
    %cst_30 = arith.constant dense<0xFF800000> : vector<2x8xf32>
    %72 = vector.multi_reduction <maximumf>, %71, %cst_30 [2] : vector<2x8x8xf32> to vector<2x8xf32>
    %73 = vector.shape_cast %72 : vector<2x8xf32> to vector<2x8x1xf32>
    %74 = vector.broadcast %73 : vector<2x8x1xf32> to vector<2x8x8xf32>
    %75 = arith.subf %71, %74 : vector<2x8x8xf32>
    %76 = math.exp %75 : vector<2x8x8xf32>
    %cst_31 = arith.constant dense<0.000000e+00> : vector<2x8xf32>
    %77 = vector.multi_reduction <add>, %76, %cst_31 [2] : vector<2x8x8xf32> to vector<2x8xf32>
    %78 = vector.shape_cast %77 : vector<2x8xf32> to vector<2x8x1xf32>
    %79 = vector.broadcast %78 : vector<2x8x1xf32> to vector<2x8x8xf32>
    %80 = arith.divf %76, %79 : vector<2x8x8xf32>
    "tpu.trace_start"() <{level = 10 : i32, message = "bqk,bkd->bqd"}> : () -> ()
    %cst_32 = arith.constant dense<0.000000e+00> : vector<2x8x32xf32>
    %81 = tpu.matmul %80, %18, %cst_32 {dimension_numbers = #tpu.dot_dimension_numbers<[2], [1], [1], [2], [0, 0, 0, 1, 1, 2], [0], [0]>} : vector<2x8x8xf32>, vector<2x8x32xf32>, vector<2x8x32xf32> -> vector<2x8x32xf32>
    "tpu.trace_stop"() : () -> ()
    %82 = vector.shape_cast %65 : vector<1x32xf32> to vector<1x1x32xf32>
    %83 = vector.broadcast %82 : vector<1x1x32xf32> to vector<2x8x32xf32>
    %84 = arith.mulf %81, %83 : vector<2x8x32xf32>
    %85 = arith.addf %63, %84 : vector<2x8x32xf32>
    %c3 = arith.constant 3 : index
    %c0_33 = arith.constant 0 : index
    %c0_34 = arith.constant 0 : index
    %86 = vector.load %arg3[%c3, %c0_33, %c0_34] : memref<4x1x32xf32, #tpu.memory_space<vmem>>, vector<1x1x32xf32>
    %87 = vector.shape_cast %86 : vector<1x1x32xf32> to vector<1x32xf32>
    %88 = vector.shape_cast %87 : vector<1x32xf32> to vector<1x1x32xf32>
    %89 = vector.broadcast %88 : vector<1x1x32xf32> to vector<2x8x32xf32>
    %90 = arith.mulf %14, %89 : vector<2x8x32xf32>
    "tpu.trace_start"() <{level = 10 : i32, message = "bqd,bkd->bqk"}> : () -> ()
    %cst_35 = arith.constant dense<0.000000e+00> : vector<2x8x8xf32>
    %91 = tpu.matmul %90, %16, %cst_35 {dimension_numbers = #tpu.dot_dimension_numbers<[2], [2], [1], [1], [0, 0, 0, 1, 1, 1], [0], [0]>} : vector<2x8x32xf32>, vector<2x8x32xf32>, vector<2x8x8xf32> -> vector<2x8x8xf32>
    "tpu.trace_stop"() : () -> ()
    %cst_36 = arith.constant 0.353553385 : f32
    %92 = vector.broadcast %cst_36 : f32 to vector<2x8x8xf32>
    %93 = arith.mulf %91, %92 : vector<2x8x8xf32>
    %cst_37 = arith.constant dense<0xFF800000> : vector<2x8xf32>
    %94 = vector.multi_reduction <maximumf>, %93, %cst_37 [2] : vector<2x8x8xf32> to vector<2x8xf32>
    %95 = vector.shape_cast %94 : vector<2x8xf32> to vector<2x8x1xf32>
    %96 = vector.broadcast %95 : vector<2x8x1xf32> to vector<2x8x8xf32>
    %97 = arith.subf %93, %96 : vector<2x8x8xf32>
    %98 = math.exp %97 : vector<2x8x8xf32>
    %cst_38 = arith.constant dense<0.000000e+00> : vector<2x8xf32>
    %99 = vector.multi_reduction <add>, %98, %cst_38 [2] : vector<2x8x8xf32> to vector<2x8xf32>
    %100 = vector.shape_cast %99 : vector<2x8xf32> to vector<2x8x1xf32>
    %101 = vector.broadcast %100 : vector<2x8x1xf32> to vector<2x8x8xf32>
    %102 = arith.divf %98, %101 : vector<2x8x8xf32>
    "tpu.trace_start"() <{level = 10 : i32, message = "bqk,bkd->bqd"}> : () -> ()
    %cst_39 = arith.constant dense<0.000000e+00> : vector<2x8x32xf32>
    %103 = tpu.matmul %102, %18, %cst_39 {dimension_numbers = #tpu.dot_dimension_numbers<[2], [1], [1], [2], [0, 0, 0, 1, 1, 2], [0], [0]>} : vector<2x8x8xf32>, vector<2x8x32xf32>, vector<2x8x32xf32> -> vector<2x8x32xf32>
    "tpu.trace_stop"() : () -> ()
    %104 = vector.shape_cast %87 : vector<1x32xf32> to vector<1x1x32xf32>
    %105 = vector.broadcast %104 : vector<1x1x32xf32> to vector<2x8x32xf32>
    %106 = arith.mulf %103, %105 : vector<2x8x32xf32>
    %107 = arith.addf %85, %106 : vector<2x8x32xf32>
    %108 = vector.shape_cast %107 : vector<2x8x32xf32> to vector<16x32xf32>
    %c0_40 = arith.constant 0 : index
    %c0_41 = arith.constant 0 : index
    %c0_42 = arith.constant 0 : index
    %109 = vector.load %arg6[%c0_40, %c0_41, %c0_42] : memref<2x32x32xf32, #tpu.memory_space<vmem>>, vector<1x32x32xf32>
    %110 = vector.shape_cast %109 : vector<1x32x32xf32> to vector<32x32xf32>
    %cst_43 = arith.constant dense<0.000000e+00> : vector<16x32xf32>
    %111 = tpu.matmul %108, %110, %cst_43 {dimension_numbers = #tpu.dot_dimension_numbers<[1], [0], [0], [1], [0, 0, 1, 1], [], []>} : vector<16x32xf32>, vector<32x32xf32>, vector<16x32xf32> -> vector<16x32xf32>
    %c0_44 = arith.constant 0 : index
    %c0_45 = arith.constant 0 : index
    %c0_46 = arith.constant 0 : index
    %112 = vector.load %arg7[%c0_44, %c0_45, %c0_46] : memref<2x1x32xf32, #tpu.memory_space<vmem>>, vector<1x1x32xf32>
    %113 = vector.shape_cast %112 : vector<1x1x32xf32> to vector<1x32xf32>
    %114 = vector.broadcast %113 : vector<1x32xf32> to vector<16x32xf32>
    %115 = arith.addf %111, %114 : vector<16x32xf32>
    %116 = arith.addf %5, %115 : vector<16x32xf32>
    %c0_47 = arith.constant 0 : index
    %c0_48 = arith.constant 0 : index
    %c0_49 = arith.constant 0 : index
    %117 = vector.load %arg8[%c0_47, %c0_48, %c0_49] : memref<2x1x32xf32, #tpu.memory_space<vmem>>, vector<1x1x32xf32>
    %118 = vector.shape_cast %117 : vector<1x1x32xf32> to vector<1x32xf32>
    %c0_50 = arith.constant 0 : index
    %c0_51 = arith.constant 0 : index
    %c0_52 = arith.constant 0 : index
    %119 = vector.load %arg9[%c0_50, %c0_51, %c0_52] : memref<2x1x32xf32, #tpu.memory_space<vmem>>, vector<1x1x32xf32>
    %120 = vector.shape_cast %119 : vector<1x1x32xf32> to vector<1x32xf32>
    %cst_53 = arith.constant dense<0.000000e+00> : vector<16xf32>
    %121 = vector.multi_reduction <add>, %116, %cst_53 [1] : vector<16x32xf32> to vector<16xf32>
    %122 = vector.shape_cast %121 : vector<16xf32> to vector<16x1xf32>
    %cst_54 = arith.constant 3.200000e+01 : f32
    %123 = vector.broadcast %cst_54 : f32 to vector<16x1xf32>
    %124 = arith.divf %122, %123 : vector<16x1xf32>
    %125 = vector.broadcast %124 : vector<16x1xf32> to vector<16x32xf32>
    %126 = arith.subf %116, %125 : vector<16x32xf32>
    %127 = arith.mulf %126, %126 : vector<16x32xf32>
    %cst_55 = arith.constant dense<0.000000e+00> : vector<16xf32>
    %128 = vector.multi_reduction <add>, %127, %cst_55 [1] : vector<16x32xf32> to vector<16xf32>
    %129 = vector.shape_cast %128 : vector<16xf32> to vector<16x1xf32>
    %cst_56 = arith.constant 3.200000e+01 : f32
    %130 = vector.broadcast %cst_56 : f32 to vector<16x1xf32>
    %131 = arith.divf %129, %130 : vector<16x1xf32>
    %cst_57 = arith.constant 9.99999974E-6 : f32
    %132 = vector.broadcast %cst_57 : f32 to vector<16x1xf32>
    %133 = arith.addf %131, %132 : vector<16x1xf32>
    %134 = math.rsqrt %133 : vector<16x1xf32>
    %135 = vector.broadcast %134 : vector<16x1xf32> to vector<16x32xf32>
    %136 = arith.mulf %126, %135 : vector<16x32xf32>
    %137 = vector.broadcast %118 : vector<1x32xf32> to vector<16x32xf32>
    %138 = arith.mulf %136, %137 : vector<16x32xf32>
    %139 = vector.broadcast %120 : vector<1x32xf32> to vector<16x32xf32>
    %140 = arith.addf %138, %139 : vector<16x32xf32>
    %141 = arith.truncf %140 : vector<16x32xf32> to vector<16x32xbf16>
    %c0_58 = arith.constant 0 : index
    %c0_59 = arith.constant 0 : index
    %c0_60 = arith.constant 0 : index
    %142 = vector.load %arg10[%c0_58, %c0_59, %c0_60] : memref<2x32x2048xbf16, #tpu.memory_space<vmem>>, vector<1x32x2048xbf16>
    %143 = vector.shape_cast %142 : vector<1x32x2048xbf16> to vector<32x2048xbf16>
    %cst_61 = arith.constant dense<0.000000e+00> : vector<16x2048xf32>
    %144 = tpu.matmul %141, %143, %cst_61 {dimension_numbers = #tpu.dot_dimension_numbers<[1], [0], [0], [1], [0, 0, 1, 1], [], []>} : vector<16x32xbf16>, vector<32x2048xbf16>, vector<16x2048xf32> -> vector<16x2048xf32>
    %c0_62 = arith.constant 0 : index
    %c0_63 = arith.constant 0 : index
    %c0_64 = arith.constant 0 : index
    %145 = vector.load %arg11[%c0_62, %c0_63, %c0_64] : memref<2x1x2048xf32, #tpu.memory_space<vmem>>, vector<1x1x2048xf32>
    %146 = vector.shape_cast %145 : vector<1x1x2048xf32> to vector<1x2048xf32>
    %147 = vector.broadcast %146 : vector<1x2048xf32> to vector<16x2048xf32>
    %148 = arith.addf %144, %147 : vector<16x2048xf32>
    %cst_65 = arith.constant 5.000000e-01 : f32
    %149 = vector.broadcast %cst_65 : f32 to vector<16x2048xf32>
    %150 = arith.mulf %149, %148 : vector<16x2048xf32>
    %cst_66 = arith.constant 0.707106769 : f32
    %151 = vector.broadcast %cst_66 : f32 to vector<16x2048xf32>
    %152 = arith.mulf %148, %151 : vector<16x2048xf32>
    %153 = math.erf %152 : vector<16x2048xf32>
    %cst_67 = arith.constant 1.000000e+00 : f32
    %154 = vector.broadcast %cst_67 : f32 to vector<16x2048xf32>
    %155 = arith.addf %154, %153 : vector<16x2048xf32>
    %156 = arith.mulf %150, %155 : vector<16x2048xf32>
    %157 = arith.truncf %156 : vector<16x2048xf32> to vector<16x2048xbf16>
    %c0_68 = arith.constant 0 : index
    %c0_69 = arith.constant 0 : index
    %c0_70 = arith.constant 0 : index
    %158 = vector.load %arg12[%c0_68, %c0_69, %c0_70] : memref<2x2048x32xbf16, #tpu.memory_space<vmem>>, vector<1x2048x32xbf16>
    %159 = vector.shape_cast %158 : vector<1x2048x32xbf16> to vector<2048x32xbf16>
    %cst_71 = arith.constant dense<0.000000e+00> : vector<16x32xf32>
    %160 = tpu.matmul %157, %159, %cst_71 {dimension_numbers = #tpu.dot_dimension_numbers<[1], [0], [0], [1], [0, 0, 1, 1], [], []>} : vector<16x2048xbf16>, vector<2048x32xbf16>, vector<16x32xf32> -> vector<16x32xf32>
    %c0_72 = arith.constant 0 : index
    %c0_73 = arith.constant 0 : index
    %c0_74 = arith.constant 0 : index
    %161 = vector.load %arg13[%c0_72, %c0_73, %c0_74] : memref<2x1x32xf32, #tpu.memory_space<vmem>>, vector<1x1x32xf32>
    %162 = vector.shape_cast %161 : vector<1x1x32xf32> to vector<1x32xf32>
    %163 = vector.broadcast %162 : vector<1x32xf32> to vector<16x32xf32>
    %164 = arith.addf %160, %163 : vector<16x32xf32>
    %165 = arith.addf %140, %164 : vector<16x32xf32>
    %c0_75 = arith.constant 0 : index
    %c0_76 = arith.constant 0 : index
    %c0_77 = arith.constant 0 : index
    %166 = vector.load %arg14[%c0_75, %c0_76, %c0_77] : memref<2x1x32xf32, #tpu.memory_space<vmem>>, vector<1x1x32xf32>
    %167 = vector.shape_cast %166 : vector<1x1x32xf32> to vector<1x32xf32>
    %c0_78 = arith.constant 0 : index
    %c0_79 = arith.constant 0 : index
    %c0_80 = arith.constant 0 : index
    %168 = vector.load %arg15[%c0_78, %c0_79, %c0_80] : memref<2x1x32xf32, #tpu.memory_space<vmem>>, vector<1x1x32xf32>
    %169 = vector.shape_cast %168 : vector<1x1x32xf32> to vector<1x32xf32>
    %cst_81 = arith.constant dense<0.000000e+00> : vector<16xf32>
    %170 = vector.multi_reduction <add>, %165, %cst_81 [1] : vector<16x32xf32> to vector<16xf32>
    %171 = vector.shape_cast %170 : vector<16xf32> to vector<16x1xf32>
    %cst_82 = arith.constant 3.200000e+01 : f32
    %172 = vector.broadcast %cst_82 : f32 to vector<16x1xf32>
    %173 = arith.divf %171, %172 : vector<16x1xf32>
    %174 = vector.broadcast %173 : vector<16x1xf32> to vector<16x32xf32>
    %175 = arith.subf %165, %174 : vector<16x32xf32>
    %176 = arith.mulf %175, %175 : vector<16x32xf32>
    %cst_83 = arith.constant dense<0.000000e+00> : vector<16xf32>
    %177 = vector.multi_reduction <add>, %176, %cst_83 [1] : vector<16x32xf32> to vector<16xf32>
    %178 = vector.shape_cast %177 : vector<16xf32> to vector<16x1xf32>
    %cst_84 = arith.constant 3.200000e+01 : f32
    %179 = vector.broadcast %cst_84 : f32 to vector<16x1xf32>
    %180 = arith.divf %178, %179 : vector<16x1xf32>
    %cst_85 = arith.constant 9.99999974E-6 : f32
    %181 = vector.broadcast %cst_85 : f32 to vector<16x1xf32>
    %182 = arith.addf %180, %181 : vector<16x1xf32>
    %183 = math.rsqrt %182 : vector<16x1xf32>
    %184 = vector.broadcast %183 : vector<16x1xf32> to vector<16x32xf32>
    %185 = arith.mulf %175, %184 : vector<16x32xf32>
    %186 = vector.broadcast %167 : vector<1x32xf32> to vector<16x32xf32>
    %187 = arith.mulf %185, %186 : vector<16x32xf32>
    %188 = vector.broadcast %169 : vector<1x32xf32> to vector<16x32xf32>
    %189 = arith.addf %187, %188 : vector<16x32xf32>
    %c1_86 = arith.constant 1 : index
    %c0_87 = arith.constant 0 : index
    %c0_88 = arith.constant 0 : index
    %190 = vector.load %arg4[%c1_86, %c0_87, %c0_88] : memref<2x32x96xf32, #tpu.memory_space<vmem>>, vector<1x32x96xf32>
    %191 = vector.shape_cast %190 : vector<1x32x96xf32> to vector<32x96xf32>
    %cst_89 = arith.constant dense<0.000000e+00> : vector<16x96xf32>
    %192 = tpu.matmul %189, %191, %cst_89 {dimension_numbers = #tpu.dot_dimension_numbers<[1], [0], [0], [1], [0, 0, 1, 1], [], []>} : vector<16x32xf32>, vector<32x96xf32>, vector<16x96xf32> -> vector<16x96xf32>
    %c1_90 = arith.constant 1 : index
    %c0_91 = arith.constant 0 : index
    %c0_92 = arith.constant 0 : index
    %193 = vector.load %arg5[%c1_90, %c0_91, %c0_92] : memref<2x1x96xf32, #tpu.memory_space<vmem>>, vector<1x1x96xf32>
    %194 = vector.shape_cast %193 : vector<1x1x96xf32> to vector<1x96xf32>
    %195 = vector.broadcast %194 : vector<1x96xf32> to vector<16x96xf32>
    %196 = arith.addf %192, %195 : vector<16x96xf32>
    %197 = vector.extract_strided_slice %196 {offsets = [0, 0], sizes = [16, 32], strides = [1, 1]} : vector<16x96xf32> to vector<16x32xf32>
    %198 = vector.shape_cast %197 : vector<16x32xf32> to vector<2x8x32xf32>
    %199 = vector.extract_strided_slice %196 {offsets = [0, 32], sizes = [16, 32], strides = [1, 1]} : vector<16x96xf32> to vector<16x32xf32>
    %200 = vector.shape_cast %199 : vector<16x32xf32> to vector<2x8x32xf32>
    %201 = vector.extract_strided_slice %196 {offsets = [0, 64], sizes = [16, 32], strides = [1, 1]} : vector<16x96xf32> to vector<16x32xf32>
    %202 = vector.shape_cast %201 : vector<16x32xf32> to vector<2x8x32xf32>
    %cst_93 = arith.constant 0.000000e+00 : f32
    %203 = vector.broadcast %cst_93 : f32 to vector<2x8x32xf32>
    %c0_94 = arith.constant 0 : index
    %c0_95 = arith.constant 0 : index
    %c0_96 = arith.constant 0 : index
    %204 = vector.load %arg3[%c0_94, %c0_95, %c0_96] : memref<4x1x32xf32, #tpu.memory_space<vmem>>, vector<1x1x32xf32>
    %205 = vector.shape_cast %204 : vector<1x1x32xf32> to vector<1x32xf32>
    %206 = vector.shape_cast %205 : vector<1x32xf32> to vector<1x1x32xf32>
    %207 = vector.broadcast %206 : vector<1x1x32xf32> to vector<2x8x32xf32>
    %208 = arith.mulf %198, %207 : vector<2x8x32xf32>
    "tpu.trace_start"() <{level = 10 : i32, message = "bqd,bkd->bqk"}> : () -> ()
    %cst_97 = arith.constant dense<0.000000e+00> : vector<2x8x8xf32>
    %209 = tpu.matmul %208, %200, %cst_97 {dimension_numbers = #tpu.dot_dimension_numbers<[2], [2], [1], [1], [0, 0, 0, 1, 1, 1], [0], [0]>} : vector<2x8x32xf32>, vector<2x8x32xf32>, vector<2x8x8xf32> -> vector<2x8x8xf32>
    "tpu.trace_stop"() : () -> ()
    %cst_98 = arith.constant 0.353553385 : f32
    %210 = vector.broadcast %cst_98 : f32 to vector<2x8x8xf32>
    %211 = arith.mulf %209, %210 : vector<2x8x8xf32>
    %cst_99 = arith.constant dense<0xFF800000> : vector<2x8xf32>
    %212 = vector.multi_reduction <maximumf>, %211, %cst_99 [2] : vector<2x8x8xf32> to vector<2x8xf32>
    %213 = vector.shape_cast %212 : vector<2x8xf32> to vector<2x8x1xf32>
    %214 = vector.broadcast %213 : vector<2x8x1xf32> to vector<2x8x8xf32>
    %215 = arith.subf %211, %214 : vector<2x8x8xf32>
    %216 = math.exp %215 : vector<2x8x8xf32>
    %cst_100 = arith.constant dense<0.000000e+00> : vector<2x8xf32>
    %217 = vector.multi_reduction <add>, %216, %cst_100 [2] : vector<2x8x8xf32> to vector<2x8xf32>
    %218 = vector.shape_cast %217 : vector<2x8xf32> to vector<2x8x1xf32>
    %219 = vector.broadcast %218 : vector<2x8x1xf32> to vector<2x8x8xf32>
    %220 = arith.divf %216, %219 : vector<2x8x8xf32>
    "tpu.trace_start"() <{level = 10 : i32, message = "bqk,bkd->bqd"}> : () -> ()
    %cst_101 = arith.constant dense<0.000000e+00> : vector<2x8x32xf32>
    %221 = tpu.matmul %220, %202, %cst_101 {dimension_numbers = #tpu.dot_dimension_numbers<[2], [1], [1], [2], [0, 0, 0, 1, 1, 2], [0], [0]>} : vector<2x8x8xf32>, vector<2x8x32xf32>, vector<2x8x32xf32> -> vector<2x8x32xf32>
    "tpu.trace_stop"() : () -> ()
    %222 = vector.shape_cast %205 : vector<1x32xf32> to vector<1x1x32xf32>
    %223 = vector.broadcast %222 : vector<1x1x32xf32> to vector<2x8x32xf32>
    %224 = arith.mulf %221, %223 : vector<2x8x32xf32>
    %225 = arith.addf %203, %224 : vector<2x8x32xf32>
    %c1_102 = arith.constant 1 : index
    %c0_103 = arith.constant 0 : index
    %c0_104 = arith.constant 0 : index
    %226 = vector.load %arg3[%c1_102, %c0_103, %c0_104] : memref<4x1x32xf32, #tpu.memory_space<vmem>>, vector<1x1x32xf32>
    %227 = vector.shape_cast %226 : vector<1x1x32xf32> to vector<1x32xf32>
    %228 = vector.shape_cast %227 : vector<1x32xf32> to vector<1x1x32xf32>
    %229 = vector.broadcast %228 : vector<1x1x32xf32> to vector<2x8x32xf32>
    %230 = arith.mulf %198, %229 : vector<2x8x32xf32>
    "tpu.trace_start"() <{level = 10 : i32, message = "bqd,bkd->bqk"}> : () -> ()
    %cst_105 = arith.constant dense<0.000000e+00> : vector<2x8x8xf32>
    %231 = tpu.matmul %230, %200, %cst_105 {dimension_numbers = #tpu.dot_dimension_numbers<[2], [2], [1], [1], [0, 0, 0, 1, 1, 1], [0], [0]>} : vector<2x8x32xf32>, vector<2x8x32xf32>, vector<2x8x8xf32> -> vector<2x8x8xf32>
    "tpu.trace_stop"() : () -> ()
    %cst_106 = arith.constant 0.353553385 : f32
    %232 = vector.broadcast %cst_106 : f32 to vector<2x8x8xf32>
    %233 = arith.mulf %231, %232 : vector<2x8x8xf32>
    %cst_107 = arith.constant dense<0xFF800000> : vector<2x8xf32>
    %234 = vector.multi_reduction <maximumf>, %233, %cst_107 [2] : vector<2x8x8xf32> to vector<2x8xf32>
    %235 = vector.shape_cast %234 : vector<2x8xf32> to vector<2x8x1xf32>
    %236 = vector.broadcast %235 : vector<2x8x1xf32> to vector<2x8x8xf32>
    %237 = arith.subf %233, %236 : vector<2x8x8xf32>
    %238 = math.exp %237 : vector<2x8x8xf32>
    %cst_108 = arith.constant dense<0.000000e+00> : vector<2x8xf32>
    %239 = vector.multi_reduction <add>, %238, %cst_108 [2] : vector<2x8x8xf32> to vector<2x8xf32>
    %240 = vector.shape_cast %239 : vector<2x8xf32> to vector<2x8x1xf32>
    %241 = vector.broadcast %240 : vector<2x8x1xf32> to vector<2x8x8xf32>
    %242 = arith.divf %238, %241 : vector<2x8x8xf32>
    "tpu.trace_start"() <{level = 10 : i32, message = "bqk,bkd->bqd"}> : () -> ()
    %cst_109 = arith.constant dense<0.000000e+00> : vector<2x8x32xf32>
    %243 = tpu.matmul %242, %202, %cst_109 {dimension_numbers = #tpu.dot_dimension_numbers<[2], [1], [1], [2], [0, 0, 0, 1, 1, 2], [0], [0]>} : vector<2x8x8xf32>, vector<2x8x32xf32>, vector<2x8x32xf32> -> vector<2x8x32xf32>
    "tpu.trace_stop"() : () -> ()
    %244 = vector.shape_cast %227 : vector<1x32xf32> to vector<1x1x32xf32>
    %245 = vector.broadcast %244 : vector<1x1x32xf32> to vector<2x8x32xf32>
    %246 = arith.mulf %243, %245 : vector<2x8x32xf32>
    %247 = arith.addf %225, %246 : vector<2x8x32xf32>
    %c2_110 = arith.constant 2 : index
    %c0_111 = arith.constant 0 : index
    %c0_112 = arith.constant 0 : index
    %248 = vector.load %arg3[%c2_110, %c0_111, %c0_112] : memref<4x1x32xf32, #tpu.memory_space<vmem>>, vector<1x1x32xf32>
    %249 = vector.shape_cast %248 : vector<1x1x32xf32> to vector<1x32xf32>
    %250 = vector.shape_cast %249 : vector<1x32xf32> to vector<1x1x32xf32>
    %251 = vector.broadcast %250 : vector<1x1x32xf32> to vector<2x8x32xf32>
    %252 = arith.mulf %198, %251 : vector<2x8x32xf32>
    "tpu.trace_start"() <{level = 10 : i32, message = "bqd,bkd->bqk"}> : () -> ()
    %cst_113 = arith.constant dense<0.000000e+00> : vector<2x8x8xf32>
    %253 = tpu.matmul %252, %200, %cst_113 {dimension_numbers = #tpu.dot_dimension_numbers<[2], [2], [1], [1], [0, 0, 0, 1, 1, 1], [0], [0]>} : vector<2x8x32xf32>, vector<2x8x32xf32>, vector<2x8x8xf32> -> vector<2x8x8xf32>
    "tpu.trace_stop"() : () -> ()
    %cst_114 = arith.constant 0.353553385 : f32
    %254 = vector.broadcast %cst_114 : f32 to vector<2x8x8xf32>
    %255 = arith.mulf %253, %254 : vector<2x8x8xf32>
    %cst_115 = arith.constant dense<0xFF800000> : vector<2x8xf32>
    %256 = vector.multi_reduction <maximumf>, %255, %cst_115 [2] : vector<2x8x8xf32> to vector<2x8xf32>
    %257 = vector.shape_cast %256 : vector<2x8xf32> to vector<2x8x1xf32>
    %258 = vector.broadcast %257 : vector<2x8x1xf32> to vector<2x8x8xf32>
    %259 = arith.subf %255, %258 : vector<2x8x8xf32>
    %260 = math.exp %259 : vector<2x8x8xf32>
    %cst_116 = arith.constant dense<0.000000e+00> : vector<2x8xf32>
    %261 = vector.multi_reduction <add>, %260, %cst_116 [2] : vector<2x8x8xf32> to vector<2x8xf32>
    %262 = vector.shape_cast %261 : vector<2x8xf32> to vector<2x8x1xf32>
    %263 = vector.broadcast %262 : vector<2x8x1xf32> to vector<2x8x8xf32>
    %264 = arith.divf %260, %263 : vector<2x8x8xf32>
    "tpu.trace_start"() <{level = 10 : i32, message = "bqk,bkd->bqd"}> : () -> ()
    %cst_117 = arith.constant dense<0.000000e+00> : vector<2x8x32xf32>
    %265 = tpu.matmul %264, %202, %cst_117 {dimension_numbers = #tpu.dot_dimension_numbers<[2], [1], [1], [2], [0, 0, 0, 1, 1, 2], [0], [0]>} : vector<2x8x8xf32>, vector<2x8x32xf32>, vector<2x8x32xf32> -> vector<2x8x32xf32>
    "tpu.trace_stop"() : () -> ()
    %266 = vector.shape_cast %249 : vector<1x32xf32> to vector<1x1x32xf32>
    %267 = vector.broadcast %266 : vector<1x1x32xf32> to vector<2x8x32xf32>
    %268 = arith.mulf %265, %267 : vector<2x8x32xf32>
    %269 = arith.addf %247, %268 : vector<2x8x32xf32>
    %c3_118 = arith.constant 3 : index
    %c0_119 = arith.constant 0 : index
    %c0_120 = arith.constant 0 : index
    %270 = vector.load %arg3[%c3_118, %c0_119, %c0_120] : memref<4x1x32xf32, #tpu.memory_space<vmem>>, vector<1x1x32xf32>
    %271 = vector.shape_cast %270 : vector<1x1x32xf32> to vector<1x32xf32>
    %272 = vector.shape_cast %271 : vector<1x32xf32> to vector<1x1x32xf32>
    %273 = vector.broadcast %272 : vector<1x1x32xf32> to vector<2x8x32xf32>
    %274 = arith.mulf %198, %273 : vector<2x8x32xf32>
    "tpu.trace_start"() <{level = 10 : i32, message = "bqd,bkd->bqk"}> : () -> ()
    %cst_121 = arith.constant dense<0.000000e+00> : vector<2x8x8xf32>
    %275 = tpu.matmul %274, %200, %cst_121 {dimension_numbers = #tpu.dot_dimension_numbers<[2], [2], [1], [1], [0, 0, 0, 1, 1, 1], [0], [0]>} : vector<2x8x32xf32>, vector<2x8x32xf32>, vector<2x8x8xf32> -> vector<2x8x8xf32>
    "tpu.trace_stop"() : () -> ()
    %cst_122 = arith.constant 0.353553385 : f32
    %276 = vector.broadcast %cst_122 : f32 to vector<2x8x8xf32>
    %277 = arith.mulf %275, %276 : vector<2x8x8xf32>
    %cst_123 = arith.constant dense<0xFF800000> : vector<2x8xf32>
    %278 = vector.multi_reduction <maximumf>, %277, %cst_123 [2] : vector<2x8x8xf32> to vector<2x8xf32>
    %279 = vector.shape_cast %278 : vector<2x8xf32> to vector<2x8x1xf32>
    %280 = vector.broadcast %279 : vector<2x8x1xf32> to vector<2x8x8xf32>
    %281 = arith.subf %277, %280 : vector<2x8x8xf32>
    %282 = math.exp %281 : vector<2x8x8xf32>
    %cst_124 = arith.constant dense<0.000000e+00> : vector<2x8xf32>
    %283 = vector.multi_reduction <add>, %282, %cst_124 [2] : vector<2x8x8xf32> to vector<2x8xf32>
    %284 = vector.shape_cast %283 : vector<2x8xf32> to vector<2x8x1xf32>
    %285 = vector.broadcast %284 : vector<2x8x1xf32> to vector<2x8x8xf32>
    %286 = arith.divf %282, %285 : vector<2x8x8xf32>
    "tpu.trace_start"() <{level = 10 : i32, message = "bqk,bkd->bqd"}> : () -> ()
    %cst_125 = arith.constant dense<0.000000e+00> : vector<2x8x32xf32>
    %287 = tpu.matmul %286, %202, %cst_125 {dimension_numbers = #tpu.dot_dimension_numbers<[2], [1], [1], [2], [0, 0, 0, 1, 1, 2], [0], [0]>} : vector<2x8x8xf32>, vector<2x8x32xf32>, vector<2x8x32xf32> -> vector<2x8x32xf32>
    "tpu.trace_stop"() : () -> ()
    %288 = vector.shape_cast %271 : vector<1x32xf32> to vector<1x1x32xf32>
    %289 = vector.broadcast %288 : vector<1x1x32xf32> to vector<2x8x32xf32>
    %290 = arith.mulf %287, %289 : vector<2x8x32xf32>
    %291 = arith.addf %269, %290 : vector<2x8x32xf32>
    %292 = vector.shape_cast %291 : vector<2x8x32xf32> to vector<16x32xf32>
    %c1_126 = arith.constant 1 : index
    %c0_127 = arith.constant 0 : index
    %c0_128 = arith.constant 0 : index
    %293 = vector.load %arg6[%c1_126, %c0_127, %c0_128] : memref<2x32x32xf32, #tpu.memory_space<vmem>>, vector<1x32x32xf32>
    %294 = vector.shape_cast %293 : vector<1x32x32xf32> to vector<32x32xf32>
    %cst_129 = arith.constant dense<0.000000e+00> : vector<16x32xf32>
    %295 = tpu.matmul %292, %294, %cst_129 {dimension_numbers = #tpu.dot_dimension_numbers<[1], [0], [0], [1], [0, 0, 1, 1], [], []>} : vector<16x32xf32>, vector<32x32xf32>, vector<16x32xf32> -> vector<16x32xf32>
    %c1_130 = arith.constant 1 : index
    %c0_131 = arith.constant 0 : index
    %c0_132 = arith.constant 0 : index
    %296 = vector.load %arg7[%c1_130, %c0_131, %c0_132] : memref<2x1x32xf32, #tpu.memory_space<vmem>>, vector<1x1x32xf32>
    %297 = vector.shape_cast %296 : vector<1x1x32xf32> to vector<1x32xf32>
    %298 = vector.broadcast %297 : vector<1x32xf32> to vector<16x32xf32>
    %299 = arith.addf %295, %298 : vector<16x32xf32>
    %300 = arith.addf %189, %299 : vector<16x32xf32>
    %c1_133 = arith.constant 1 : index
    %c0_134 = arith.constant 0 : index
    %c0_135 = arith.constant 0 : index
    %301 = vector.load %arg8[%c1_133, %c0_134, %c0_135] : memref<2x1x32xf32, #tpu.memory_space<vmem>>, vector<1x1x32xf32>
    %302 = vector.shape_cast %301 : vector<1x1x32xf32> to vector<1x32xf32>
    %c1_136 = arith.constant 1 : index
    %c0_137 = arith.constant 0 : index
    %c0_138 = arith.constant 0 : index
    %303 = vector.load %arg9[%c1_136, %c0_137, %c0_138] : memref<2x1x32xf32, #tpu.memory_space<vmem>>, vector<1x1x32xf32>
    %304 = vector.shape_cast %303 : vector<1x1x32xf32> to vector<1x32xf32>
    %cst_139 = arith.constant dense<0.000000e+00> : vector<16xf32>
    %305 = vector.multi_reduction <add>, %300, %cst_139 [1] : vector<16x32xf32> to vector<16xf32>
    %306 = vector.shape_cast %305 : vector<16xf32> to vector<16x1xf32>
    %cst_140 = arith.constant 3.200000e+01 : f32
    %307 = vector.broadcast %cst_140 : f32 to vector<16x1xf32>
    %308 = arith.divf %306, %307 : vector<16x1xf32>
    %309 = vector.broadcast %308 : vector<16x1xf32> to vector<16x32xf32>
    %310 = arith.subf %300, %309 : vector<16x32xf32>
    %311 = arith.mulf %310, %310 : vector<16x32xf32>
    %cst_141 = arith.constant dense<0.000000e+00> : vector<16xf32>
    %312 = vector.multi_reduction <add>, %311, %cst_141 [1] : vector<16x32xf32> to vector<16xf32>
    %313 = vector.shape_cast %312 : vector<16xf32> to vector<16x1xf32>
    %cst_142 = arith.constant 3.200000e+01 : f32
    %314 = vector.broadcast %cst_142 : f32 to vector<16x1xf32>
    %315 = arith.divf %313, %314 : vector<16x1xf32>
    %cst_143 = arith.constant 9.99999974E-6 : f32
    %316 = vector.broadcast %cst_143 : f32 to vector<16x1xf32>
    %317 = arith.addf %315, %316 : vector<16x1xf32>
    %318 = math.rsqrt %317 : vector<16x1xf32>
    %319 = vector.broadcast %318 : vector<16x1xf32> to vector<16x32xf32>
    %320 = arith.mulf %310, %319 : vector<16x32xf32>
    %321 = vector.broadcast %302 : vector<1x32xf32> to vector<16x32xf32>
    %322 = arith.mulf %320, %321 : vector<16x32xf32>
    %323 = vector.broadcast %304 : vector<1x32xf32> to vector<16x32xf32>
    %324 = arith.addf %322, %323 : vector<16x32xf32>
    %325 = arith.truncf %324 : vector<16x32xf32> to vector<16x32xbf16>
    %c1_144 = arith.constant 1 : index
    %c0_145 = arith.constant 0 : index
    %c0_146 = arith.constant 0 : index
    %326 = vector.load %arg10[%c1_144, %c0_145, %c0_146] : memref<2x32x2048xbf16, #tpu.memory_space<vmem>>, vector<1x32x2048xbf16>
    %327 = vector.shape_cast %326 : vector<1x32x2048xbf16> to vector<32x2048xbf16>
    %cst_147 = arith.constant dense<0.000000e+00> : vector<16x2048xf32>
    %328 = tpu.matmul %325, %327, %cst_147 {dimension_numbers = #tpu.dot_dimension_numbers<[1], [0], [0], [1], [0, 0, 1, 1], [], []>} : vector<16x32xbf16>, vector<32x2048xbf16>, vector<16x2048xf32> -> vector<16x2048xf32>
    %c1_148 = arith.constant 1 : index
    %c0_149 = arith.constant 0 : index
    %c0_150 = arith.constant 0 : index
    %329 = vector.load %arg11[%c1_148, %c0_149, %c0_150] : memref<2x1x2048xf32, #tpu.memory_space<vmem>>, vector<1x1x2048xf32>
    %330 = vector.shape_cast %329 : vector<1x1x2048xf32> to vector<1x2048xf32>
    %331 = vector.broadcast %330 : vector<1x2048xf32> to vector<16x2048xf32>
    %332 = arith.addf %328, %331 : vector<16x2048xf32>
    %cst_151 = arith.constant 5.000000e-01 : f32
    %333 = vector.broadcast %cst_151 : f32 to vector<16x2048xf32>
    %334 = arith.mulf %333, %332 : vector<16x2048xf32>
    %cst_152 = arith.constant 0.707106769 : f32
    %335 = vector.broadcast %cst_152 : f32 to vector<16x2048xf32>
    %336 = arith.mulf %332, %335 : vector<16x2048xf32>
    %337 = math.erf %336 : vector<16x2048xf32>
    %cst_153 = arith.constant 1.000000e+00 : f32
    %338 = vector.broadcast %cst_153 : f32 to vector<16x2048xf32>
    %339 = arith.addf %338, %337 : vector<16x2048xf32>
    %340 = arith.mulf %334, %339 : vector<16x2048xf32>
    %341 = arith.truncf %340 : vector<16x2048xf32> to vector<16x2048xbf16>
    %c1_154 = arith.constant 1 : index
    %c0_155 = arith.constant 0 : index
    %c0_156 = arith.constant 0 : index
    %342 = vector.load %arg12[%c1_154, %c0_155, %c0_156] : memref<2x2048x32xbf16, #tpu.memory_space<vmem>>, vector<1x2048x32xbf16>
    %343 = vector.shape_cast %342 : vector<1x2048x32xbf16> to vector<2048x32xbf16>
    %cst_157 = arith.constant dense<0.000000e+00> : vector<16x32xf32>
    %344 = tpu.matmul %341, %343, %cst_157 {dimension_numbers = #tpu.dot_dimension_numbers<[1], [0], [0], [1], [0, 0, 1, 1], [], []>} : vector<16x2048xbf16>, vector<2048x32xbf16>, vector<16x32xf32> -> vector<16x32xf32>
    %c1_158 = arith.constant 1 : index
    %c0_159 = arith.constant 0 : index
    %c0_160 = arith.constant 0 : index
    %345 = vector.load %arg13[%c1_158, %c0_159, %c0_160] : memref<2x1x32xf32, #tpu.memory_space<vmem>>, vector<1x1x32xf32>
    %346 = vector.shape_cast %345 : vector<1x1x32xf32> to vector<1x32xf32>
    %347 = vector.broadcast %346 : vector<1x32xf32> to vector<16x32xf32>
    %348 = arith.addf %344, %347 : vector<16x32xf32>
    %349 = arith.addf %324, %348 : vector<16x32xf32>
    %c1_161 = arith.constant 1 : index
    %c0_162 = arith.constant 0 : index
    %c0_163 = arith.constant 0 : index
    %350 = vector.load %arg14[%c1_161, %c0_162, %c0_163] : memref<2x1x32xf32, #tpu.memory_space<vmem>>, vector<1x1x32xf32>
    %351 = vector.shape_cast %350 : vector<1x1x32xf32> to vector<1x32xf32>
    %c1_164 = arith.constant 1 : index
    %c0_165 = arith.constant 0 : index
    %c0_166 = arith.constant 0 : index
    %352 = vector.load %arg15[%c1_164, %c0_165, %c0_166] : memref<2x1x32xf32, #tpu.memory_space<vmem>>, vector<1x1x32xf32>
    %353 = vector.shape_cast %352 : vector<1x1x32xf32> to vector<1x32xf32>
    %cst_167 = arith.constant dense<0.000000e+00> : vector<16xf32>
    %354 = vector.multi_reduction <add>, %349, %cst_167 [1] : vector<16x32xf32> to vector<16xf32>
    %355 = vector.shape_cast %354 : vector<16xf32> to vector<16x1xf32>
    %cst_168 = arith.constant 3.200000e+01 : f32
    %356 = vector.broadcast %cst_168 : f32 to vector<16x1xf32>
    %357 = arith.divf %355, %356 : vector<16x1xf32>
    %358 = vector.broadcast %357 : vector<16x1xf32> to vector<16x32xf32>
    %359 = arith.subf %349, %358 : vector<16x32xf32>
    %360 = arith.mulf %359, %359 : vector<16x32xf32>
    %cst_169 = arith.constant dense<0.000000e+00> : vector<16xf32>
    %361 = vector.multi_reduction <add>, %360, %cst_169 [1] : vector<16x32xf32> to vector<16xf32>
    %362 = vector.shape_cast %361 : vector<16xf32> to vector<16x1xf32>
    %cst_170 = arith.constant 3.200000e+01 : f32
    %363 = vector.broadcast %cst_170 : f32 to vector<16x1xf32>
    %364 = arith.divf %362, %363 : vector<16x1xf32>
    %cst_171 = arith.constant 9.99999974E-6 : f32
    %365 = vector.broadcast %cst_171 : f32 to vector<16x1xf32>
    %366 = arith.addf %364, %365 : vector<16x1xf32>
    %367 = math.rsqrt %366 : vector<16x1xf32>
    %368 = vector.broadcast %367 : vector<16x1xf32> to vector<16x32xf32>
    %369 = arith.mulf %359, %368 : vector<16x32xf32>
    %370 = vector.broadcast %351 : vector<1x32xf32> to vector<16x32xf32>
    %371 = arith.mulf %369, %370 : vector<16x32xf32>
    %372 = vector.broadcast %353 : vector<1x32xf32> to vector<16x32xf32>
    %373 = arith.addf %371, %372 : vector<16x32xf32>
    %c0_172 = arith.constant 0 : index
    %c0_173 = arith.constant 0 : index
    %374 = vector.load %arg16[%c0_172, %c0_173] : memref<1x32xf32, #tpu.memory_space<vmem>>, vector<1x32xf32>
    %c0_174 = arith.constant 0 : index
    %c0_175 = arith.constant 0 : index
    %375 = vector.load %arg17[%c0_174, %c0_175] : memref<1x32xf32, #tpu.memory_space<vmem>>, vector<1x32xf32>
    %cst_176 = arith.constant dense<0.000000e+00> : vector<16xf32>
    %376 = vector.multi_reduction <add>, %373, %cst_176 [1] : vector<16x32xf32> to vector<16xf32>
    %377 = vector.shape_cast %376 : vector<16xf32> to vector<16x1xf32>
    %cst_177 = arith.constant 3.200000e+01 : f32
    %378 = vector.broadcast %cst_177 : f32 to vector<16x1xf32>
    %379 = arith.divf %377, %378 : vector<16x1xf32>
    %380 = vector.broadcast %379 : vector<16x1xf32> to vector<16x32xf32>
    %381 = arith.subf %373, %380 : vector<16x32xf32>
    %382 = arith.mulf %381, %381 : vector<16x32xf32>
    %cst_178 = arith.constant dense<0.000000e+00> : vector<16xf32>
    %383 = vector.multi_reduction <add>, %382, %cst_178 [1] : vector<16x32xf32> to vector<16xf32>
    %384 = vector.shape_cast %383 : vector<16xf32> to vector<16x1xf32>
    %cst_179 = arith.constant 3.200000e+01 : f32
    %385 = vector.broadcast %cst_179 : f32 to vector<16x1xf32>
    %386 = arith.divf %384, %385 : vector<16x1xf32>
    %cst_180 = arith.constant 9.99999974E-6 : f32
    %387 = vector.broadcast %cst_180 : f32 to vector<16x1xf32>
    %388 = arith.addf %386, %387 : vector<16x1xf32>
    %389 = math.rsqrt %388 : vector<16x1xf32>
    %390 = vector.broadcast %389 : vector<16x1xf32> to vector<16x32xf32>
    %391 = arith.mulf %381, %390 : vector<16x32xf32>
    %392 = vector.broadcast %374 : vector<1x32xf32> to vector<16x32xf32>
    %393 = arith.mulf %391, %392 : vector<16x32xf32>
    %394 = vector.broadcast %375 : vector<1x32xf32> to vector<16x32xf32>
    %395 = arith.addf %393, %394 : vector<16x32xf32>
    %c0_181 = arith.constant 0 : index
    %c0_182 = arith.constant 0 : index
    %396 = vector.load %arg18[%c0_181, %c0_182] : memref<32x64xf32, #tpu.memory_space<vmem>>, vector<32x64xf32>
    %cst_183 = arith.constant dense<0.000000e+00> : vector<16x64xf32>
    %397 = tpu.matmul %395, %396, %cst_183 {dimension_numbers = #tpu.dot_dimension_numbers<[1], [0], [0], [1], [0, 0, 1, 1], [], []>} : vector<16x32xf32>, vector<32x64xf32>, vector<16x64xf32> -> vector<16x64xf32>
    %c0_184 = arith.constant 0 : index
    %c0_185 = arith.constant 0 : index
    %398 = vector.load %arg19[%c0_184, %c0_185] : memref<1x64xf32, #tpu.memory_space<vmem>>, vector<1x64xf32>
    %399 = vector.broadcast %398 : vector<1x64xf32> to vector<16x64xf32>
    %400 = arith.addf %397, %399 : vector<16x64xf32>
    %401 = math.tanh %400 : vector<16x64xf32>
    %c0_186 = arith.constant 0 : index
    %c0_187 = arith.constant 0 : index
    %402 = vector.load %arg20[%c0_186, %c0_187] : memref<64x2xf32, #tpu.memory_space<vmem>>, vector<64x2xf32>
    %cst_188 = arith.constant dense<0.000000e+00> : vector<16x2xf32>
    %403 = tpu.matmul %401, %402, %cst_188 {dimension_numbers = #tpu.dot_dimension_numbers<[1], [0], [0], [1], [0, 0, 1, 1], [], []>} : vector<16x64xf32>, vector<64x2xf32>, vector<16x2xf32> -> vector<16x2xf32>
    %c0_189 = arith.constant 0 : index
    %c0_190 = arith.constant 0 : index
    %404 = vector.load %arg21[%c0_189, %c0_190] : memref<1x2xf32, #tpu.memory_space<vmem>>, vector<1x2xf32>
    %405 = vector.broadcast %404 : vector<1x2xf32> to vector<16x2xf32>
    %406 = arith.addf %403, %405 : vector<16x2xf32>
    %c0_191 = arith.constant 0 : index
    %c0_192 = arith.constant 0 : index
    %407 = vector.load %arg2[%c0_191, %c0_192] : memref<16x1xf32, #tpu.memory_space<vmem>>, vector<16x1xf32>
    %408 = vector.extract_strided_slice %406 {offsets = [0, 0], sizes = [16, 1], strides = [1, 1]} : vector<16x2xf32> to vector<16x1xf32>
    %cst_193 = arith.constant 1.000000e+00 : f32
    %409 = vector.broadcast %cst_193 : f32 to vector<16x1xf32>
    %410 = arith.subf %407, %409 : vector<16x1xf32>
    %cst_194 = arith.constant 1.000000e+04 : f32
    %411 = vector.broadcast %cst_194 : f32 to vector<16x1xf32>
    %412 = arith.mulf %410, %411 : vector<16x1xf32>
    %413 = arith.addf %408, %412 : vector<16x1xf32>
    %414 = vector.extract_strided_slice %406 {offsets = [0, 1], sizes = [16, 1], strides = [1, 1]} : vector<16x2xf32> to vector<16x1xf32>
    %415 = arith.mulf %414, %407 : vector<16x1xf32>
    %416 = tpu.concatenate %413, %415 in 1 : vector<16x1xf32>, vector<16x1xf32> -> vector<16x2xf32>
    %c0_195 = arith.constant 0 : index
    %c0_196 = arith.constant 0 : index
    %417 = vector.load %arg22[%c0_195, %c0_196] : memref<16x2xf32, #tpu.memory_space<vmem>>, vector<16x2xf32>
    tpu.vector_store %arg22[%c0_195, %c0_196], %416 {strides = array<i32>} : memref<16x2xf32, #tpu.memory_space<vmem>>, vector<16x2xf32>,
    return
  }
}

</mosaic_0001>

<bundles_post_ra>
// kernel: squeeze.2
= control target key start
LH: loop header
LB: loop body
LE: loop exit
PB: predicated region body
PF: predicated region fallthrough
CT: control target
= control target key end

     0   :  { %s85_s0 = inlined_call_operand.vmem [shape: f32[16], index: 0, kind: input, shape index: {}]   ;;  %s86_s1 = inlined_call_operand.hbm [shape: f32[2,8], index: 1, kind: output, shape index: {}]  }
   0x1   :  { %v5_v0 = vld [vmem:[%s85_s0] sm:$0x1] }
   0x2   :  { %2 = vsyncpa [#allocation1], 0  ;;  %6 = vst [vmem:[#allocation3] sm:$0x1] %v5_v0  ;;  %vm8_vm0 = vcmask 64512   ;;  %s58_s0 = smov 120  }
   0x3   :  { %s59_s8 = smov [#allocation0]  }
   0x4   :  { %s26_s9 = sshll.u32 %s59_s8, 4  ;;  %s27_s9 = int_to_ptr.vmem [resolvable:$true] %s26_s9 }
   0x5   :  { %s34_s10 = scalar_lea.vmem %s27_s9, 32  ;;  %p39_p1 = scmp.lt.s32.totalorder %s27_s9, %s27_s9 }
   0x6   :  { %p35_p0 = scmp.ne.s32.totalorder %s27_s9, %s34_s10  ;;  %p40_p2 = scmp.lt.s32.totalorder %s34_s10, %s34_s10 }
   0x8   :  { %p41_p3 = por %p40_p2, %p39_p1 }
   0x9   :  { %v10_v1 = vld [vmem:[#allocation3] sm:$0x1]  }
   0xa   :  { %v7_v2 = vld [vmem:[#allocation3] sm:$0x1]   ;;  %11 = vrot.lane.b32.xlu0 %v10_v1, %s58_s0  ;;  %p42_p4 = pnand %p41_p3, %p35_p0 }
   0xb   :  { %9 = vst.msk [vmem:[#allocation2] sm:$0x1] %vm8_vm0, %v7_v2  }
  0x7c   :  { %v12_v3 = vpop.permute.xlu0 %11  }
  0x7d   :  { %15 = vst.msk [vmem:[#allocation2 + $0x1] sm:$0x1] %vm8_vm0, %v12_v3  }
  0x84   :  { %v19_v4 = vld [vmem:[#allocation2] sm:$0x3] }
  0x85   :  { %21 = vst [vmem:[#allocation0] sm:$0x3] %v19_v4 }
  0x86   :  { %45 = shalt.err (!%p42_p4)
}
  0x87   :  { %s46_s13 = scalar_lea.hbm %s86_s1, 32 }
  0x88   :  { %p47_p5 = scmp.ne.s32.totalorder %s86_s1, %s46_s13  ;;  %p50_p6 = scmp.lt.u32.totalorder %s46_s13, %s86_s1 }
  0x8a   :  { %p52_p7 = pnand %p50_p6, %p47_p5 }
  0x8c   :  { %55 = shalt.err (!%p52_p7)
}
  0x8d   :  { %29 = dma.vmem_to_hbm [thread:$0]  %s27_s9, 32, %s86_s1, [#allocation1]  }
  0x8e   :  { %56 = dma.done.wait [#allocation1], 32  }
  0x8f   :  { %57 = vsyncadd [#allocation1], 4294967264 }
  0x90   :  { %31 = vsyncpa [#allocation1], 1 }

// kernel: ext_transformer_encoder.1
= control target key start
LH: loop header
LB: loop body
LE: loop exit
PB: predicated region body
PF: predicated region fallthrough
CT: control target
= control target key end

     0   :  { %vm88_vm0 = vcmask 261120   ;;  %v12150_v11 = vmov 0.0   ;;  %vm9852_vm1 = vmmov 0   ;;  %s12146_s23 = smov 96   ;;  %vm337_vm2 = vcmask 64512   ;;  %s12115_s4 = inlined_call_operand.vmem [shape: f32[2,32,96], index: 4, kind: input, shape index: {}]   ;;  %s12116_s0 = inlined_call_operand.vmem [shape: f32[2,8,32], index: 0, kind: input, shape index: {}]   ;;  %s12117_s1 = inlined_call_operand.vmem [shape: f32[8,32], index: 1, kind: input, shape index: {}]   ;;  %s12118_s5 = inlined_call_operand.vmem [shape: f32[2,1,96], index: 5, kind: input, shape index: {}]   ;;  %s12119_s3 = inlined_call_operand.vmem [shape: f32[4,1,32], index: 3, kind: input, shape index: {}]   ;;  %s12120_s6 = inlined_call_operand.vmem [shape: f32[2,32,32], index: 6, kind: input, shape index: {}]   ;;  %s12121_s7 = inlined_call_operand.vmem [shape: f32[2,1,32], index: 7, kind: input, shape index: {}]   ;;  %s12122_s10 = inlined_call_operand.vmem [shape: bf16[2,32,2048], index: 10, kind: input, shape index: {}]   ;;  %s12123_s12 = inlined_call_operand.vmem [shape: bf16[2,2048,32], index: 12, kind: input, shape index: {}]   ;;  %s12124_s8 = inlined_call_operand.vmem [shape: f32[2,1,32], index: 8, kind: input, shape index: {}]   ;;  %s12125_s9 = inlined_call_operand.vmem [shape: f32[2,1,32], index: 9, kind: input, shape index: {}]   ;;  %s12126_s11 = inlined_call_operand.vmem [shape: f32[2,1,2048], index: 11, kind: input, shape index: {}]   ;;  %s12127_s13 = inlined_call_operand.vmem [shape: f32[2,1,32], index: 13, kind: input, shape index: {}]   ;;  %s12128_s14 = inlined_call_operand.vmem [shape: f32[2,1,32], index: 14, kind: input, shape index: {}]   ;;  %s12129_s15 = inlined_call_operand.vmem [shape: f32[2,1,32], index: 15, kind: input, shape index: {}]   ;;  %s12130_s18 = inlined_call_operand.vmem [shape: f32[32,64], index: 18, kind: input, shape index: {}]   ;;  %s12131_s16 = inlined_call_operand.vmem [shape: f32[1,32], index: 16, kind: input, shape index: {}]   ;;  %s12132_s17 = inlined_call_operand.vmem [shape: f32[1,32], index: 17, kind: input, shape index: {}]   ;;  %s12133_s20 = inlined_call_operand.vmem [shape: f32[64,2], index: 20, kind: input, shape index: {}]   ;;  %s12134_s2 = inlined_call_operand.vmem [shape: f32[16,1], index: 2, kind: input, shape index: {}]   ;;  %s12135_s19 = inlined_call_operand.vmem [shape: f32[1,64], index: 19, kind: input, shape index: {}]   ;;  %s12136_s21 = inlined_call_operand.vmem [shape: f32[1,2], index: 21, kind: input, shape index: {}]   ;;  %s12137_s22 = inlined_call_operand.vmem [shape: f32[16,2], index: 22, kind: output, shape index: {}]  }
   0x1   :  { %12162 = sst [smem:[#allocation7_spill]] %s12115_s4  ;;  %9099 = vmatprep.subr.mxu1 %v12150_v11  ;;  %9101 = vmatprep.mubr.msk.f32.mxu1 %vm9852_vm1, %v12150_v11  ;;  %vm7782_vm3 = vcmask 523264   ;;  %vm7882_vm4 = vcmask 7168   ;;  %vm7885_vm5 = vcmask 15360  }
   0x2   :  { %12163 = sst [smem:[#allocation8_spill]] %s12116_s0  ;;  %s12169_s29 = sld [smem:[#allocation7_spill]] }
   0x3   :  { %12164 = sst [smem:[#allocation9_spill]] %s12117_s1  ;;  %s12170_s25 = sld [smem:[#allocation8_spill]] }
   0x4   :  { %12165 = sst [smem:[#allocation10_spill]] %s12118_s5  ;;  %s12171_s27 = sld [smem:[#allocation9_spill]] }
   0x5   :  { %12166 = sst [smem:[#allocation11_spill]] %s12119_s3  ;;  %s12172_s4 = sld [smem:[#allocation10_spill]] }
   0x6   :  { %12167 = sst [smem:[#allocation12_spill]] %s12120_s6  ;;  %s12173_s24 = sld [smem:[#allocation11_spill]] }
   0x7   :  { %12168 = sst [smem:[#allocation13_spill]] %s12121_s7  ;;  %s12144_s7 = smov 64  }
   0x8   :  { %v77_v0 = vld [vmem:[%s12169_s29] sm:$0xff]  ;;  %v78_v1 = vld [vmem:[%s12169_s29 + $0x8] sm:$0xff]  ;;  %v79_v2 = vld [vmem:[%s12169_s29 + $0x10] sm:$0xff]  ;;  %s12174_s0 = sld [smem:[#allocation12_spill]]  ;;  %s12175_s3 = sld [smem:[#allocation13_spill]] }
   0x9   :  { %v9317_v3 = vpack.c.bf16 %v78_v1, %v77_v0  ;;  %v80_v4 = vld [vmem:[%s12169_s29 + $0x18] sm:$0xff]  ;;  %v72_v5 = vld [vmem:[%s12170_s25] sm:$0xff]  ;;  %v73_v9 = vld [vmem:[%s12170_s25 + $0x8] sm:$0xff] }
   0xa   :  { %v9321_v6 = vpack.c.bf16 %v80_v4, %v79_v2  ;;  %v74_v7 = vld [vmem:[%s12171_s27] sm:$0xff] }
   0xb   :  { %9318 = vmatprep.subr.bf16.mxu0 %v9317_v3  ;;  %v9990_v8 = vadd.f32 %v74_v7, %v72_v5  ;;  %v9997_v10 = vadd.f32 %v74_v7, %v73_v9  ;;  %v7892_v12 = vld [vmem:[%s12172_s4] ss:$0 sm:$0xff] }
   0xc   :  { %9320 = vmatpush3.bf16.msra.mxu0 %v9317_v3  ;;  %v10021_v17 = vld [vmem:[%s12173_s24] ss:$0 sm:$0xff]  ;;  %v10062_v46 = vld [vmem:[%s12173_s24 + $0x1] ss:$0 sm:$0xff] }
   0xd   :  { %9322 = vmatprep.subr.bf16.mxu0 %v9321_v6  ;;  %9091 = vmatprep.mubr.msk.f32.mxu0 %vm88_vm0, %v9990_v8 }
  0x10   :  { %9324 = vmatpush3.bf16.msra.mxu0 %v9321_v6 }
  0x11   :  { %9094 = vmatprep.subr.mxu0 %v12150_v11 }
  0x13   :  { %9092 = vmatmul.mubr.msk.f32.vlgmr.msra.gmra.mrb[0].mxu0 %vm88_vm0, %v9997_v10 }
  0x14   :  { %9096 = vmatprep.mubr.msk.f32.mxu0 %vm9852_vm1, %v12150_v11 }
  0xe6   :  { %v9093_v13 = vpop.f32.mrb[0].mxu0 }
  0xe7   :  { %v161_v14 = vpop.f32.mrb[1].mxu0  ;;  %v10014_v16 = vadd.f32 %v9093_v13, %v7892_v12 }
  0xe8   :  { %v10010_v15 = vadd.f32 %v7892_v12, %v161_v14 }
  0xe9   :  { %v178_v21 = vmul.f32 %v10021_v17, %v10014_v16  ;;  %v525_v50 = vmul.f32 %v10062_v46, %v10014_v16 }
  0xea   :  { %180 = vrot.lane.b32.xlu0 %v10010_v15, %s12146_s23  ;;  %v177_v19 = vmul.f32 %v10021_v17, %v10010_v15  ;;  %v524_v49 = vmul.f32 %v10062_v46, %v10010_v15 }
  0xee   :  { %258 = vrot.lane.b32.xlu0 %v10014_v16, %s12146_s23  ;;  %s12184_s23 = smov 96  }
 0x15c   :  { %v10023_v18 = vpop.permute.xlu0 %180 }
 0x15d   :  { %9095 = vmatpush3.xpose.msk.msra.mxu0 %vm88_vm0, %v10023_v18 }
 0x15e   :  { %9104 = vmatprep.subr.mxu0 %v12150_v11 }
 0x160   :  { %v10030_v20 = vpop.permute.xlu0 %258  ;;  %9097 = vmatmul.mubr.msk.f32.vlgmr.msra.gmra.mrb[2].mxu0 %vm88_vm0, %v177_v19 }
 0x161   :  { %9100 = vmatpush3.xpose.msk.msra.mxu1 %vm88_vm0, %v10030_v20  ;;  %9106 = vmatprep.mubr.msk.f32.mxu0 %vm9852_vm1, %v12150_v11 }
 0x162   :  { %9109 = vmatprep.subr.mxu1 %v12150_v11 }
 0x164   :  { %9102 = vmatmul.mubr.msk.f32.vlgmr.msra.gmra.mrb[0].mxu1 %vm88_vm0, %v178_v21  ;;  %v10097_v21 = vld [vmem:[%s12173_s24 + $0x2] ss:$0 sm:$0xff] }
 0x165   :  { %9111 = vmatprep.mubr.msk.f32.mxu1 %vm9852_vm1, %v12150_v11 }
 0x233   :  { %v253_v22 = vpop.f32.mrb[2].mxu0 }
 0x234   :  { %v335_v23 = vmul.f32 0.35355338, %v253_v22  ;;  %v9098_v24 = vpop.f32.mrb[3].mxu0 }
 0x235   :  { %v854_v24 = vmul.f32 %v10097_v21, %v10010_v15 }
 0x236   :  { %v338_v25 = vsel %vm337_vm2, %v335_v23, -inf }
 0x237   :  { %v331_v26 = vpop.f32.mrb[0].mxu1  ;;  %339 = vmax.xlane.f32.xlu1 %v338_v25  ;;  %v855_v25 = vmul.f32 %v10097_v21, %v10014_v16 }
 0x238   :  { %v336_v27 = vmul.f32 0.35355338, %v331_v26  ;;  %v9103_v28 = vpop.f32.mrb[1].mxu1 }
 0x23a   :  { %v341_v29 = vsel %vm337_vm2, %v336_v27, -inf }
 0x23b   :  { %342 = vmax.xlane.f32.xlu1 %v341_v29 }
 0x2c4   :  { %v340_v30 = vpop.xlane.xlu1 %339 }
 0x2c5   :  { %v344_v31 = vsub.f32 %v335_v23, %v340_v30 }
 0x2c7   :  { %v346_v32 = vmul.f32 1.442695, %v344_v31 }
 0x2c8   :  { %v343_v33 = vpop.xlane.xlu1 %342 }
 0x2c9   :  { %9635 = vpow2.f32 %v346_v32  ;;  %v345_v34 = vsub.f32 %v336_v27, %v343_v33 }
 0x2cb   :  { %v348_v35 = vmul.f32 1.442695, %v345_v34 }
 0x2cd   :  { %9637 = vpow2.f32 %v348_v35 }
 0x2d3   :  { %v9636_v36 = vpop.eup %9635 }
 0x2d4   :  { %v350_v37 = vsel %vm337_vm2, %v9636_v36, 0.0 }
 0x2d5   :  { %351 = vadd.xlane.f32.xlu0 %v350_v37 }
 0x2d7   :  { %v9638_v38 = vpop.eup %9637 }
 0x2d8   :  { %v353_v39 = vsel %vm337_vm2, %v9638_v38, 0.0 }
 0x2d9   :  { %354 = vadd.xlane.f32.xlu1 %v353_v39 }
 0x2ea   :  { %360 = vrot.lane.b32.xlu1 %v10010_v15, %s12144_s7 }
 0x2ee   :  { %436 = vrot.lane.b32.xlu1 %v10014_v16, %s12144_s7  ;;  %s9856_s7 = smov 1  }
 0x362   :  { %v352_v40 = vpop.xlane.xlu0 %351 }
 0x363   :  { %9639 = vrcp.f32 %v352_v40 }
 0x366   :  { %v355_v41 = vpop.xlane.xlu1 %354 }
 0x367   :  { %9641 = vrcp.f32 %v355_v41 }
 0x36a   :  { %v10051_v42 = vpop.permute.xlu1 %360 }
 0x36b   :  { %9105 = vmatpush3.msra.mxu0 %v10051_v42 }
 0x36c   :  { %9114 = vmatprep.subr.mxu0 %v12150_v11 }
 0x36d   :  { %v9640_v43 = vpop.eup %9639 }
 0x36e   :  { %v357_v44 = vmul.f32 %v9640_v43, %v9636_v36  ;;  %v10055_v45 = vpop.permute.xlu1 %436 }
 0x36f   :  { %9110 = vmatpush3.msra.mxu1 %v10055_v45 }
 0x370   :  { %9107 = vmatmul.mubr.msk.f32.vlgmr.msra.gmra.mrb[4].mxu0 %vm337_vm2, %v357_v44  ;;  %9119 = vmatprep.subr.mxu1 %v12150_v11 }
 0x371   :  { %v9642_v47 = vpop.eup %9641  ;;  %9116 = vmatprep.mubr.msk.f32.mxu0 %vm9852_vm1, %v12150_v11 }
 0x372   :  { %v359_v48 = vmul.f32 %v9642_v47, %v9638_v38  ;;  %9115 = vmatpush3.xpose.msk.msra.mxu0 %vm88_vm0, %v10023_v18 }
 0x373   :  { %9124 = vmatprep.subr.mxu0 %v12150_v11 }
 0x374   :  { %9112 = vmatmul.mubr.msk.f32.vlgmr.msra.gmra.mrb[2].mxu1 %vm337_vm2, %v359_v48 }
 0x375   :  { %9117 = vmatmul.mubr.msk.f32.vlgmr.msra.gmra.mrb[6].mxu0 %vm88_vm0, %v524_v49  ;;  %9121 = vmatprep.mubr.msk.f32.mxu1 %vm9852_vm1, %v12150_v11 }
 0x376   :  { %9120 = vmatpush3.xpose.msk.msra.mxu1 %vm88_vm0, %v10030_v20  ;;  %9125 = vmatpush3.msra.mxu0 %v10051_v42 }
 0x377   :  { %9129 = vmatprep.subr.mxu1 %v12150_v11  ;;  %9126 = vmatprep.mubr.msk.f32.mxu0 %vm9852_vm1, %v12150_v11 }
 0x378   :  { %9134 = vmatprep.subr.mxu0 %v12150_v11 }
 0x379   :  { %9122 = vmatmul.mubr.msk.f32.vlgmr.msra.gmra.mrb[4].mxu1 %vm88_vm0, %v525_v50 }
 0x37a   :  { %9130 = vmatpush3.msra.mxu1 %v10055_v45  ;;  %9131 = vmatprep.mubr.msk.f32.mxu1 %vm9852_vm1, %v12150_v11 }
 0x37b   :  { %9139 = vmatprep.subr.mxu1 %v12150_v11 }
 0x443   :  { %v432_v51 = vpop.f32.mrb[4].mxu0 }
 0x444   :  { %v9108_v52 = vpop.f32.mrb[5].mxu0  ;;  %v512_v27 = vmul.f32 %v10021_v17, %v432_v51 }
 0x447   :  { %v508_v53 = vpop.f32.mrb[2].mxu1 }
 0x448   :  { %v9113_v54 = vpop.f32.mrb[3].mxu1  ;;  %v595_v55 = vpop.f32.mrb[6].mxu0  ;;  %v513_v33 = vmul.f32 %v10021_v17, %v508_v53 }
 0x449   :  { %v672_v56 = vmul.f32 0.35355338, %v595_v55  ;;  %v9118_v57 = vpop.f32.mrb[7].mxu0 }
 0x44b   :  { %v674_v58 = vsel %vm337_vm2, %v672_v56, -inf }
 0x44c   :  { %v668_v59 = vpop.f32.mrb[4].mxu1  ;;  %675 = vmax.xlane.f32.xlu1 %v674_v58 }
 0x44d   :  { %v673_v60 = vmul.f32 0.35355338, %v668_v59  ;;  %v9123_v61 = vpop.f32.mrb[5].mxu1  ;;  %v10136_v59 = vld [vmem:[%s12173_s24 + $0x3] ss:$0 sm:$0xff] }
 0x44f   :  { %v677_v62 = vsel %vm337_vm2, %v673_v60, -inf }
 0x450   :  { %678 = vmax.xlane.f32.xlu0 %v677_v62  ;;  %v1184_v62 = vmul.f32 %v10136_v59, %v10010_v15 }
 0x4d9   :  { %v676_v63 = vpop.xlane.xlu1 %675 }
 0x4da   :  { %v680_v0 = vsub.f32 %v672_v56, %v676_v63 }
 0x4dc   :  { %v682_v1 = vmul.f32 1.442695, %v680_v0 }
 0x4dd   :  { %v679_v2 = vpop.xlane.xlu0 %678 }
 0x4de   :  { %9643 = vpow2.f32 %v682_v1  ;;  %v681_v3 = vsub.f32 %v673_v60, %v679_v2 }
 0x4e0   :  { %v684_v4 = vmul.f32 1.442695, %v681_v3 }
 0x4e2   :  { %9645 = vpow2.f32 %v684_v4 }
 0x4e8   :  { %v9644_v5 = vpop.eup %9643 }
 0x4e9   :  { %v686_v6 = vsel %vm337_vm2, %v9644_v5, 0.0 }
 0x4ea   :  { %687 = vadd.xlane.f32.xlu0 %v686_v6 }
 0x4ec   :  { %v9646_v7 = vpop.eup %9645 }
 0x4ed   :  { %v689_v9 = vsel %vm337_vm2, %v9646_v7, 0.0 }
 0x4ee   :  { %690 = vadd.xlane.f32.xlu0 %v689_v9 }
 0x577   :  { %v688_v12 = vpop.xlane.xlu0 %687 }
 0x578   :  { %9647 = vrcp.f32 %v688_v12 }
 0x57b   :  { %v691_v13 = vpop.xlane.xlu0 %690 }
 0x57c   :  { %9649 = vrcp.f32 %v691_v13 }
 0x582   :  { %v9648_v14 = vpop.eup %9647 }
 0x583   :  { %v693_v19 = vmul.f32 %v9648_v14, %v9644_v5 }
 0x585   :  { %9127 = vmatmul.mubr.msk.f32.vlgmr.msra.gmra.mrb[8].mxu0 %vm337_vm2, %v693_v19 }
 0x586   :  { %v9650_v22 = vpop.eup %9649  ;;  %9135 = vmatpush3.xpose.msk.msra.mxu0 %vm88_vm0, %v10023_v18  ;;  %9136 = vmatprep.mubr.msk.f32.mxu0 %vm9852_vm1, %v12150_v11 }
 0x587   :  { %v695_v23 = vmul.f32 %v9650_v22, %v9646_v7  ;;  %9144 = vmatprep.subr.mxu0 %v12150_v11 }
 0x589   :  { %9132 = vmatmul.mubr.msk.f32.vlgmr.msra.gmra.mrb[6].mxu1 %vm337_vm2, %v695_v23  ;;  %9137 = vmatmul.mubr.msk.f32.vlgmr.msra.gmra.mrb[10].mxu0 %vm88_vm0, %v854_v24 }
 0x58a   :  { %9140 = vmatpush3.xpose.msk.msra.mxu1 %vm88_vm0, %v10030_v20  ;;  %9145 = vmatpush3.msra.mxu0 %v10051_v42 }
 0x58b   :  { %9141 = vmatprep.mubr.msk.f32.mxu1 %vm9852_vm1, %v12150_v11  ;;  %9149 = vmatprep.subr.mxu1 %v12150_v11 }
 0x58c   :  { %9146 = vmatprep.mubr.msk.f32.mxu0 %vm9852_vm1, %v12150_v11  ;;  %9154 = vmatprep.subr.mxu0 %v12150_v11 }
 0x58d   :  { %9142 = vmatmul.mubr.msk.f32.vlgmr.msra.gmra.mrb[8].mxu1 %vm88_vm0, %v855_v25 }
 0x58e   :  { %9150 = vmatpush3.msra.mxu1 %v10055_v45  ;;  %9151 = vmatprep.mubr.msk.f32.mxu1 %vm9852_vm1, %v12150_v11 }
 0x58f   :  { %9159 = vmatprep.subr.mxu1 %v12150_v11 }
 0x658   :  { %v765_v26 = vpop.f32.mrb[8].mxu0 }
 0x659   :  { %v842_v28 = vmul.f32 %v10062_v46, %v765_v26  ;;  %v9128_v29 = vpop.f32.mrb[9].mxu0 }
 0x65b   :  { %v844_v30 = vadd.f32 %v842_v28, %v512_v27 }
 0x65c   :  { %v838_v31 = vpop.f32.mrb[6].mxu1  ;;  %v925_v32 = vpop.f32.mrb[10].mxu0 }
 0x65d   :  { %v843_v34 = vmul.f32 %v10062_v46, %v838_v31  ;;  %v1002_v35 = vmul.f32 0.35355338, %v925_v32  ;;  %v9133_v36 = vpop.f32.mrb[7].mxu1  ;;  %v9138_v37 = vpop.f32.mrb[11].mxu0 }
 0x65e   :  { %v1508_v37 = vld [vmem:[%s12174_s0 + $0x10] sm:$0xff] }
 0x65f   :  { %v845_v38 = vadd.f32 %v843_v34, %v513_v33  ;;  %v1004_v39 = vsel %vm337_vm2, %v1002_v35, -inf  ;;  %v1506_v34 = vld [vmem:[%s12174_s0] sm:$0xff] }
 0x660   :  { %v998_v40 = vpop.f32.mrb[8].mxu1  ;;  %1005 = vmax.xlane.f32.xlu0 %v1004_v39 }
 0x661   :  { %v1003_v41 = vmul.f32 0.35355338, %v998_v40  ;;  %v9143_v43 = vpop.f32.mrb[9].mxu1 }
 0x663   :  { %v1007_v44 = vsel %vm337_vm2, %v1003_v41, -inf }
 0x664   :  { %1008 = vmax.xlane.f32.xlu0 %v1007_v44 }
 0x6ed   :  { %v1006_v47 = vpop.xlane.xlu0 %1005 }
 0x6ee   :  { %v1010_v48 = vsub.f32 %v1002_v35, %v1006_v47  ;;  %v1507_v35 = vld [vmem:[%s12174_s0 + $0x8] sm:$0xff] }
 0x6ef   :  { %v9325_v36 = vpack.c.bf16 %v1507_v35, %v1506_v34  ;;  %v7929_v35 = vld [vmem:[%s12124_s8] ss:$0 sm:$0xff] }
 0x6f0   :  { %v1012_v49 = vmul.f32 1.442695, %v1010_v48 }
 0x6f1   :  { %v1009_v50 = vpop.xlane.xlu0 %1008 }
 0x6f2   :  { %9651 = vpow2.f32 %v1012_v49  ;;  %v1011_v17 = vsub.f32 %v1003_v41, %v1009_v50 }
 0x6f4   :  { %v1014_v46 = vmul.f32 1.442695, %v1011_v17  ;;  %v7926_v17 = vld [vmem:[%s12175_s3] ss:$0 sm:$0xff] }
 0x6f6   :  { %9653 = vpow2.f32 %v1014_v46 }
 0x6fc   :  { %v9652_v51 = vpop.eup %9651 }
 0x6fd   :  { %v1016_v52 = vsel %vm337_vm2, %v9652_v51, 0.0 }
 0x6fe   :  { %1017 = vadd.xlane.f32.xlu0 %v1016_v52 }
 0x700   :  { %v9654_v53 = vpop.eup %9653 }
 0x701   :  { %v1019_v54 = vsel %vm337_vm2, %v9654_v53, 0.0 }
 0x702   :  { %1020 = vadd.xlane.f32.xlu0 %v1019_v54 }
 0x78b   :  { %v1018_v55 = vpop.xlane.xlu0 %1017 }
 0x78c   :  { %9655 = vrcp.f32 %v1018_v55 }
 0x78f   :  { %v1021_v56 = vpop.xlane.xlu0 %1020 }
 0x790   :  { %9657 = vrcp.f32 %v1021_v56 }
 0x796   :  { %v9656_v57 = vpop.eup %9655 }
 0x797   :  { %v1023_v58 = vmul.f32 %v9656_v57, %v9652_v51 }
 0x799   :  { %9147 = vmatmul.mubr.msk.f32.vlgmr.msra.gmra.mrb[12].mxu0 %vm337_vm2, %v1023_v58 }
 0x79a   :  { %v9658_v60 = vpop.eup %9657  ;;  %9155 = vmatpush3.xpose.msk.msra.mxu0 %vm88_vm0, %v10023_v18  ;;  %9156 = vmatprep.mubr.msk.f32.mxu0 %vm9852_vm1, %v12150_v11  ;;  %v1185_v18 = vmul.f32 %v10136_v59, %v10014_v16 }
 0x79b   :  { %v1025_v61 = vmul.f32 %v9658_v60, %v9654_v53  ;;  %9164 = vmatprep.subr.mxu0 %v12150_v11 }
 0x79d   :  { %9152 = vmatmul.mubr.msk.f32.vlgmr.msra.gmra.mrb[10].mxu1 %vm337_vm2, %v1025_v61  ;;  %9157 = vmatmul.mubr.msk.f32.vlgmr.msra.gmra.mrb[14].mxu0 %vm88_vm0, %v1184_v62 }
 0x79e   :  { %9160 = vmatpush3.xpose.msk.msra.mxu1 %vm88_vm0, %v10030_v20  ;;  %9165 = vmatpush3.msra.mxu0 %v10051_v42 }
 0x79f   :  { %9161 = vmatprep.mubr.msk.f32.mxu1 %vm9852_vm1, %v12150_v11  ;;  %9169 = vmatprep.subr.mxu1 %v12150_v11 }
 0x7a0   :  { %9166 = vmatprep.mubr.msk.f32.mxu0 %vm9852_vm1, %v12150_v11  ;;  %9326 = vmatprep.subr.bf16.mxu0 %v9325_v36 }
 0x7a1   :  { %9162 = vmatmul.mubr.msk.f32.vlgmr.msra.gmra.mrb[12].mxu1 %vm88_vm0, %v1185_v18 }
 0x7a2   :  { %9170 = vmatpush3.msra.mxu1 %v10055_v45  ;;  %9171 = vmatprep.mubr.msk.f32.mxu1 %vm9852_vm1, %v12150_v11 }
 0x86c   :  { %v1095_v15 = vpop.f32.mrb[12].mxu0 }
 0x86d   :  { %v1172_v20 = vmul.f32 %v10097_v21, %v1095_v15  ;;  %v9148_v42 = vpop.f32.mrb[13].mxu0 }
 0x86f   :  { %v1174_v63 = vadd.f32 %v1172_v20, %v844_v30 }
 0x870   :  { %v1168_v0 = vpop.f32.mrb[10].mxu1  ;;  %v1255_v1 = vpop.f32.mrb[14].mxu0 }
 0x871   :  { %v1173_v2 = vmul.f32 %v10097_v21, %v1168_v0  ;;  %v1332_v16 = vmul.f32 0.35355338, %v1255_v1  ;;  %v9153_v3 = vpop.f32.mrb[11].mxu1  ;;  %v9158_v4 = vpop.f32.mrb[15].mxu0  ;;  %v1647_v0 = vld [vmem:[%s12122_s10 + $0x8] sm:$0xff] }
 0x873   :  { %v1175_v5 = vadd.f32 %v1173_v2, %v845_v38  ;;  %v1334_v6 = vsel %vm337_vm2, %v1332_v16, -inf  ;;  %v1509_v38 = vld [vmem:[%s12174_s0 + $0x18] sm:$0xff]  ;;  %v1655_v2 = vld [vmem:[%s12122_s10 + $0x48] sm:$0xff] }
 0x874   :  { %v1328_v7 = vpop.f32.mrb[12].mxu1  ;;  %1335 = vmax.xlane.f32.xlu0 %v1334_v6  ;;  %v9329_v39 = vpack.c.bf16 %v1509_v38, %v1508_v37  ;;  %v7933_v3 = vcombine.low %v1647_v0, %v1655_v2  ;;  %v7934_v4 = vcombine.high %v1647_v0, %v1655_v2  ;;  %v1670_v6 = vld [vmem:[%s12122_s10 + $0xc0] sm:$0xff]  ;;  %v1661_v0 = vld [vmem:[%s12122_s10 + $0x78] sm:$0xff] }
 0x875   :  { %v1333_v45 = vmul.f32 0.35355338, %v1328_v7  ;;  %v9163_v9 = vpop.f32.mrb[13].mxu1  ;;  %v1663_v7 = vld [vmem:[%s12122_s10 + $0x88] sm:$0xff]  ;;  %v7930_v37 = vld [vmem:[%s12125_s9] ss:$0 sm:$0xff] }
 0x876   :  { %v1671_v9 = vld [vmem:[%s12122_s10 + $0xc8] sm:$0xff] }
 0x877   :  { %v1337_v12 = vsel %vm337_vm2, %v1333_v45, -inf }
 0x878   :  { %1338 = vmax.xlane.f32.xlu1 %v1337_v12 }
 0x901   :  { %v1336_v13 = vpop.xlane.xlu0 %1335 }
 0x902   :  { %v1340_v14 = vsub.f32 %v1332_v16, %v1336_v13  ;;  %v7949_v13 = vcombine.low %v1663_v7, %v1671_v9 }
 0x904   :  { %v1342_v19 = vmul.f32 1.442695, %v1340_v14  ;;  %v7950_v14 = vcombine.high %v1663_v7, %v1671_v9  ;;  %v1677_v7 = vld [vmem:[%s12122_s10 + $0xf8] sm:$0xff] }
 0x905   :  { %v1339_v22 = vpop.xlane.xlu1 %1338 }
 0x906   :  { %9659 = vpow2.f32 %v1342_v19  ;;  %v1341_v23 = vsub.f32 %v1333_v45, %v1339_v22  ;;  %v1648_v19 = vld [vmem:[%s12122_s10 + $0x10] sm:$0xff] }
 0x907   :  { %v1656_v22 = vld [vmem:[%s12122_s10 + $0x50] sm:$0xff] }
 0x908   :  { %v1344_v21 = vmul.f32 1.442695, %v1341_v23  ;;  %v1649_v23 = vld [vmem:[%s12122_s10 + $0x18] sm:$0xff] }
 0x90a   :  { %9661 = vpow2.f32 %v1344_v21  ;;  %v12148_v21 = vmov 0  }
 0x910   :  { %v9660_v24 = vpop.eup %9659 }
 0x911   :  { %v1346_v25 = vsel %vm337_vm2, %v9660_v24, 0.0 }
 0x912   :  { %1347 = vadd.xlane.f32.xlu0 %v1346_v25  ;;  %v1657_v25 = vld [vmem:[%s12122_s10 + $0x58] sm:$0xff] }
 0x914   :  { %v9662_v26 = vpop.eup %9661 }
 0x915   :  { %v1349_v27 = vsel %vm337_vm2, %v9662_v26, 0.0 }
 0x916   :  { %1350 = vadd.xlane.f32.xlu1 %v1349_v27  ;;  %v7937_v27 = vcombine.low %v1649_v23, %v1657_v25 }
 0x99f   :  { %v1348_v28 = vpop.xlane.xlu0 %1347 }
 0x9a0   :  { %9663 = vrcp.f32 %v1348_v28  ;;  %v7938_v28 = vcombine.high %v1649_v23, %v1657_v25  ;;  %v9380_v23 = vld [vmem:[%s12123_s12 + $0xc0] sm:$0xff]  }
 0x9a3   :  { %v1351_v29 = vpop.xlane.xlu1 %1350 }
 0x9a4   :  { %9665 = vrcp.f32 %v1351_v29 }
 0x9aa   :  { %v9664_v30 = vpop.eup %9663 }
 0x9ab   :  { %v1353_v31 = vmul.f32 %v9664_v30, %v9660_v24  ;;  %v7936_v24 = vcombine.high %v1648_v19, %v1656_v22 }
 0x9ad   :  { %9167 = vmatmul.mubr.msk.f32.vlgmr.msra.gmra.mrb[16].mxu0 %vm337_vm2, %v1353_v31 }
 0x9ae   :  { %v9666_v32 = vpop.eup %9665  ;;  %9328 = vmatpush3.bf16.msra.mxu0 %v9325_v36 }
 0x9af   :  { %v1355_v33 = vmul.f32 %v9666_v32, %v9662_v26  ;;  %9330 = vmatprep.subr.bf16.mxu0 %v9329_v39  ;;  %v7935_v26 = vcombine.low %v1648_v19, %v1656_v22  ;;  %v9379_v22 = vld [vmem:[%s12123_s12 + $0x40] sm:$0xff]  }
 0x9b1   :  { %9172 = vmatmul.mubr.msk.f32.vlgmr.msra.gmra.mrb[14].mxu1 %vm337_vm2, %v1355_v33 }
 0x9b2   :  { %9332 = vmatpush3.bf16.msra.mxu0 %v9329_v39  ;;  %1957 = vmatprep.mubr.bf16.mxu1 %v12148_v21 }
 0x9b3   :  { %1968 = vmatprep.subr.bf16.mxu0 %v7934_v4  ;;  %v1668_v4 = vld [vmem:[%s12122_s10 + $0xb0] sm:$0xff] }
 0xa80   :  { %v1425_v40 = vpop.f32.mrb[16].mxu0 }
 0xa81   :  { %v1502_v41 = vmul.f32 %v10136_v59, %v1425_v40  ;;  %v9168_v43 = vpop.f32.mrb[17].mxu0 }
 0xa82   :  { %v1664_v43 = vld [vmem:[%s12122_s10 + $0x90] sm:$0xff] }
 0xa83   :  { %v1504_v44 = vadd.f32 %v1502_v41, %v1174_v63  ;;  %v1654_v63 = vld [vmem:[%s12122_s10 + $0x40] sm:$0xff] }
 0xa84   :  { %v1498_v47 = vpop.f32.mrb[14].mxu1 }
 0xa85   :  { %v1503_v48 = vmul.f32 %v10136_v59, %v1498_v47  ;;  %v9173_v49 = vpop.f32.mrb[15].mxu1  ;;  %9182 = vmatprep.mubr.msk.f32.mxu0 %vm88_vm0, %v1504_v44  ;;  %v1672_v44 = vld [vmem:[%s12122_s10 + $0xd0] sm:$0xff]  ;;  %v1665_v47 = vld [vmem:[%s12122_s10 + $0x98] sm:$0xff] }
 0xa87   :  { %v1505_v50 = vadd.f32 %v1503_v48, %v1175_v5  ;;  %v1662_v5 = vld [vmem:[%s12122_s10 + $0x80] sm:$0xff]  ;;  %v1673_v48 = vld [vmem:[%s12122_s10 + $0xd8] sm:$0xff] }
 0xa88   :  { %v7948_v45 = vcombine.high %v1662_v5, %v1670_v6  ;;  %v7947_v12 = vcombine.low %v1662_v5, %v1670_v6  ;;  %v1676_v5 = vld [vmem:[%s12122_s10 + $0xf0] sm:$0xff]  ;;  %v1669_v6 = vld [vmem:[%s12122_s10 + $0xb8] sm:$0xff] }
 0xa89   :  { %9183 = vmatmul.mubr.msk.f32.vlgmr.msra.gmra.mrb[18].mxu0 %vm88_vm0, %v1505_v50  ;;  %v7962_v19 = vcombine.high %v1669_v6, %v1677_v7  ;;  %v7961_v25 = vcombine.low %v1669_v6, %v1677_v7 }
 0xa8a   :  { %1969 = vmatpush1.bf16.msra.mxu0 %v7933_v3  ;;  %2000 = vmatprep.mubr.bf16.mxu0 %v12148_v21 }
 0xa8b   :  { %1970 = vmatprep.subr.bf16.mxu0 %v7950_v14  ;;  %v7960_v14 = vcombine.high %v1668_v4, %v1676_v5 }
 0xa8e   :  { %1971 = vmatpush1.bf16.msra.mxu0 %v7949_v13 }
 0xa8f   :  { %2054 = vmatprep.subr.bf16.mxu0 %v7938_v28  ;;  %v9383_v28 = vld [vmem:[%s12123_s12 + $0x48] sm:$0xff]  }
 0xb5c   :  { %v9184_v46 = vpop.f32.mrb[18].mxu0 }
 0xb5d   :  { %v1595_v51 = vadd.f32 %v9184_v46, %v7926_v17  ;;  %v1589_v52 = vpop.f32.mrb[19].mxu0  ;;  %v1650_v46 = vld [vmem:[%s12122_s10 + $0x20] sm:$0xff] }
 0xb5e   :  { %v1590_v53 = vadd.f32 %v7926_v17, %v1589_v52  ;;  %v1651_v52 = vld [vmem:[%s12122_s10 + $0x28] sm:$0xff] }
 0xb5f   :  { %v1599_v54 = vadd.f32 %v1595_v51, %v9997_v10  ;;  %v1658_v51 = vld [vmem:[%s12122_s10 + $0x60] sm:$0xff] }
 0xb60   :  { %v1598_v55 = vadd.f32 %v1590_v53, %v9990_v8  ;;  %v1646_v8 = vld [vmem:[%s12122_s10] sm:$0xff]  ;;  %v1659_v53 = vld [vmem:[%s12122_s10 + $0x68] sm:$0xff] }
 0xb61   :  { %v1605_v56 = vsel %vm88_vm0, %v1599_v54, 0.0  ;;  %v7932_v1 = vcombine.high %v1646_v8, %v1654_v63  ;;  %v7931_v16 = vcombine.low %v1646_v8, %v1654_v63  ;;  %v1660_v8 = vld [vmem:[%s12122_s10 + $0x70] sm:$0xff]  ;;  %v1653_v63 = vld [vmem:[%s12122_s10 + $0x38] sm:$0xff] }
 0xb62   :  { %1606 = vadd.xlane.f32.xlu1 %v1605_v56  ;;  %v1602_v57 = vsel %vm88_vm0, %v1598_v55, 0.0  ;;  %v7954_v56 = vcombine.high %v1665_v47, %v1673_v48  ;;  %v7946_v9 = vcombine.high %v1653_v63, %v1661_v0  ;;  %v7945_v13 = vcombine.low %v1653_v63, %v1661_v0 }
 0xb63   :  { %1603 = vadd.xlane.f32.xlu0 %v1602_v57  ;;  %1925 = vmatprep.subr.bf16.mxu1 %v7932_v1  ;;  %v7951_v57 = vcombine.low %v1664_v43, %v1672_v44 }
 0xb64   :  { %1926 = vmatpush1.bf16.msra.mxu1 %v7931_v16 }
 0xb65   :  { %1927 = vmatprep.subr.bf16.mxu1 %v7948_v45 }
 0xb68   :  { %1928 = vmatpush1.bf16.msra.mxu1 %v7947_v12 }
 0xb69   :  { %2011 = vmatprep.subr.bf16.mxu1 %v7936_v24  ;;  %v7959_v24 = vcombine.low %v1668_v4, %v1676_v5 }
 0xbef   :  { %v1607_v58 = vpop.xlane.xlu1 %1606 }
 0xbf0   :  { %v1610_v59 = vmul.f32 0.03125, %v1607_v58  ;;  %v1604_v60 = vpop.xlane.xlu0 %1603  ;;  %v7953_v58 = vcombine.low %v1665_v47, %v1673_v48  ;;  %v9399_v47 = vld [vmem:[%s12123_s12 + $0x68] sm:$0xff]  }
 0xbf1   :  { %v1609_v61 = vmul.f32 0.03125, %v1604_v60  ;;  %v1674_v60 = vld [vmem:[%s12122_s10 + $0xe0] sm:$0xff]  ;;  %v9400_v48 = vld [vmem:[%s12123_s12 + $0xe8] sm:$0xff]  }
 0xbf2   :  { %v1612_v62 = vsub.f32 %v1599_v54, %v1610_v59  ;;  %v1666_v59 = vld [vmem:[%s12122_s10 + $0xa0] sm:$0xff] }
 0xbf3   :  { %v1611_v18 = vsub.f32 %v1598_v55, %v1609_v61  ;;  %v7952_v55 = vcombine.high %v1664_v43, %v1672_v44  ;;  %v1667_v61 = vld [vmem:[%s12122_s10 + $0xa8] sm:$0xff]  ;;  %v7956_v1 = vcombine.high %v1666_v59, %v1674_v60  ;;  %v7955_v16 = vcombine.low %v1666_v59, %v1674_v60  ;;  %v9397_v43 = vld [vmem:[%s12123_s12 + $0x20] sm:$0xff]  }
 0xbf4   :  { %v1614_v15 = vmul.f32 %v1612_v62, %v1612_v62  ;;  %v9398_v44 = vld [vmem:[%s12123_s12 + $0xa0] sm:$0xff]  }
 0xbf5   :  { %v1613_v20 = vmul.f32 %v1611_v18, %v1611_v18  ;;  %v9411_v59 = vld [vmem:[%s12123_s12 + $0x140] sm:$0xff]  }
 0xbf6   :  { %v1618_v42 = vsel %vm88_vm0, %v1614_v15, 0.0  ;;  %v7942_v15 = vcombine.high %v1651_v52, %v1659_v53  ;;  %v9412_v60 = vld [vmem:[%s12123_s12 + $0x1c0] sm:$0xff]  }
 0xbf7   :  { %1619 = vadd.xlane.f32.xlu1 %v1618_v42  ;;  %v1615_v10 = vsel %vm88_vm0, %v1613_v20, 0.0  ;;  %v7939_v20 = vcombine.low %v1650_v46, %v1658_v51  ;;  %v7941_v42 = vcombine.low %v1651_v52, %v1659_v53  ;;  %v9404_v52 = vld [vmem:[%s12123_s12 + $0xf0] sm:$0xff]  }
 0xbf8   :  { %1616 = vadd.xlane.f32.xlu0 %v1615_v10  ;;  %v1652_v10 = vld [vmem:[%s12122_s10 + $0x30] sm:$0xff] }
 0xbf9   :  { %v7944_v45 = vcombine.high %v1652_v10, %v1660_v8  ;;  %v7943_v12 = vcombine.low %v1652_v10, %v1660_v8  ;;  %v9405_v53 = vld [vmem:[%s12123_s12 + $0x30] sm:$0xff]  }
 0xc84   :  { %v1620_v29 = vpop.xlane.xlu1 %1619 }
 0xc85   :  { %v1622_v30 = vmul.f32 0.03125, %v1620_v29  ;;  %v1617_v31 = vpop.xlane.xlu0 %1616  ;;  %v9384_v29 = vld [vmem:[%s12123_s12 + $0xc8] sm:$0xff]  }
 0xc86   :  { %v1621_v32 = vmul.f32 0.03125, %v1617_v31  ;;  %v9386_v31 = vld [vmem:[%s12123_s12 + $0x88] sm:$0xff]  }
 0xc87   :  { %v1624_v33 = vadd.f32 1e-05, %v1622_v30  ;;  %v9385_v30 = vld [vmem:[%s12123_s12 + $0x8] sm:$0xff]  }
 0xc88   :  { %v1623_v34 = vadd.f32 1e-05, %v1621_v32  ;;  %v9387_v32 = vld [vmem:[%s12123_s12 + $0x50] sm:$0xff]  }
 0xc89   :  { %9667 = vrsqrt.f32 %v1624_v33  ;;  %v9388_v33 = vld [vmem:[%s12123_s12 + $0xd0] sm:$0xff]  }
 0xc8a   :  { %9669 = vrsqrt.f32 %v1623_v34  ;;  %v9389_v34 = vld [vmem:[%s12123_s12 + $0x10] sm:$0xff]  }
 0xc93   :  { %v9668_v36 = vpop.eup %9667 }
 0xc94   :  { %v9670_v38 = vpop.eup %9669  ;;  %v1628_v39 = vmul.f32 %v9668_v36, %v1612_v62  ;;  %v1675_v62 = vld [vmem:[%s12122_s10 + $0xe8] sm:$0xff]  ;;  %v9391_v36 = vld [vmem:[%s12123_s12 + $0x58] sm:$0xff]  }
 0xc95   :  { %v1627_v40 = vmul.f32 %v9670_v38, %v1611_v18  ;;  %v7940_v18 = vcombine.high %v1650_v46, %v1658_v51  ;;  %v7958_v2 = vcombine.high %v1667_v61, %v1675_v62  ;;  %v7957_v3 = vcombine.low %v1667_v61, %v1675_v62  ;;  %v9393_v38 = vld [vmem:[%s12123_s12 + $0x18] sm:$0xff]   ;;  %v9402_v46 = vld [vmem:[%s12123_s12 + $0xa8] sm:$0xff]   ;;  %v9403_v51 = vld [vmem:[%s12123_s12 + $0x70] sm:$0xff]  }
 0xc96   :  { %v1636_v41 = vmul.f32 %v7929_v35, %v1628_v39  ;;  %v9394_v39 = vld [vmem:[%s12123_s12 + $0x98] sm:$0xff]   ;;  %v1682_v61 = vlaneseq }
 0xc97   :  { %v1635_v49 = vmul.f32 %v7929_v35, %v1627_v40  ;;  %v9390_v35 = vld [vmem:[%s12123_s12 + $0x90] sm:$0xff]   ;;  %v9395_v40 = vld [vmem:[%s12123_s12 + $0x60] sm:$0xff]  }
 0xc98   :  { %v10251_v50 = vadd.f32 %v7930_v37, %v1636_v41  ;;  %v9396_v41 = vld [vmem:[%s12123_s12 + $0xe0] sm:$0xff]   ;;  %v1683_v62 = vshrl.u32 %v1682_v61, 7 }
 0xc99   :  { %v10253_v17 = vadd.f32 %v7930_v37, %v1635_v49  ;;  %v9392_v37 = vld [vmem:[%s12123_s12 + $0xd8] sm:$0xff]   ;;  %v9401_v49 = vld [vmem:[%s12123_s12 + $0x28] sm:$0xff]  }
 0xc9a   :  { %v10440_v10 = vsub.s32 3, %v1683_v62 }
 0xc9b   :  { %v10269_v54 = vpack.c.bf16 %v10251_v50, %v10253_v17 }
 0xc9c   :  { %12176 = vst [vmem:[#allocation2_spill] sm:$0xff] %v10440_v10 }
 0xc9d   :  { %7963 = vmatmul.mubr.msk.bf16.vlgmr.msra.gmra.mrb[16].mxu1 %vm88_vm0, %v10269_v54  ;;  %7964 = vmatmul.mubr.msk.bf16.vlgmr.msra.gmra.mrb[20].mxu0 %vm88_vm0, %v10269_v54 }
 0xc9e   :  { %2012 = vmatpush1.bf16.msra.mxu1 %v7935_v26  ;;  %2055 = vmatpush1.bf16.msra.mxu0 %v7937_v27  ;;  %v9381_v26 = vld [vmem:[%s12123_s12] sm:$0xff]  }
 0xc9f   :  { %2013 = vmatprep.subr.bf16.mxu1 %v7952_v55  ;;  %2056 = vmatprep.subr.bf16.mxu0 %v7954_v56  ;;  %v9382_v27 = vld [vmem:[%s12123_s12 + $0x80] sm:$0xff]   ;;  %v9407_v55 = vld [vmem:[%s12123_s12 + $0x78] sm:$0xff]  }
 0xca0   :  { %2043 = vmatprep.mubr.bf16.mxu1 %v12148_v21  ;;  %2086 = vmatprep.mubr.bf16.mxu0 %v12148_v21  ;;  %v9408_v56 = vld [vmem:[%s12123_s12 + $0xf8] sm:$0xff]  }
 0xca2   :  { %2014 = vmatpush1.bf16.msra.mxu1 %v7951_v57  ;;  %2057 = vmatpush1.bf16.msra.mxu0 %v7953_v58  ;;  %v9409_v57 = vld [vmem:[%s12123_s12 + $0x38] sm:$0xff]  }
 0xca3   :  { %2097 = vmatprep.subr.bf16.mxu1 %v7940_v18  ;;  %2140 = vmatprep.subr.bf16.mxu0 %v7942_v15  ;;  %v9410_v58 = vld [vmem:[%s12123_s12 + $0xb8] sm:$0xff]   ;;  %v10431_v18 = vsub.s32 0, %v1683_v62  ;;  %v10433_v15 = vsub.s32 2, %v1683_v62 }
 0xca5   :  { %7965 = vmatmul.mubr.msk.bf16.vlgmr.msra.gmra.mrb[20].mxu1 %vm88_vm0, %v10269_v54  ;;  %7966 = vmatmul.mubr.msk.bf16.vlgmr.msra.gmra.mrb[24].mxu0 %vm88_vm0, %v10269_v54 }
 0xca6   :  { %2098 = vmatpush1.bf16.msra.mxu1 %v7939_v20  ;;  %2141 = vmatpush1.bf16.msra.mxu0 %v7941_v42  ;;  %v1678_v20 = vld [vmem:[%s12126_s11] sm:$0xff]  ;;  %v10438_v42 = vsub.s32 1, %v1683_v62 }
 0xca7   :  { %2099 = vmatprep.subr.bf16.mxu1 %v7956_v1  ;;  %2142 = vmatprep.subr.bf16.mxu0 %v7958_v2  ;;  %v1685_v8 = vrot.slane %v1678_v20, %v10431_v18  ;;  %v1693_v63 = vrot.slane %v1678_v20, %v10433_v15  ;;  %v1697_v1 = vrot.slane %v1678_v20, %v10440_v10 }
 0xca8   :  { %2129 = vmatprep.mubr.bf16.mxu1 %v12148_v21  ;;  %2172 = vmatprep.mubr.bf16.mxu0 %v12148_v21  ;;  %v1689_v0 = vrot.slane %v1678_v20, %v10438_v42 }
 0xcaa   :  { %2100 = vmatpush1.bf16.msra.mxu1 %v7955_v16  ;;  %2143 = vmatpush1.bf16.msra.mxu0 %v7957_v3  ;;  %v10446_v3 = vsub.s32 4, %v1683_v62 }
 0xcab   :  { %2183 = vmatprep.subr.bf16.mxu1 %v7944_v45  ;;  %2226 = vmatprep.subr.bf16.mxu0 %v7946_v9  ;;  %v10448_v45 = vsub.s32 6, %v1683_v62 }
 0xcac   :  { %12177 = vst [vmem:[#allocation3_spill] sm:$0xff] %v10446_v3 }
 0xcad   :  { %7967 = vmatmul.mubr.msk.bf16.vlgmr.msra.gmra.mrb[24].mxu1 %vm88_vm0, %v10269_v54  ;;  %7968 = vmatmul.mubr.msk.bf16.vlgmr.msra.gmra.mrb[28].mxu0 %vm88_vm0, %v10269_v54  ;;  %12178 = vst [vmem:[#allocation4_spill] sm:$0xff] %v10448_v45 }
 0xcae   :  { %2184 = vmatpush1.bf16.msra.mxu1 %v7943_v12  ;;  %2227 = vmatpush1.bf16.msra.mxu0 %v7945_v13 }
 0xcaf   :  { %2185 = vmatprep.subr.bf16.mxu1 %v7960_v14  ;;  %2228 = vmatprep.subr.bf16.mxu0 %v7962_v19  ;;  %v10450_v19 = vsub.s32 5, %v1683_v62 }
 0xcb0   :  { %2215 = vmatprep.mubr.bf16.mxu1 %v12148_v21  ;;  %2258 = vmatprep.mubr.bf16.mxu0 %v12148_v21 }
 0xcb1   :  { %12179 = vst [vmem:[#allocation5_spill] sm:$0xff] %v10450_v19 }
 0xcb2   :  { %2186 = vmatpush1.bf16.msra.mxu1 %v7959_v24  ;;  %2229 = vmatpush1.bf16.msra.mxu0 %v7961_v25 }
 0xcb3   :  { %8671 = vmatprep.subr.bf16.mxu1 %v9379_v22  ;;  %8693 = vmatprep.subr.bf16.mxu0 %v9380_v23  ;;  %v10452_v22 = vsub.s32 7, %v1683_v62 }
 0xcb5   :  { %7969 = vmatmul.mubr.msk.bf16.vlgmr.msra.gmra.mrb[28].mxu1 %vm88_vm0, %v10269_v54  ;;  %7970 = vmatmul.mubr.msk.bf16.vlgmr.msra.gmra.mrb[32].mxu0 %vm88_vm0, %v10269_v54  ;;  %v9406_v54 = vld [vmem:[%s12123_s12 + $0xb0] sm:$0xff]   ;;  %12180 = vst [vmem:[#allocation6_spill] sm:$0xff] %v10452_v22 }
 0xcb6   :  { %8672 = vmatpush3.bf16.msra.mxu1 %v9381_v26  ;;  %8694 = vmatpush3.bf16.msra.mxu0 %v9382_v27  ;;  %v1701_v27 = vrot.slane %v1678_v20, %v10446_v3 }
 0xcb7   :  { %8673 = vmatprep.subr.bf16.mxu1 %v9383_v28  ;;  %8695 = vmatprep.subr.bf16.mxu0 %v9384_v29  ;;  %v1679_v28 = vld [vmem:[%s12126_s11 + $0x8] sm:$0xff] }
 0xcb8   :  { %v10479_v62 = vrot.slane %v1679_v28, %v10448_v45 }
 0xcba   :  { %8674 = vmatpush3.bf16.msra.mxu1 %v9385_v30  ;;  %8696 = vmatpush3.bf16.msra.mxu0 %v9386_v31 }
 0xcbb   :  { %8675 = vmatprep.subr.bf16.mxu1 %v9387_v32  ;;  %8697 = vmatprep.subr.bf16.mxu0 %v9388_v33  ;;  %v1709_v33 = vrot.slane %v1678_v20, %v10448_v45 }
 0xcbe   :  { %8676 = vmatpush3.bf16.msra.mxu1 %v9389_v34  ;;  %8698 = vmatpush3.bf16.msra.mxu0 %v9390_v35  ;;  %v1705_v35 = vrot.slane %v1678_v20, %v10450_v19 }
 0xcbf   :  { %8677 = vmatprep.subr.bf16.mxu1 %v9391_v36  ;;  %8699 = vmatprep.subr.bf16.mxu0 %v9392_v37  ;;  %v1713_v36 = vrot.slane %v1678_v20, %v10452_v22 }
 0xcc2   :  { %8678 = vmatpush3.bf16.msra.mxu1 %v9393_v38  ;;  %8700 = vmatpush3.bf16.msra.mxu0 %v9394_v39  ;;  %v10462_v39 = vrot.slane %v1679_v28, %v10431_v18 }
 0xcc3   :  { %8679 = vmatprep.subr.bf16.mxu1 %v9395_v40  ;;  %8701 = vmatprep.subr.bf16.mxu0 %v9396_v41 }
 0xcc6   :  { %8680 = vmatpush3.bf16.msra.mxu1 %v9397_v43  ;;  %8702 = vmatpush3.bf16.msra.mxu0 %v9398_v44  ;;  %v10465_v44 = vrot.slane %v1679_v28, %v10433_v15 }
 0xcc7   :  { %8681 = vmatprep.subr.bf16.mxu1 %v9399_v47  ;;  %8703 = vmatprep.subr.bf16.mxu0 %v9400_v48 }
 0xcca   :  { %8682 = vmatpush3.bf16.msra.mxu1 %v9401_v49  ;;  %8704 = vmatpush3.bf16.msra.mxu0 %v9402_v46  ;;  %v10468_v46 = vrot.slane %v1679_v28, %v10438_v42 }
 0xccb   :  { %8683 = vmatprep.subr.bf16.mxu1 %v9403_v51  ;;  %8705 = vmatprep.subr.bf16.mxu0 %v9404_v52  ;;  %v10471_v51 = vrot.slane %v1679_v28, %v10440_v10 }
 0xcce   :  { %8684 = vmatpush3.bf16.msra.mxu1 %v9405_v53  ;;  %8706 = vmatpush3.bf16.msra.mxu0 %v9406_v54 }
 0xccf   :  { %8685 = vmatprep.subr.bf16.mxu1 %v9407_v55  ;;  %8707 = vmatprep.subr.bf16.mxu0 %v9408_v56  ;;  %v10474_v56 = vrot.slane %v1679_v28, %v10446_v3 }
 0xcd2   :  { %8686 = vmatpush3.bf16.msra.mxu1 %v9409_v57  ;;  %8708 = vmatpush3.bf16.msra.mxu0 %v9410_v58 }
 0xcd3   :  { %8715 = vmatprep.subr.bf16.mxu1 %v9411_v59  ;;  %8737 = vmatprep.subr.bf16.mxu0 %v9412_v60 }
 0xd70   :  { %v1959_v2 = vpop.f32.mrb[16].mxu1  ;;  %v2002_v16 = vpop.f32.mrb[20].mxu0 }
 0xd71   :  { %v1960_v4 = vadd.f32 %v1959_v2, %v1685_v8  ;;  %v2003_v5 = vadd.f32 %v2002_v16, %v1693_v63  ;;  %v1961_v6 = vpop.f32.mrb[17].mxu1  ;;  %v2004_v7 = vpop.f32.mrb[21].mxu0 }
 0xd72   :  { %v1962_v9 = vadd.f32 %v1961_v6, %v1689_v0  ;;  %v2005_v12 = vadd.f32 %v2004_v7, %v1697_v1  ;;  %v1963_v13 = vpop.f32.mrb[18].mxu1  ;;  %v2006_v14 = vpop.f32.mrb[22].mxu0 }
 0xd73   :  { %v2301_v23 = vmul.f32 0.70710677, %v1960_v4  ;;  %v2303_v24 = vmul.f32 0.70710677, %v2003_v5  ;;  %v1964_v29 = vadd.f32 %v1963_v13, %v1685_v8  ;;  %v2007_v30 = vadd.f32 %v2006_v14, %v1693_v63  ;;  %v1965_v31 = vpop.f32.mrb[19].mxu1  ;;  %v2008_v32 = vpop.f32.mrb[23].mxu0 }
 0xd74   :  { %v2302_v25 = vmul.f32 0.70710677, %v1962_v9  ;;  %v2304_v26 = vmul.f32 0.70710677, %v2005_v12  ;;  %v1966_v34 = vadd.f32 %v1965_v31, %v1689_v0  ;;  %v2009_v38 = vadd.f32 %v2008_v32, %v1697_v1 }
 0xd75   :  { %9671 = verf.f32 %v2301_v23  ;;  %v2317_v37 = vmul.f32 0.70710677, %v1964_v29  ;;  %v2319_v40 = vmul.f32 0.70710677, %v2007_v30  ;;  %v10482_v63 = vrot.slane %v1679_v28, %v10450_v19 }
 0xd76   :  { %9673 = verf.f32 %v2303_v24  ;;  %v2318_v41 = vmul.f32 0.70710677, %v1966_v34  ;;  %v2320_v57 = vmul.f32 0.70710677, %v2009_v38  ;;  %v10485_v0 = vrot.slane %v1679_v28, %v10452_v22 }
 0xd77   :  { %9675 = verf.f32 %v2302_v25  ;;  %v2269_v1 = vmul.f32 0.5, %v1960_v4  ;;  %v2271_v2 = vmul.f32 0.5, %v2003_v5  ;;  %v10487_v23 = vmul.f32 0.5, %v1962_v9 }
 0xd78   :  { %9677 = verf.f32 %v2304_v26  ;;  %v2045_v43 = vpop.f32.mrb[20].mxu1  ;;  %v2088_v48 = vpop.f32.mrb[24].mxu0  ;;  %v10489_v24 = vmul.f32 0.5, %v2005_v12  ;;  %v2285_v28 = vmul.f32 0.5, %v1964_v29  ;;  %v10494_v12 = vmul.f32 0.5, %v2009_v38 }
 0xd79   :  { %9679 = verf.f32 %v2317_v37  ;;  %v2046_v47 = vadd.f32 %v2045_v43, %v1701_v27  ;;  %v2047_v49 = vpop.f32.mrb[21].mxu1  ;;  %v2089_v52 = vadd.f32 %v2088_v48, %v1709_v33  ;;  %v2090_v54 = vpop.f32.mrb[25].mxu0  ;;  %v10492_v43 = vmul.f32 0.5, %v1966_v34 }
 0xd7a   :  { %9681 = verf.f32 %v2319_v40  ;;  %v2048_v53 = vadd.f32 %v2047_v49, %v1705_v35  ;;  %v2049_v55 = vpop.f32.mrb[22].mxu1  ;;  %v10476_v59 = vadd.f32 %v2090_v54, %v1713_v36  ;;  %v2092_v60 = vpop.f32.mrb[26].mxu0 }
 0xd7b   :  { %v2305_v58 = vmul.f32 0.70710677, %v2046_v47  ;;  %v2051_v61 = vpop.f32.mrb[23].mxu1  ;;  %9683 = verf.f32 %v2318_v41  ;;  %v2307_v20 = vmul.f32 0.70710677, %v2089_v52  ;;  %v2094_v8 = vpop.f32.mrb[27].mxu0  ;;  %v2050_v6 = vadd.f32 %v2049_v55, %v1701_v27 }
 0xd7c   :  { %v2306_v16 = vmul.f32 0.70710677, %v2048_v53  ;;  %v2093_v7 = vadd.f32 %v2092_v60, %v1709_v33  ;;  %v2052_v13 = vadd.f32 %v2051_v61, %v1705_v35  ;;  %v2308_v25 = vmul.f32 0.70710677, %v10476_v59 }
 0xd7d   :  { %9685 = verf.f32 %v2305_v58  ;;  %v2321_v32 = vmul.f32 0.70710677, %v2050_v6  ;;  %v2095_v4 = vadd.f32 %v2094_v8, %v1713_v36  ;;  %v2287_v27 = vmul.f32 0.5, %v2007_v30 }
 0xd7e   :  { %9687 = verf.f32 %v2307_v20  ;;  %v2323_v33 = vmul.f32 0.70710677, %v2093_v7  ;;  %v2322_v48 = vmul.f32 0.70710677, %v2052_v13  ;;  %v10496_v55 = vmul.f32 0.5, %v2046_v47 }
 0xd7f   :  { %v9672_v14 = vpop.eup %9671  ;;  %9689 = verf.f32 %v2320_v57  ;;  %v10498_v36 = vmul.f32 0.5, %v2089_v52  ;;  %v10500_v57 = vmul.f32 0.5, %v2048_v53  ;;  %v2324_v61 = vmul.f32 0.70710677, %v2095_v4 }
 0xd80   :  { %v9674_v26 = vpop.eup %9673  ;;  %v2365_v31 = vadd.f32 1.0, %v9672_v14  ;;  %v2131_v5 = vpop.f32.mrb[24].mxu1  ;;  %9691 = verf.f32 %v2306_v16 }
 0xd81   :  { %v2174_v37 = vpop.f32.mrb[28].mxu0  ;;  %v9676_v40 = vpop.eup %9675  ;;  %v2367_v41 = vadd.f32 1.0, %v9674_v26  ;;  %9693 = verf.f32 %v2321_v32  ;;  %v2132_v52 = vadd.f32 %v2131_v5, %v10462_v39  ;;  %v10520_v5 = vmul.f32 0.5, %v10476_v59 }
 0xd82   :  { %v2133_v35 = vpop.f32.mrb[25].mxu1  ;;  %v9678_v9 = vpop.eup %9677  ;;  %9695 = verf.f32 %v2323_v33  ;;  %v10504_v34 = vmul.f32 %v2365_v31, %v2269_v1  ;;  %v2366_v47 = vadd.f32 1.0, %v9676_v40  ;;  %v2175_v32 = vadd.f32 %v2174_v37, %v10465_v44 }
 0xd83   :  { %v2176_v49 = vpop.f32.mrb[29].mxu0  ;;  %v2135_v54 = vpop.f32.mrb[26].mxu1  ;;  %9697 = verf.f32 %v2308_v25  ;;  %v10508_v8 = vmul.f32 %v2367_v41, %v2271_v2  ;;  %v2368_v14 = vadd.f32 1.0, %v9678_v9  ;;  %v2309_v25 = vmul.f32 0.70710677, %v2132_v52 }
 0xd84   :  { %v9680_v29 = vpop.eup %9679  ;;  %v2178_v30 = vpop.f32.mrb[30].mxu0  ;;  %9699 = verf.f32 %v2322_v48  ;;  %v2134_v33 = vadd.f32 %v2133_v35, %v10468_v46  ;;  %v2289_v41 = vmul.f32 0.5, %v2050_v6  ;;  %v2311_v6 = vmul.f32 0.70710677, %v2175_v32 }
 0xd85   :  { %v10502_v58 = vpop.f32.mrb[27].mxu1  ;;  %v9682_v60 = vpop.eup %9681  ;;  %v2381_v38 = vadd.f32 1.0, %v9680_v29  ;;  %9701 = verf.f32 %v2324_v61  ;;  %v10536_v37 = vmul.f32 %v2368_v14, %v10489_v24  ;;  %v10548_v14 = vmul.f32 0.5, %v2132_v52 }
 0xd86   :  { %v10506_v20 = vpop.f32.mrb[31].mxu0  ;;  %v2383_v16 = vadd.f32 1.0, %v9682_v60  ;;  %v9684_v53 = vpop.eup %9683  ;;  %v10524_v60 = vmul.f32 0.5, %v2052_v13  ;;  %9703 = verf.f32 %v2309_v25  ;;  %v2179_v25 = vadd.f32 %v2178_v30, %v10465_v44 }
 0xd87   :  { %v10511_v26 = vmul.f32 %v2381_v38, %v2285_v28  ;;  %v9686_v1 = vpop.eup %9685  ;;  %v2291_v28 = vmul.f32 0.5, %v2093_v7  ;;  %v10526_v38 = vmul.f32 0.5, %v2095_v4  ;;  %v2177_v4 = vadd.f32 %v2176_v49, %v10471_v51 }
 0xd88   :  { %v10514_v31 = vmul.f32 %v2383_v16, %v2287_v27  ;;  %v9688_v2 = vpop.eup %9687  ;;  %v2217_v9 = vpop.f32.mrb[28].mxu1  ;;  %v2382_v27 = vadd.f32 1.0, %v9684_v53  ;;  %v10529_v16 = vmul.f32 %v2366_v47, %v10487_v23  ;;  %v2369_v59 = vadd.f32 1.0, %v9686_v1 }
 0xd89   :  { %v2260_v48 = vpop.f32.mrb[32].mxu0  ;;  %v9690_v29 = vpop.eup %9689  ;;  %v2371_v13 = vadd.f32 1.0, %v9688_v2  ;;  %v2310_v53 = vmul.f32 0.70710677, %v2134_v33  ;;  %9705 = verf.f32 %v2311_v6  ;;  %v2136_v1 = vadd.f32 %v2135_v54, %v10462_v39 }
 0xd8a   :  { %v2219_v35 = vpop.f32.mrb[29].mxu1  ;;  %v2262_v61 = vpop.f32.mrb[33].mxu0  ;;  %v2384_v47 = vadd.f32 1.0, %v9690_v29  ;;  %v10546_v45 = vmul.f32 %v2382_v27, %v10492_v43  ;;  %v10550_v2 = vmul.f32 0.5, %v2175_v32  ;;  %v10553_v3 = vmul.f32 %v2369_v59, %v10496_v55 }
 0xd8b   :  { %v10531_v7 = vpop.f32.mrb[30].mxu1  ;;  %v10533_v21 = vpop.f32.mrb[34].mxu0  ;;  %v2312_v29 = vmul.f32 0.70710677, %v2177_v4  ;;  %v2325_v6 = vmul.f32 0.70710677, %v2136_v1  ;;  %v10556_v39 = vmul.f32 %v2371_v13, %v10498_v36  ;;  %9707 = verf.f32 %v2310_v53 }
 0xd8c   :  { %v9692_v11 = vpop.eup %9691  ;;  %v10539_v40 = vpop.f32.mrb[31].mxu1  ;;  %v2327_v43 = vmul.f32 0.70710677, %v2179_v25  ;;  %v2138_v52 = vadd.f32 %v10502_v58, %v10468_v46  ;;  %v2181_v55 = vadd.f32 %v10506_v20, %v10471_v51  ;;  %v2416_v32 = vmul.f32 %v2384_v47, %v10494_v12 }
 0xd8d   :  { %v10541_v22 = vpop.f32.mrb[35].mxu0  ;;  %v9694_v23 = vpop.eup %9693  ;;  %9709 = verf.f32 %v2312_v29  ;;  %v2370_v27 = vadd.f32 1.0, %v9692_v11  ;;  %v10571_v13 = vmul.f32 0.5, %v2134_v33  ;;  %v10574_v51 = vadd.f32 %v2217_v9, %v10474_v56 }
 0xd8e   :  { %v9696_v19 = vpop.eup %9695  ;;  %v2385_v24 = vadd.f32 1.0, %v9694_v23  ;;  %9711 = verf.f32 %v2325_v6  ;;  %v2328_v46 = vmul.f32 0.70710677, %v2181_v55  ;;  %v10577_v11 = vadd.f32 %v2260_v48, %v10479_v62 }
 0xd8f   :  { %v9698_v49 = vpop.eup %9697  ;;  %v2387_v10 = vadd.f32 1.0, %v9696_v19  ;;  %9713 = verf.f32 %v2327_v43  ;;  %v10580_v20 = vadd.f32 %v2219_v35, %v10482_v63  ;;  %v10583_v53 = vmul.f32 %v2370_v27, %v10500_v57 }
 0xd90   :  { %v10558_v44 = vmul.f32 %v2385_v24, %v2289_v41  ;;  %v9700_v54 = vpop.eup %9699  ;;  %v2372_v41 = vadd.f32 1.0, %v9698_v49  ;;  %v2313_v33 = vmul.f32 0.70710677, %v10574_v51  ;;  %v10587_v23 = vadd.f32 %v2262_v61, %v10485_v0 }
 0xd91   :  { %v10560_v30 = vmul.f32 %v2387_v10, %v2291_v28  ;;  %v9702_v19 = vpop.eup %9701  ;;  %v2326_v28 = vmul.f32 0.70710677, %v2138_v52  ;;  %v2386_v59 = vadd.f32 1.0, %v9700_v54  ;;  %v10592_v24 = vmul.f32 0.5, %v2177_v4  ;;  %v9413_v4 = vld [vmem:[%s12123_s12 + $0x100] sm:$0xff]  }
 0xd92   :  { %v2433_v36 = vpack.c.bf16 %v10558_v44, %v10553_v3  ;;  %v9704_v58 = vpop.eup %9703  ;;  %v2388_v12 = vadd.f32 1.0, %v9702_v19  ;;  %v10590_v47 = vmul.f32 %v2372_v41, %v10520_v5  ;;  %v2293_v48 = vmul.f32 0.5, %v2136_v1  ;;  %v9450_v3 = vld [vmem:[%s12123_s12 + $0x288] sm:$0xff]   ;;  %v9451_v44 = vld [vmem:[%s12123_s12 + $0x250] sm:$0xff]  }
 0xd93   :  { %v2435_v10 = vpack.c.bf16 %v10560_v30, %v10556_v39  ;;  %9715 = verf.f32 %v2326_v28  ;;  %v9706_v9 = vpop.eup %9705  ;;  %v2315_v49 = vmul.f32 0.70710677, %v10577_v11  ;;  %v10596_v35 = vmul.f32 %v2386_v59, %v10524_v60  ;;  %v9418_v59 = vld [vmem:[%s12123_s12 + $0x188] sm:$0xff]   ;;  %v9452_v39 = vld [vmem:[%s12123_s12 + $0x2d0] sm:$0xff]  }
 0xd94   :  { %9717 = verf.f32 %v2328_v46  ;;  %v2373_v57 = vadd.f32 1.0, %v9704_v58  ;;  %v2295_v29 = vmul.f32 0.5, %v2179_v25  ;;  %v2314_v6 = vmul.f32 0.70710677, %v10580_v20  ;;  %v9453_v30 = vld [vmem:[%s12123_s12 + $0x210] sm:$0xff]  }
 0xd95   :  { %v10600_v43 = vmul.f32 %v2388_v12, %v10526_v38  ;;  %v2294_v61 = vmul.f32 0.5, %v2138_v52  ;;  %v2316_v54 = vmul.f32 0.70710677, %v10587_v23  ;;  %v2430_v5 = vpack.c.bf16 %v10546_v45, %v10529_v16  ;;  %v9708_v1 = vpop.eup %9707  ;;  %v9414_v38 = vld [vmem:[%s12123_s12 + $0x180] sm:$0xff]   ;;  %v9415_v45 = vld [vmem:[%s12123_s12 + $0x148] sm:$0xff]   ;;  %v9420_v12 = vld [vmem:[%s12123_s12 + $0x1d0] sm:$0xff]  }
 0xd96   :  { %v2375_v60 = vadd.f32 1.0, %v9706_v9  ;;  %9719 = verf.f32 %v2313_v33  ;;  %v2432_v25 = vpack.c.bf16 %v2416_v32, %v10536_v37  ;;  %v10611_v19 = vadd.f32 %v10531_v7, %v10474_v56  ;;  %v9416_v37 = vld [vmem:[%s12123_s12 + $0x1c8] sm:$0xff]  }
 0xd97   :  { %v9710_v16 = vpop.eup %9709  ;;  %v2296_v52 = vmul.f32 0.5, %v2181_v55  ;;  %9721 = verf.f32 %v2315_v49  ;;  %3508 = vmatprep.mubr.bf16.mxu1 %v2430_v5  ;;  %v10621_v27 = vadd.f32 %v10533_v21, %v10479_v62  ;;  %v10625_v56 = vadd.f32 %v10539_v40, %v10482_v63  ;;  %v9421_v5 = vld [vmem:[%s12123_s12 + $0x110] sm:$0xff]  }
 0xd98   :  { %v9712_v7 = vpop.eup %9711  ;;  %v10631_v32 = vmul.f32 %v2373_v57, %v10548_v14  ;;  %9723 = verf.f32 %v2314_v6  ;;  %3549 = vmatprep.mubr.bf16.mxu0 %v2432_v25  ;;  %v2329_v55 = vmul.f32 0.70710677, %v10611_v19  ;;  %v12181_v21 = vpack.c.bf16 %v10511_v26, %v10504_v34  ;;  %v9417_v34 = vld [vmem:[%s12123_s12 + $0x108] sm:$0xff]  }
 0xd99   :  { %v10639_v62 = vadd.f32 %v10541_v22, %v10485_v0  ;;  %v9714_v63 = vpop.eup %9713  ;;  %v2374_v40 = vadd.f32 1.0, %v9708_v1  ;;  %v2389_v41 = vadd.f32 1.0, %v9712_v7  ;;  %9725 = verf.f32 %v2316_v54 }
 0xd9a   :  { %3509 = vmatmul.mubr.bf16.vlgmr.msra.gmra.mrb[32].mxu1 %v12181_v21  ;;  %v2331_v28 = vmul.f32 0.70710677, %v10621_v27  ;;  %v12182_v14 = vpack.c.bf16 %v10514_v31, %v10508_v8  ;;  %v10649_v26 = vmul.f32 %v2375_v60, %v10550_v2  ;;  %v2391_v22 = vadd.f32 1.0, %v9714_v63  ;;  %v9419_v8 = vld [vmem:[%s12123_s12 + $0x150] sm:$0xff]  }
 0xd9b   :  { %8716 = vmatpush3.bf16.msra.mxu1 %v9413_v4  ;;  %9727 = verf.f32 %v2329_v55  ;;  %v2330_v0 = vmul.f32 0.70710677, %v10625_v56  ;;  %v2376_v46 = vadd.f32 1.0, %v9710_v16  ;;  %v10658_v58 = vmul.f32 %v2389_v41, %v2293_v48  ;;  %v9426_v16 = vld [vmem:[%s12123_s12 + $0x198] sm:$0xff]   ;;  %v9428_v55 = vld [vmem:[%s12123_s12 + $0x1e0] sm:$0xff]  }
 0xd9c   :  { %3550 = vmatmul.mubr.bf16.vlgmr.msra.gmra.mrb[36].mxu0 %v12182_v14  ;;  %8717 = vmatprep.subr.bf16.mxu1 %v9415_v45  ;;  %9729 = verf.f32 %v2331_v28  ;;  %v2332_v2 = vmul.f32 0.70710677, %v10639_v62  ;;  %v10664_v9 = vmul.f32 %v2391_v22, %v2295_v29  ;;  %v2434_v57 = vpack.c.bf16 %v10596_v35, %v10583_v53  ;;  %v9422_v35 = vld [vmem:[%s12123_s12 + $0x190] sm:$0xff]  }
 0xd9d   :  { %8738 = vmatpush3.bf16.msra.mxu0 %v9414_v38  ;;  %v9716_v31 = vpop.eup %9715  ;;  %9731 = verf.f32 %v2330_v0  ;;  %v2437_v48 = vpack.c.bf16 %v10658_v58, %v10631_v32  ;;  %v2436_v54 = vpack.c.bf16 %v10600_v43, %v10590_v47  ;;  %v10676_v29 = vmul.f32 %v2374_v40, %v10571_v13  ;;  %v9423_v47 = vld [vmem:[%s12123_s12 + $0x158] sm:$0xff]   ;;  %v9482_v32 = vld [vmem:[%s12123_s12 + $0x388] sm:$0xff]   ;;  %v9483_v58 = vld [vmem:[%s12123_s12 + $0x350] sm:$0xff]  }
 0xd9e   :  { %8739 = vmatprep.subr.bf16.mxu0 %v9416_v37  ;;  %v9718_v33 = vpop.eup %9717  ;;  %v2390_v49 = vadd.f32 1.0, %v9716_v31  ;;  %9733 = verf.f32 %v2332_v2  ;;  %v2439_v4 = vpack.c.bf16 %v10664_v9, %v10649_v26  ;;  %v10689_v43 = vmul.f32 %v2376_v46, %v10592_v24  ;;  %3590 = vmatprep.mubr.bf16.mxu1 %v2434_v57  ;;  %v9425_v24 = vld [vmem:[%s12123_s12 + $0x118] sm:$0xff]   ;;  %v9484_v26 = vld [vmem:[%s12123_s12 + $0x3d0] sm:$0xff]  }
 0xd9f   :  { %v2392_v6 = vadd.f32 1.0, %v9718_v33  ;;  %8718 = vmatpush3.bf16.msra.mxu1 %v9417_v34  ;;  %3631 = vmatprep.mubr.bf16.mxu0 %v2436_v54  ;;  %v2281_v63 = vmul.f32 0.5, %v10574_v51  ;;  %v2283_v40 = vmul.f32 0.5, %v10577_v11  ;;  %v2282_v14 = vmul.f32 0.5, %v10580_v20  ;;  %v9430_v20 = vld [vmem:[%s12123_s12 + $0x1a0] sm:$0xff]   ;;  %v9485_v9 = vld [vmem:[%s12123_s12 + $0x310] sm:$0xff]  }
 0xda0   :  { %v10680_v53 = vmul.f32 %v2390_v49, %v2294_v61  ;;  %8719 = vmatprep.subr.bf16.mxu1 %v9419_v8  ;;  %v9424_v61 = vld [vmem:[%s12123_s12 + $0x1d8] sm:$0xff]   ;;  %v9720_v1 = vpop.eup %9719  ;;  %v2297_v22 = vmul.f32 0.5, %v10611_v19  ;;  %v2284_v31 = vmul.f32 0.5, %v10587_v23  ;;  %v2299_v51 = vmul.f32 0.5, %v10621_v27  ;;  %v9431_v19 = vld [vmem:[%s12123_s12 + $0x168] sm:$0xff]  }
 0xda1   :  { %8740 = vmatpush3.bf16.msra.mxu0 %v9418_v59  ;;  %v10691_v13 = vmul.f32 %v2392_v6, %v2296_v52  ;;  %v9722_v25 = vpop.eup %9721  ;;  %v9427_v52 = vld [vmem:[%s12123_s12 + $0x160] sm:$0xff]   ;;  %v2377_v7 = vadd.f32 1.0, %v9720_v1  ;;  %v2298_v23 = vmul.f32 0.5, %v10625_v56  ;;  %v9432_v27 = vld [vmem:[%s12123_s12 + $0x1e8] sm:$0xff]   ;;  %v2300_v54 = vmul.f32 0.5, %v10639_v62 }
 0xda2   :  { %8741 = vmatprep.subr.bf16.mxu0 %v9420_v12  ;;  %v2438_v60 = vpack.c.bf16 %v10680_v53, %v10676_v29  ;;  %v9724_v45 = vpop.eup %9723  ;;  %v2379_v41 = vadd.f32 1.0, %v9722_v25  ;;  %v9429_v59 = vld [vmem:[%s12123_s12 + $0x120] sm:$0xff]   ;;  %v9433_v56 = vld [vmem:[%s12123_s12 + $0x128] sm:$0xff]   ;;  %v9456_v29 = vld [vmem:[%s12123_s12 + $0x2d8] sm:$0xff]  }
 0xda3   :  { %8720 = vmatpush3.bf16.msra.mxu1 %v9421_v5  ;;  %v2440_v38 = vpack.c.bf16 %v10691_v13, %v10689_v43  ;;  %v9726_v37 = vpop.eup %9725  ;;  %v2378_v34 = vadd.f32 1.0, %v9724_v45  ;;  %v10727_v12 = vmul.f32 %v2377_v7, %v2281_v63  ;;  %v9434_v62 = vld [vmem:[%s12123_s12 + $0x1a8] sm:$0xff]   ;;  %v9435_v45 = vld [vmem:[%s12123_s12 + $0x170] sm:$0xff]   ;;  %v9440_v63 = vld [vmem:[%s12123_s12 + $0x1f8] sm:$0xff]  }
 0xda4   :  { %8721 = vmatprep.subr.bf16.mxu1 %v9423_v47  ;;  %v2380_v46 = vadd.f32 1.0, %v9726_v37  ;;  %v10735_v57 = vmul.f32 %v2379_v41, %v2283_v40  ;;  %v9437_v7 = vld [vmem:[%s12123_s12 + $0x130] sm:$0xff]   ;;  %v9441_v40 = vld [vmem:[%s12123_s12 + $0x138] sm:$0xff]   ;;  %v9459_v13 = vld [vmem:[%s12123_s12 + $0x260] sm:$0xff]  }
 0xda5   :  { %8742 = vmatpush3.bf16.msra.mxu0 %v9422_v35  ;;  %v9728_v21 = vpop.eup %9727  ;;  %v10740_v35 = vmul.f32 %v2378_v34, %v2282_v14  ;;  %v9442_v41 = vld [vmem:[%s12123_s12 + $0x1b8] sm:$0xff]   ;;  %v9444_v14 = vld [vmem:[%s12123_s12 + $0x2c0] sm:$0xff]  }
 0xda6   :  { %8743 = vmatprep.subr.bf16.mxu0 %v9424_v61  ;;  %v9730_v28 = vpop.eup %9729  ;;  %v2393_v0 = vadd.f32 1.0, %v9728_v21  ;;  %v10749_v1 = vmul.f32 %v2380_v46, %v2284_v31  ;;  %v9439_v21 = vld [vmem:[%s12123_s12 + $0x178] sm:$0xff]   ;;  %v9445_v34 = vld [vmem:[%s12123_s12 + $0x200] sm:$0xff]   ;;  %v9463_v46 = vld [vmem:[%s12123_s12 + $0x268] sm:$0xff]  }
 0xda7   :  { %8722 = vmatpush3.bf16.msra.mxu1 %v9425_v24  ;;  %v9732_v8 = vpop.eup %9731  ;;  %v2395_v11 = vadd.f32 1.0, %v9730_v28  ;;  %v9443_v28 = vld [vmem:[%s12123_s12 + $0x240] sm:$0xff]   ;;  %v9457_v53 = vld [vmem:[%s12123_s12 + $0x218] sm:$0xff]  }
 0xda8   :  { %8723 = vmatprep.subr.bf16.mxu1 %v9427_v52  ;;  %v9734_v2 = vpop.eup %9733  ;;  %v10729_v33 = vmul.f32 %v2393_v0, %v2297_v22  ;;  %v2394_v49 = vadd.f32 1.0, %v9732_v8  ;;  %v9446_v22 = vld [vmem:[%s12123_s12 + $0x280] sm:$0xff]   ;;  %v9447_v0 = vld [vmem:[%s12123_s12 + $0x248] sm:$0xff]   ;;  %v9458_v43 = vld [vmem:[%s12123_s12 + $0x298] sm:$0xff]  }
 0xda9   :  { %8744 = vmatpush3.bf16.msra.mxu0 %v9426_v16  ;;  %v10737_v6 = vmul.f32 %v2395_v11, %v2299_v51  ;;  %v2396_v5 = vadd.f32 1.0, %v9734_v2  ;;  %v9436_v16 = vld [vmem:[%s12123_s12 + $0x1f0] sm:$0xff]   ;;  %v9449_v8 = vld [vmem:[%s12123_s12 + $0x208] sm:$0xff]   ;;  %v9462_v31 = vld [vmem:[%s12123_s12 + $0x2a0] sm:$0xff]  }
 0xdaa   :  { %8745 = vmatprep.subr.bf16.mxu0 %v9428_v55  ;;  %v2441_v47 = vpack.c.bf16 %v10729_v33, %v10727_v12  ;;  %v10744_v61 = vmul.f32 %v2394_v49, %v2298_v23  ;;  %v9438_v55 = vld [vmem:[%s12123_s12 + $0x1b0] sm:$0xff]   ;;  %v9464_v51 = vld [vmem:[%s12123_s12 + $0x2e8] sm:$0xff]  }
 0xdab   :  { %8724 = vmatpush3.bf16.msra.mxu1 %v9429_v59  ;;  %v2443_v25 = vpack.c.bf16 %v10737_v6, %v10735_v57  ;;  %v10753_v24 = vmul.f32 %v2396_v5, %v2300_v54  ;;  %v9448_v59 = vld [vmem:[%s12123_s12 + $0x2c8] sm:$0xff]   ;;  %v9468_v2 = vld [vmem:[%s12123_s12 + $0x2f0] sm:$0xff]   ;;  %v9472_v54 = vld [vmem:[%s12123_s12 + $0x2f8] sm:$0xff]  }
 0xdac   :  { %8725 = vmatprep.subr.bf16.mxu1 %v9431_v19  ;;  %v2442_v52 = vpack.c.bf16 %v10744_v61, %v10740_v35  ;;  %v9465_v11 = vld [vmem:[%s12123_s12 + $0x228] sm:$0xff]   ;;  %v9467_v19 = vld [vmem:[%s12123_s12 + $0x270] sm:$0xff]   ;;  %v9473_v5 = vld [vmem:[%s12123_s12 + $0x238] sm:$0xff]  }
 0xdad   :  { %8746 = vmatpush3.bf16.msra.mxu0 %v9430_v20  ;;  %v2444_v37 = vpack.c.bf16 %v10753_v24, %v10749_v1  ;;  %v9466_v20 = vld [vmem:[%s12123_s12 + $0x2a8] sm:$0xff]   ;;  %v9469_v23 = vld [vmem:[%s12123_s12 + $0x230] sm:$0xff]   ;;  %v9488_v35 = vld [vmem:[%s12123_s12 + $0x3d8] sm:$0xff]  }
 0xdae   :  { %8747 = vmatprep.subr.bf16.mxu0 %v9432_v27  ;;  %v9470_v49 = vld [vmem:[%s12123_s12 + $0x2b0] sm:$0xff]   ;;  %v9471_v27 = vld [vmem:[%s12123_s12 + $0x278] sm:$0xff]   ;;  %v9491_v24 = vld [vmem:[%s12123_s12 + $0x360] sm:$0xff]  }
 0xdaf   :  { %8726 = vmatpush3.bf16.msra.mxu1 %v9433_v56  ;;  %v9474_v56 = vld [vmem:[%s12123_s12 + $0x2b8] sm:$0xff]  }
 0xdb0   :  { %8727 = vmatprep.subr.bf16.mxu1 %v9435_v45  ;;  %v9476_v45 = vld [vmem:[%s12123_s12 + $0x3c0] sm:$0xff]   ;;  %v9489_v61 = vld [vmem:[%s12123_s12 + $0x318] sm:$0xff]  }
 0xdb1   :  { %8748 = vmatpush3.bf16.msra.mxu0 %v9434_v62  ;;  %v9475_v62 = vld [vmem:[%s12123_s12 + $0x340] sm:$0xff]   ;;  %v9490_v1 = vld [vmem:[%s12123_s12 + $0x398] sm:$0xff]  }
 0xdb2   :  { %8749 = vmatprep.subr.bf16.mxu0 %v9436_v16  ;;  %v9477_v16 = vld [vmem:[%s12123_s12 + $0x300] sm:$0xff]  }
 0xdb3   :  { %8728 = vmatpush3.bf16.msra.mxu1 %v9437_v7  ;;  %v9478_v7 = vld [vmem:[%s12123_s12 + $0x380] sm:$0xff]  }
 0xdb4   :  { %8729 = vmatprep.subr.bf16.mxu1 %v9439_v21  ;;  %v9480_v21 = vld [vmem:[%s12123_s12 + $0x3c8] sm:$0xff]  }
 0xdb5   :  { %8750 = vmatpush3.bf16.msra.mxu0 %v9438_v55  ;;  %v9479_v55 = vld [vmem:[%s12123_s12 + $0x348] sm:$0xff]  }
 0xdb6   :  { %8751 = vmatprep.subr.bf16.mxu0 %v9440_v63  ;;  %v9481_v63 = vld [vmem:[%s12123_s12 + $0x308] sm:$0xff]  }
 0xdb7   :  { %8730 = vmatpush3.bf16.msra.mxu1 %v9441_v40  ;;  %v9494_v40 = vld [vmem:[%s12123_s12 + $0x3a0] sm:$0xff]  }
 0xdb8   :  { %8759 = vmatprep.subr.bf16.mxu1 %v9443_v28  ;;  %v9496_v28 = vld [vmem:[%s12123_s12 + $0x3e8] sm:$0xff]  }
 0xdb9   :  { %8752 = vmatpush3.bf16.msra.mxu0 %v9442_v41  ;;  %v9495_v41 = vld [vmem:[%s12123_s12 + $0x368] sm:$0xff]  }
 0xdba   :  { %8781 = vmatprep.subr.bf16.mxu0 %v9444_v14  ;;  %3591 = vmatmul.mubr.bf16.vlgmr.msra.gmra.mrb[36].mxu1 %v2433_v36  ;;  %v9454_v36 = vld [vmem:[%s12123_s12 + $0x290] sm:$0xff]   ;;  %v9497_v14 = vld [vmem:[%s12123_s12 + $0x328] sm:$0xff]  }
 0xdbb   :  { %8760 = vmatpush3.bf16.msra.mxu1 %v9445_v34  ;;  %3672 = vmatprep.mubr.bf16.mxu1 %v2438_v60  ;;  %v9460_v60 = vld [vmem:[%s12123_s12 + $0x2e0] sm:$0xff]   ;;  %v9498_v34 = vld [vmem:[%s12123_s12 + $0x3a8] sm:$0xff]  }
 0xdbc   :  { %3632 = vmatmul.mubr.bf16.vlgmr.msra.gmra.mrb[40].mxu0 %v2435_v10  ;;  %8761 = vmatprep.subr.bf16.mxu1 %v9447_v0  ;;  %v9455_v10 = vld [vmem:[%s12123_s12 + $0x258] sm:$0xff]   ;;  %v9500_v0 = vld [vmem:[%s12123_s12 + $0x3f0] sm:$0xff]  }
 0xdbd   :  { %8782 = vmatpush3.bf16.msra.mxu0 %v9446_v22  ;;  %3713 = vmatprep.mubr.bf16.mxu0 %v2440_v38  ;;  %v9461_v38 = vld [vmem:[%s12123_s12 + $0x220] sm:$0xff]   ;;  %v9499_v22 = vld [vmem:[%s12123_s12 + $0x370] sm:$0xff]  }
 0xdbe   :  { %8783 = vmatprep.subr.bf16.mxu0 %v9448_v59  ;;  %v9501_v59 = vld [vmem:[%s12123_s12 + $0x330] sm:$0xff]  }
 0xdbf   :  { %8762 = vmatpush3.bf16.msra.mxu1 %v9449_v8  ;;  %v9502_v8 = vld [vmem:[%s12123_s12 + $0x3b0] sm:$0xff]  }
 0xdc0   :  { %8763 = vmatprep.subr.bf16.mxu1 %v9451_v44  ;;  %v9504_v44 = vld [vmem:[%s12123_s12 + $0x3f8] sm:$0xff]  }
 0xdc1   :  { %8784 = vmatpush3.bf16.msra.mxu0 %v9450_v3  ;;  %v9503_v3 = vld [vmem:[%s12123_s12 + $0x378] sm:$0xff]  }
 0xdc2   :  { %8785 = vmatprep.subr.bf16.mxu0 %v9452_v39  ;;  %v9505_v39 = vld [vmem:[%s12123_s12 + $0x338] sm:$0xff]  }
 0xdc3   :  { %8764 = vmatpush3.bf16.msra.mxu1 %v9453_v30  ;;  %v9506_v30 = vld [vmem:[%s12123_s12 + $0x3b8] sm:$0xff]  }
 0xdc4   :  { %8765 = vmatprep.subr.bf16.mxu1 %v9455_v10 }
 0xdc5   :  { %8786 = vmatpush3.bf16.msra.mxu0 %v9454_v36  ;;  %v12183_v36 = vmov 0.0  }
 0xdc6   :  { %8787 = vmatprep.subr.bf16.mxu0 %v9456_v29 }
 0xdc7   :  { %8766 = vmatpush3.bf16.msra.mxu1 %v9457_v53  ;;  %v7971_v53 = vld [vmem:[%s12127_s13] ss:$0 sm:$0xff] }
 0xdc8   :  { %8767 = vmatprep.subr.bf16.mxu1 %v9459_v13 }
 0xdc9   :  { %8788 = vmatpush3.bf16.msra.mxu0 %v9458_v43 }
 0xdca   :  { %8789 = vmatprep.subr.bf16.mxu0 %v9460_v60 }
 0xdcb   :  { %8768 = vmatpush3.bf16.msra.mxu1 %v9461_v38 }
 0xdcc   :  { %8769 = vmatprep.subr.bf16.mxu1 %v9463_v46 }
 0xdcd   :  { %8790 = vmatpush3.bf16.msra.mxu0 %v9462_v31 }
 0xdce   :  { %8791 = vmatprep.subr.bf16.mxu0 %v9464_v51 }
 0xdcf   :  { %8770 = vmatpush3.bf16.msra.mxu1 %v9465_v11 }
 0xdd0   :  { %8771 = vmatprep.subr.bf16.mxu1 %v9467_v19 }
 0xdd1   :  { %8792 = vmatpush3.bf16.msra.mxu0 %v9466_v20 }
 0xdd2   :  { %8793 = vmatprep.subr.bf16.mxu0 %v9468_v2 }
 0xdd3   :  { %8772 = vmatpush3.bf16.msra.mxu1 %v9469_v23 }
 0xdd4   :  { %8773 = vmatprep.subr.bf16.mxu1 %v9471_v27 }
 0xdd5   :  { %8794 = vmatpush3.bf16.msra.mxu0 %v9470_v49 }
 0xdd6   :  { %8795 = vmatprep.subr.bf16.mxu0 %v9472_v54 }
 0xdd7   :  { %8774 = vmatpush3.bf16.msra.mxu1 %v9473_v5 }
 0xdd8   :  { %8803 = vmatprep.subr.bf16.mxu1 %v9475_v62 }
 0xdd9   :  { %8796 = vmatpush3.bf16.msra.mxu0 %v9474_v56 }
 0xdda   :  { %8825 = vmatprep.subr.bf16.mxu0 %v9476_v45  ;;  %3673 = vmatmul.mubr.bf16.vlgmr.msra.gmra.mrb[40].mxu1 %v2437_v48  ;;  %v9486_v48 = vld [vmem:[%s12123_s12 + $0x390] sm:$0xff]  }
 0xddb   :  { %8804 = vmatpush3.bf16.msra.mxu1 %v9477_v16  ;;  %3754 = vmatprep.mubr.bf16.mxu1 %v2442_v52  ;;  %v9492_v52 = vld [vmem:[%s12123_s12 + $0x3e0] sm:$0xff]  }
 0xddc   :  { %3714 = vmatmul.mubr.bf16.vlgmr.msra.gmra.mrb[44].mxu0 %v2439_v4  ;;  %8805 = vmatprep.subr.bf16.mxu1 %v9479_v55  ;;  %v9487_v4 = vld [vmem:[%s12123_s12 + $0x358] sm:$0xff]  }
 0xddd   :  { %8826 = vmatpush3.bf16.msra.mxu0 %v9478_v7  ;;  %3795 = vmatprep.mubr.bf16.mxu0 %v2444_v37  ;;  %v9493_v37 = vld [vmem:[%s12123_s12 + $0x320] sm:$0xff]  }
 0xdde   :  { %8827 = vmatprep.subr.bf16.mxu0 %v9480_v21 }
 0xddf   :  { %8806 = vmatpush3.bf16.msra.mxu1 %v9481_v63 }
 0xde0   :  { %8807 = vmatprep.subr.bf16.mxu1 %v9483_v58 }
 0xde1   :  { %8828 = vmatpush3.bf16.msra.mxu0 %v9482_v32 }
 0xde2   :  { %8829 = vmatprep.subr.bf16.mxu0 %v9484_v26 }
 0xde3   :  { %8808 = vmatpush3.bf16.msra.mxu1 %v9485_v9 }
 0xde4   :  { %8809 = vmatprep.subr.bf16.mxu1 %v9487_v4 }
 0xde5   :  { %8830 = vmatpush3.bf16.msra.mxu0 %v9486_v48 }
 0xde6   :  { %8831 = vmatprep.subr.bf16.mxu0 %v9488_v35 }
 0xde7   :  { %8810 = vmatpush3.bf16.msra.mxu1 %v9489_v61 }
 0xde8   :  { %8811 = vmatprep.subr.bf16.mxu1 %v9491_v24 }
 0xde9   :  { %8832 = vmatpush3.bf16.msra.mxu0 %v9490_v1 }
 0xdea   :  { %8833 = vmatprep.subr.bf16.mxu0 %v9492_v52 }
 0xdeb   :  { %8812 = vmatpush3.bf16.msra.mxu1 %v9493_v37 }
 0xdec   :  { %8813 = vmatprep.subr.bf16.mxu1 %v9495_v41 }
 0xded   :  { %8834 = vmatpush3.bf16.msra.mxu0 %v9494_v40 }
 0xdee   :  { %8835 = vmatprep.subr.bf16.mxu0 %v9496_v28 }
 0xdef   :  { %8814 = vmatpush3.bf16.msra.mxu1 %v9497_v14 }
 0xdf0   :  { %8815 = vmatprep.subr.bf16.mxu1 %v9499_v22 }
 0xdf1   :  { %8836 = vmatpush3.bf16.msra.mxu0 %v9498_v34 }
 0xdf2   :  { %8837 = vmatprep.subr.bf16.mxu0 %v9500_v0 }
 0xdf3   :  { %8816 = vmatpush3.bf16.msra.mxu1 %v9501_v59 }
 0xdf4   :  { %8817 = vmatprep.subr.bf16.mxu1 %v9503_v3 }
 0xdf5   :  { %8838 = vmatpush3.bf16.msra.mxu0 %v9502_v8 }
 0xdf6   :  { %8839 = vmatprep.subr.bf16.mxu0 %v9504_v44 }
 0xdf7   :  { %8818 = vmatpush3.bf16.msra.mxu1 %v9505_v39 }
 0xdf9   :  { %8840 = vmatpush3.bf16.msra.mxu0 %v9506_v30 }
 0xdfa   :  { %9201 = vmatprep.subr.mxu0 %v12183_v36  ;;  %3755 = vmatmul.mubr.bf16.vlgmr.msra.gmra.mrb[44].mxu1 %v2441_v47 }
 0xdfc   :  { %3796 = vmatmul.mubr.bf16.vlgmr.msra.gmra.mrb[48].mxu0 %v2443_v25 }
 0xdfd   :  { %9203 = vmatprep.mubr.msk.f32.mxu0 %vm9852_vm1, %v12183_v36 }
 0xe6d   :  { %v8687_v10 = vpop.f32.mrb[32].mxu1 }
 0xe6e   :  { %v8688_v43 = vpop.f32.mrb[33].mxu1 }
 0xe6f   :  { %v8709_v29 = vpop.f32.mrb[36].mxu0  ;;  %v8689_v13 = vadd.f32 %v8688_v43, %v8687_v10  ;;  %v8690_v38 = vpop.f32.mrb[34].mxu1 }
 0xe70   :  { %v8710_v60 = vpop.f32.mrb[37].mxu0  ;;  %v8691_v33 = vpop.f32.mrb[35].mxu1 }
 0xe71   :  { %v8711_v31 = vadd.f32 %v8710_v60, %v8709_v29  ;;  %v8712_v12 = vpop.f32.mrb[38].mxu0  ;;  %v3511_v47 = vadd.f32 %v8689_v13, %v7971_v53  ;;  %v8692_v46 = vadd.f32 %v8691_v33, %v8690_v38 }
 0xe72   :  { %v8713_v57 = vpop.f32.mrb[39].mxu0 }
 0xe73   :  { %v8714_v6 = vadd.f32 %v8713_v57, %v8712_v12  ;;  %v3552_v25 = vadd.f32 %v8711_v31, %v3511_v47  ;;  %v3514_v51 = vadd.f32 %v8692_v46, %v7971_v53 }
 0xe75   :  { %v3555_v11 = vadd.f32 %v8714_v6, %v3514_v51 }
 0xe8d   :  { %v8731_v20 = vpop.f32.mrb[36].mxu1 }
 0xe8e   :  { %v8732_v2 = vpop.f32.mrb[37].mxu1 }
 0xe8f   :  { %v8753_v19 = vpop.f32.mrb[40].mxu0  ;;  %v8733_v23 = vadd.f32 %v8732_v2, %v8731_v20  ;;  %v8734_v27 = vpop.f32.mrb[38].mxu1 }
 0xe90   :  { %v8754_v49 = vpop.f32.mrb[41].mxu0  ;;  %v8735_v56 = vpop.f32.mrb[39].mxu1 }
 0xe91   :  { %v8755_v54 = vadd.f32 %v8754_v49, %v8753_v19  ;;  %v8756_v5 = vpop.f32.mrb[42].mxu0  ;;  %v3593_v62 = vadd.f32 %v8733_v23, %v3552_v25  ;;  %v8736_v45 = vadd.f32 %v8735_v56, %v8734_v27  ;;  %v8103_v23 = vld [vmem:[%s12169_s29 + $0x28] sm:$0xff]  ;;  %v8104_v27 = vld [vmem:[%s12169_s29 + $0x30] sm:$0xff] }
 0xe92   :  { %v8757_v16 = vpop.f32.mrb[43].mxu0 }
 0xe93   :  { %v8758_v7 = vadd.f32 %v8757_v16, %v8756_v5  ;;  %v3634_v55 = vadd.f32 %v8755_v54, %v3593_v62  ;;  %v3596_v21 = vadd.f32 %v8736_v45, %v3555_v11  ;;  %v8105_v54 = vld [vmem:[%s12169_s29 + $0x38] sm:$0xff] }
 0xe94   :  { %v9337_v5 = vpack.c.bf16 %v8105_v54, %v8104_v27 }
 0xe95   :  { %v3637_v63 = vadd.f32 %v8758_v7, %v3596_v21 }
 0xead   :  { %v8775_v32 = vpop.f32.mrb[40].mxu1 }
 0xeae   :  { %v8776_v26 = vpop.f32.mrb[41].mxu1 }
 0xeaf   :  { %v8797_v58 = vpop.f32.mrb[44].mxu0  ;;  %v8777_v9 = vadd.f32 %v8776_v26, %v8775_v32  ;;  %v8778_v4 = vpop.f32.mrb[42].mxu1  ;;  %v8101_v26 = vld [vmem:[%s12129_s15] ss:$0 sm:$0xff] }
 0xeb0   :  { %v8798_v48 = vpop.f32.mrb[45].mxu0  ;;  %v8779_v1 = vpop.f32.mrb[43].mxu1 }
 0xeb1   :  { %v8799_v35 = vadd.f32 %v8798_v48, %v8797_v58  ;;  %v8800_v61 = vpop.f32.mrb[46].mxu0  ;;  %v3675_v24 = vadd.f32 %v8777_v9, %v3634_v55  ;;  %v8780_v52 = vadd.f32 %v8779_v1, %v8778_v4  ;;  %v8107_v1 = vld [vmem:[%s12172_s4 + $0x1] ss:$0 sm:$0xff]  ;;  %s12185_s4 = smov 64  }
 0xeb2   :  { %v8801_v37 = vpop.f32.mrb[47].mxu0 }
 0xeb3   :  { %v8802_v40 = vadd.f32 %v8801_v37, %v8800_v61  ;;  %v3716_v41 = vadd.f32 %v8799_v35, %v3675_v24  ;;  %v3678_v28 = vadd.f32 %v8780_v52, %v3637_v63  ;;  %v8100_v63 = vld [vmem:[%s12128_s14] ss:$0 sm:$0xff] }
 0xeb5   :  { %v3719_v14 = vadd.f32 %v8802_v40, %v3678_v28 }
 0xecd   :  { %v8819_v34 = vpop.f32.mrb[44].mxu1 }
 0xece   :  { %v8820_v0 = vpop.f32.mrb[45].mxu1 }
 0xecf   :  { %v8841_v22 = vpop.f32.mrb[48].mxu0  ;;  %v8821_v59 = vadd.f32 %v8820_v0, %v8819_v34  ;;  %v8822_v3 = vpop.f32.mrb[46].mxu1 }
 0xed0   :  { %v8842_v8 = vpop.f32.mrb[49].mxu0  ;;  %v8823_v30 = vpop.f32.mrb[47].mxu1 }
 0xed1   :  { %v8843_v44 = vadd.f32 %v8842_v8, %v8841_v22  ;;  %v8844_v39 = vpop.f32.mrb[50].mxu0  ;;  %v3757_v10 = vadd.f32 %v8821_v59, %v3716_v41  ;;  %v8824_v29 = vadd.f32 %v8823_v30, %v8822_v3  ;;  %v11063_v41 = vld [vmem:[%s12173_s24] ss:$0 sm:$0xff] }
 0xed2   :  { %v8845_v53 = vpop.f32.mrb[51].mxu0 }
 0xed3   :  { %v8846_v43 = vadd.f32 %v8845_v53, %v8844_v39  ;;  %v3798_v13 = vadd.f32 %v8843_v44, %v3757_v10  ;;  %v3760_v60 = vadd.f32 %v8824_v29, %v3719_v14 }
 0xed5   :  { %v3801_v38 = vadd.f32 %v8846_v43, %v3760_v60  ;;  %v3804_v31 = vadd.f32 %v3798_v13, %v10253_v17 }
 0xed7   :  { %v3808_v12 = vsel %vm88_vm0, %v3804_v31, 0.0  ;;  %v3805_v33 = vadd.f32 %v3801_v38, %v10251_v50  ;;  %v8102_v50 = vld [vmem:[%s12169_s29 + $0x20] sm:$0xff] }
 0xed8   :  { %3809 = vadd.xlane.f32.xlu0 %v3808_v12  ;;  %v9333_v49 = vpack.c.bf16 %v8103_v23, %v8102_v50 }
 0xed9   :  { %v3811_v47 = vsel %vm88_vm0, %v3805_v33, 0.0 }
 0xeda   :  { %3812 = vadd.xlane.f32.xlu1 %v3811_v47  ;;  %9334 = vmatprep.subr.bf16.mxu1 %v9333_v49 }
 0xedb   :  { %9336 = vmatpush3.bf16.msra.mxu1 %v9333_v49 }
 0xedc   :  { %9338 = vmatprep.subr.bf16.mxu1 %v9337_v5 }
 0xedf   :  { %9340 = vmatpush3.bf16.msra.mxu1 %v9337_v5 }
 0xee0   :  { %9196 = vmatprep.subr.mxu1 %v12183_v36 }
 0xf65   :  { %v3810_v46 = vpop.xlane.xlu0 %3809 }
 0xf66   :  { %v3814_v57 = vmul.f32 0.03125, %v3810_v46 }
 0xf67   :  { %v3813_v6 = vpop.xlane.xlu1 %3812 }
 0xf68   :  { %v3816_v25 = vsub.f32 %v3804_v31, %v3814_v57  ;;  %v3815_v51 = vmul.f32 0.03125, %v3813_v6 }
 0xf6a   :  { %v3817_v11 = vsub.f32 %v3805_v33, %v3815_v51  ;;  %v3818_v20 = vmul.f32 %v3816_v25, %v3816_v25 }
 0xf6c   :  { %v3820_v19 = vsel %vm88_vm0, %v3818_v20, 0.0  ;;  %v3819_v2 = vmul.f32 %v3817_v11, %v3817_v11 }
 0xf6d   :  { %3821 = vadd.xlane.f32.xlu0 %v3820_v19 }
 0xf6e   :  { %v3823_v17 = vsel %vm88_vm0, %v3819_v2, 0.0  ;;  %v11104_v2 = vld [vmem:[%s12173_s24 + $0x1] ss:$0 sm:$0xff] }
 0xf6f   :  { %3824 = vadd.xlane.f32.xlu1 %v3823_v17 }
 0xffa   :  { %v3822_v56 = vpop.xlane.xlu0 %3821 }
 0xffb   :  { %v3826_v62 = vmul.f32 0.03125, %v3822_v56 }
 0xffc   :  { %v3825_v45 = vpop.xlane.xlu1 %3824 }
 0xffd   :  { %v3828_v16 = vadd.f32 1e-05, %v3826_v62  ;;  %v3827_v7 = vmul.f32 0.03125, %v3825_v45 }
 0xfff   :  { %9735 = vrsqrt.f32 %v3828_v16  ;;  %v3829_v55 = vadd.f32 1e-05, %v3827_v7 }
0x1001   :  { %9737 = vrsqrt.f32 %v3829_v55 }
0x1009   :  { %v9736_v21 = vpop.eup %9735 }
0x100a   :  { %v3832_v32 = vmul.f32 %v9736_v21, %v3816_v25 }
0x100b   :  { %v9738_v58 = vpop.eup %9737 }
0x100c   :  { %v3833_v9 = vmul.f32 %v9738_v58, %v3817_v11  ;;  %v3840_v48 = vmul.f32 %v8100_v63, %v3832_v32 }
0x100e   :  { %v3841_v4 = vmul.f32 %v8100_v63, %v3833_v9  ;;  %v11039_v35 = vadd.f32 %v8101_v26, %v3840_v48 }
0x1010   :  { %v11041_v61 = vadd.f32 %v8101_v26, %v3841_v4  ;;  %9193 = vmatprep.mubr.msk.f32.mxu1 %vm88_vm0, %v11039_v35 }
0x1012   :  { %9194 = vmatmul.mubr.msk.f32.vlgmr.msra.gmra.mrb[48].mxu1 %vm88_vm0, %v11041_v61 }
0x1013   :  { %9198 = vmatprep.mubr.msk.f32.mxu1 %vm9852_vm1, %v12183_v36 }
0x10e5   :  { %v9195_v24 = vpop.f32.mrb[48].mxu1 }
0x10e6   :  { %v11052_v52 = vadd.f32 %v9195_v24, %v8107_v1  ;;  %v3935_v37 = vpop.f32.mrb[49].mxu1 }
0x10e7   :  { %v11054_v40 = vadd.f32 %v8107_v1, %v3935_v37 }
0x10e8   :  { %4032 = vrot.lane.b32.xlu1 %v11052_v52, %s12184_s23  ;;  %v3952_v34 = vmul.f32 %v11063_v41, %v11052_v52  ;;  %v4297_v17 = vmul.f32 %v11104_v2, %v11052_v52 }
0x10e9   :  { %3954 = vrot.lane.b32.xlu0 %v11054_v40, %s12184_s23  ;;  %v3951_v22 = vmul.f32 %v11063_v41, %v11054_v40  ;;  %v4296_v50 = vmul.f32 %v11104_v2, %v11054_v40 }
0x115a   :  { %v11065_v28 = vpop.permute.xlu1 %4032 }
0x115b   :  { %9202 = vmatpush3.xpose.msk.msra.mxu0 %vm88_vm0, %v11065_v28  ;;  %v11069_v14 = vpop.permute.xlu0 %3954 }
0x115c   :  { %9197 = vmatpush3.xpose.msk.msra.mxu1 %vm88_vm0, %v11069_v14  ;;  %9211 = vmatprep.subr.mxu0 %v12183_v36 }
0x115d   :  { %9206 = vmatprep.subr.mxu1 %v12183_v36 }
0x115e   :  { %9204 = vmatmul.mubr.msk.f32.vlgmr.msra.gmra.mrb[52].mxu0 %vm88_vm0, %v3952_v34 }
0x115f   :  { %9199 = vmatmul.mubr.msk.f32.vlgmr.msra.gmra.mrb[50].mxu1 %vm88_vm0, %v3951_v22  ;;  %9213 = vmatprep.mubr.msk.f32.mxu0 %vm9852_vm1, %v12183_v36 }
0x1160   :  { %9208 = vmatprep.mubr.msk.f32.mxu1 %vm9852_vm1, %v12183_v36 }
0x1231   :  { %v4105_v0 = vpop.f32.mrb[52].mxu0 }
0x1232   :  { %v4110_v59 = vmul.f32 0.35355338, %v4105_v0  ;;  %v4027_v8 = vpop.f32.mrb[50].mxu1  ;;  %v9205_v3 = vpop.f32.mrb[53].mxu0 }
0x1233   :  { %v4109_v44 = vmul.f32 0.35355338, %v4027_v8  ;;  %v9200_v39 = vpop.f32.mrb[51].mxu1 }
0x1234   :  { %v4114_v30 = vsel %vm337_vm2, %v4110_v59, -inf }
0x1235   :  { %4115 = vmax.xlane.f32.xlu0 %v4114_v30  ;;  %v4111_v10 = vsel %vm337_vm2, %v4109_v44, -inf }
0x1236   :  { %4112 = vmax.xlane.f32.xlu1 %v4111_v10 }
0x12c2   :  { %v4116_v29 = vpop.xlane.xlu0 %4115 }
0x12c3   :  { %v4118_v53 = vsub.f32 %v4110_v59, %v4116_v29  ;;  %v4113_v43 = vpop.xlane.xlu1 %4112 }
0x12c4   :  { %v4117_v13 = vsub.f32 %v4109_v44, %v4113_v43  ;;  %v11139_v44 = vld [vmem:[%s12173_s24 + $0x2] ss:$0 sm:$0xff] }
0x12c5   :  { %v4121_v60 = vmul.f32 1.442695, %v4118_v53  ;;  %v4626_v39 = vmul.f32 %v11139_v44, %v11052_v52  ;;  %v4625_v30 = vmul.f32 %v11139_v44, %v11054_v40 }
0x12c6   :  { %v4119_v38 = vmul.f32 1.442695, %v4117_v13 }
0x12c7   :  { %9739 = vpow2.f32 %v4121_v60 }
0x12c8   :  { %9741 = vpow2.f32 %v4119_v38 }
0x12d1   :  { %v9740_v31 = vpop.eup %9739 }
0x12d2   :  { %v9742_v12 = vpop.eup %9741  ;;  %v4126_v33 = vsel %vm337_vm2, %v9740_v31, 0.0 }
0x12d3   :  { %4127 = vadd.xlane.f32.xlu1 %v4126_v33  ;;  %v4123_v47 = vsel %vm337_vm2, %v9742_v12, 0.0 }
0x12d4   :  { %4124 = vadd.xlane.f32.xlu0 %v4123_v47 }
0x12e4   :  { %4209 = vrot.lane.b32.xlu1 %v11052_v52, %s12185_s4 }
0x12ea   :  { %4133 = vrot.lane.b32.xlu0 %v11054_v40, %s12185_s4 }
0x1360   :  { %v4128_v46 = vpop.xlane.xlu1 %4127 }
0x1361   :  { %9743 = vrcp.f32 %v4128_v46  ;;  %v4125_v57 = vpop.xlane.xlu0 %4124 }
0x1362   :  { %9745 = vrcp.f32 %v4125_v57 }
0x1364   :  { %v11093_v6 = vpop.permute.xlu1 %4209 }
0x1365   :  { %v11095_v25 = vpop.permute.xlu0 %4133  ;;  %9212 = vmatpush3.msra.mxu0 %v11093_v6 }
0x1366   :  { %9207 = vmatpush3.msra.mxu1 %v11095_v25  ;;  %9221 = vmatprep.subr.mxu0 %v12183_v36 }
0x1367   :  { %9216 = vmatprep.subr.mxu1 %v12183_v36 }
0x136b   :  { %v9744_v51 = vpop.eup %9743 }
0x136c   :  { %v9746_v11 = vpop.eup %9745  ;;  %v4132_v20 = vmul.f32 %v9744_v51, %v9740_v31 }
0x136d   :  { %v4130_v19 = vmul.f32 %v9746_v11, %v9742_v12 }
0x136e   :  { %9214 = vmatmul.mubr.msk.f32.vlgmr.msra.gmra.mrb[54].mxu0 %vm337_vm2, %v4132_v20 }
0x136f   :  { %9222 = vmatpush3.xpose.msk.msra.mxu0 %vm88_vm0, %v11065_v28  ;;  %9209 = vmatmul.mubr.msk.f32.vlgmr.msra.gmra.mrb[52].mxu1 %vm337_vm2, %v4130_v19 }
0x1370   :  { %9217 = vmatpush3.xpose.msk.msra.mxu1 %vm88_vm0, %v11069_v14  ;;  %9223 = vmatprep.mubr.msk.f32.mxu0 %vm9852_vm1, %v12183_v36 }
0x1371   :  { %9231 = vmatprep.subr.mxu0 %v12183_v36  ;;  %9218 = vmatprep.mubr.msk.f32.mxu1 %vm9852_vm1, %v12183_v36 }
0x1372   :  { %9224 = vmatmul.mubr.msk.f32.vlgmr.msra.gmra.mrb[56].mxu0 %vm88_vm0, %v4297_v17  ;;  %9226 = vmatprep.subr.mxu1 %v12183_v36 }
0x1373   :  { %9232 = vmatpush3.msra.mxu0 %v11093_v6  ;;  %9219 = vmatmul.mubr.msk.f32.vlgmr.msra.gmra.mrb[54].mxu1 %vm88_vm0, %v4296_v50 }
0x1374   :  { %9227 = vmatpush3.msra.mxu1 %v11095_v25  ;;  %9233 = vmatprep.mubr.msk.f32.mxu0 %vm9852_vm1, %v12183_v36 }
0x1375   :  { %9241 = vmatprep.subr.mxu0 %v12183_v36  ;;  %9228 = vmatprep.mubr.msk.f32.mxu1 %vm9852_vm1, %v12183_v36 }
0x1376   :  { %9236 = vmatprep.subr.mxu1 %v12183_v36 }
0x1441   :  { %v4281_v23 = vpop.f32.mrb[54].mxu0 }
0x1442   :  { %v4205_v49 = vpop.f32.mrb[52].mxu1  ;;  %v9215_v27 = vpop.f32.mrb[55].mxu0  ;;  %v4286_v29 = vmul.f32 %v11063_v41, %v4281_v23 }
0x1443   :  { %v9210_v54 = vpop.f32.mrb[53].mxu1  ;;  %v4285_v60 = vmul.f32 %v11063_v41, %v4205_v49 }
0x1445   :  { %v4440_v5 = vpop.f32.mrb[56].mxu0 }
0x1446   :  { %v4445_v56 = vmul.f32 0.35355338, %v4440_v5  ;;  %v4367_v62 = vpop.f32.mrb[54].mxu1  ;;  %v9225_v45 = vpop.f32.mrb[57].mxu0 }
0x1447   :  { %v4444_v16 = vmul.f32 0.35355338, %v4367_v62  ;;  %v9220_v7 = vpop.f32.mrb[55].mxu1 }
0x1448   :  { %v4449_v55 = vsel %vm337_vm2, %v4445_v56, -inf }
0x1449   :  { %4450 = vmax.xlane.f32.xlu0 %v4449_v55  ;;  %v4446_v21 = vsel %vm337_vm2, %v4444_v16, -inf }
0x144a   :  { %4447 = vmax.xlane.f32.xlu1 %v4446_v21 }
0x14d6   :  { %v4451_v63 = vpop.xlane.xlu0 %4450 }
0x14d7   :  { %v4453_v32 = vsub.f32 %v4445_v56, %v4451_v63  ;;  %v4448_v58 = vpop.xlane.xlu1 %4447 }
0x14d8   :  { %v4452_v26 = vsub.f32 %v4444_v16, %v4448_v58 }
0x14d9   :  { %v4456_v9 = vmul.f32 1.442695, %v4453_v32  ;;  %v11178_v32 = vld [vmem:[%s12173_s24 + $0x3] ss:$0 sm:$0xff] }
0x14da   :  { %v4454_v48 = vmul.f32 1.442695, %v4452_v26  ;;  %v4955_v58 = vmul.f32 %v11178_v32, %v11052_v52  ;;  %v4954_v26 = vmul.f32 %v11178_v32, %v11054_v40 }
0x14db   :  { %9747 = vpow2.f32 %v4456_v9 }
0x14dc   :  { %9749 = vpow2.f32 %v4454_v48 }
0x14e5   :  { %v9748_v4 = vpop.eup %9747 }
0x14e6   :  { %v9750_v1 = vpop.eup %9749  ;;  %v4461_v24 = vsel %vm337_vm2, %v9748_v4, 0.0 }
0x14e7   :  { %4462 = vadd.xlane.f32.xlu1 %v4461_v24  ;;  %v4458_v37 = vsel %vm337_vm2, %v9750_v1, 0.0 }
0x14e8   :  { %4459 = vadd.xlane.f32.xlu0 %v4458_v37 }
0x1574   :  { %v4463_v34 = vpop.xlane.xlu1 %4462 }
0x1575   :  { %9751 = vrcp.f32 %v4463_v34  ;;  %v4460_v22 = vpop.xlane.xlu0 %4459 }
0x1576   :  { %9753 = vrcp.f32 %v4460_v22 }
0x157f   :  { %v9752_v0 = vpop.eup %9751 }
0x1580   :  { %v9754_v59 = vpop.eup %9753  ;;  %v4467_v8 = vmul.f32 %v9752_v0, %v9748_v4 }
0x1581   :  { %v4465_v3 = vmul.f32 %v9754_v59, %v9750_v1 }
0x1582   :  { %9234 = vmatmul.mubr.msk.f32.vlgmr.msra.gmra.mrb[58].mxu0 %vm337_vm2, %v4467_v8 }
0x1583   :  { %9242 = vmatpush3.xpose.msk.msra.mxu0 %vm88_vm0, %v11065_v28  ;;  %9229 = vmatmul.mubr.msk.f32.vlgmr.msra.gmra.mrb[56].mxu1 %vm337_vm2, %v4465_v3 }
0x1584   :  { %9237 = vmatpush3.xpose.msk.msra.mxu1 %vm88_vm0, %v11069_v14  ;;  %9243 = vmatprep.mubr.msk.f32.mxu0 %vm9852_vm1, %v12183_v36 }
0x1585   :  { %9251 = vmatprep.subr.mxu0 %v12183_v36  ;;  %9238 = vmatprep.mubr.msk.f32.mxu1 %vm9852_vm1, %v12183_v36 }
0x1586   :  { %9244 = vmatmul.mubr.msk.f32.vlgmr.msra.gmra.mrb[60].mxu0 %vm88_vm0, %v4626_v39  ;;  %9246 = vmatprep.subr.mxu1 %v12183_v36 }
0x1587   :  { %9252 = vmatpush3.msra.mxu0 %v11093_v6  ;;  %9239 = vmatmul.mubr.msk.f32.vlgmr.msra.gmra.mrb[58].mxu1 %vm88_vm0, %v4625_v30 }
0x1588   :  { %9247 = vmatpush3.msra.mxu1 %v11095_v25  ;;  %9253 = vmatprep.mubr.msk.f32.mxu0 %vm9852_vm1, %v12183_v36 }
0x1589   :  { %9261 = vmatprep.subr.mxu0 %v12183_v36  ;;  %9248 = vmatprep.mubr.msk.f32.mxu1 %vm9852_vm1, %v12183_v36 }
0x158a   :  { %9256 = vmatprep.subr.mxu1 %v12183_v36 }
0x1655   :  { %v4610_v10 = vpop.f32.mrb[58].mxu0 }
0x1656   :  { %v4615_v53 = vmul.f32 %v11104_v2, %v4610_v10  ;;  %v4537_v43 = vpop.f32.mrb[56].mxu1  ;;  %v9235_v13 = vpop.f32.mrb[59].mxu0 }
0x1657   :  { %v4614_v38 = vmul.f32 %v11104_v2, %v4537_v43  ;;  %v9230_v31 = vpop.f32.mrb[57].mxu1  ;;  %v8141_v13 = vld [vmem:[%s12174_s0 + $0x20] sm:$0xff] }
0x1658   :  { %v4617_v12 = vadd.f32 %v4615_v53, %v4286_v29 }
0x1659   :  { %v4616_v33 = vadd.f32 %v4614_v38, %v4285_v60  ;;  %v4769_v47 = vpop.f32.mrb[60].mxu0  ;;  %v8142_v60 = vld [vmem:[%s12174_s0 + $0x28] sm:$0xff] }
0x165a   :  { %v4774_v46 = vmul.f32 0.35355338, %v4769_v47  ;;  %v4696_v57 = vpop.f32.mrb[58].mxu1  ;;  %v9245_v51 = vpop.f32.mrb[61].mxu0  ;;  %v9341_v38 = vpack.c.bf16 %v8142_v60, %v8141_v13  ;;  %v8164_v13 = vld [vmem:[%s12122_s10 + $0x158] sm:$0xff] }
0x165b   :  { %v4773_v11 = vmul.f32 0.35355338, %v4696_v57  ;;  %v9240_v20 = vpop.f32.mrb[59].mxu1  ;;  %v12186_v51 = vmov 0  }
0x165c   :  { %v4778_v19 = vsel %vm337_vm2, %v4774_v46, -inf  ;;  %v8144_v20 = vld [vmem:[%s12174_s0 + $0x38] sm:$0xff] }
0x165d   :  { %4779 = vmax.xlane.f32.xlu1 %v4778_v19  ;;  %v4775_v17 = vsel %vm337_vm2, %v4773_v11, -inf }
0x165e   :  { %4776 = vmax.xlane.f32.xlu0 %v4775_v17 }
0x16ea   :  { %v4780_v50 = vpop.xlane.xlu1 %4779 }
0x16eb   :  { %v4782_v23 = vsub.f32 %v4774_v46, %v4780_v50  ;;  %v4777_v41 = vpop.xlane.xlu0 %4776 }
0x16ec   :  { %v4781_v49 = vsub.f32 %v4773_v11, %v4777_v41  ;;  %v8143_v11 = vld [vmem:[%s12174_s0 + $0x30] sm:$0xff] }
0x16ed   :  { %v4785_v2 = vmul.f32 1.442695, %v4782_v23  ;;  %v9345_v19 = vpack.c.bf16 %v8144_v20, %v8143_v11  ;;  %v8151_v20 = vld [vmem:[%s12124_s8 + $0x1] ss:$0 sm:$0xff] }
0x16ee   :  { %v4783_v27 = vmul.f32 1.442695, %v4781_v49 }
0x16ef   :  { %9755 = vpow2.f32 %v4785_v2 }
0x16f0   :  { %9757 = vpow2.f32 %v4783_v27 }
0x16f9   :  { %v9756_v54 = vpop.eup %9755 }
0x16fa   :  { %v9758_v5 = vpop.eup %9757  ;;  %v4790_v56 = vsel %vm337_vm2, %v9756_v54, 0.0 }
0x16fb   :  { %4791 = vadd.xlane.f32.xlu1 %v4790_v56  ;;  %v4787_v62 = vsel %vm337_vm2, %v9758_v5, 0.0 }
0x16fc   :  { %4788 = vadd.xlane.f32.xlu0 %v4787_v62 }
0x1788   :  { %v4792_v45 = vpop.xlane.xlu1 %4791 }
0x1789   :  { %9759 = vrcp.f32 %v4792_v45  ;;  %v4789_v16 = vpop.xlane.xlu0 %4788 }
0x178a   :  { %9761 = vrcp.f32 %v4789_v16 }
0x1793   :  { %v9760_v7 = vpop.eup %9759 }
0x1794   :  { %v9762_v55 = vpop.eup %9761  ;;  %v4796_v21 = vmul.f32 %v9760_v7, %v9756_v54 }
0x1795   :  { %v4794_v63 = vmul.f32 %v9762_v55, %v9758_v5  ;;  %v8146_v5 = vld [vmem:[%s12175_s3 + $0x1] ss:$0 sm:$0xff] }
0x1796   :  { %9254 = vmatmul.mubr.msk.f32.vlgmr.msra.gmra.mrb[62].mxu0 %vm337_vm2, %v4796_v21 }
0x1797   :  { %9262 = vmatpush3.xpose.msk.msra.mxu0 %vm88_vm0, %v11065_v28  ;;  %9249 = vmatmul.mubr.msk.f32.vlgmr.msra.gmra.mrb[60].mxu1 %vm337_vm2, %v4794_v63 }
0x1798   :  { %9257 = vmatpush3.xpose.msk.msra.mxu1 %vm88_vm0, %v11069_v14  ;;  %9263 = vmatprep.mubr.msk.f32.mxu0 %vm9852_vm1, %v12183_v36 }
0x1799   :  { %9271 = vmatprep.subr.mxu0 %v12183_v36  ;;  %9258 = vmatprep.mubr.msk.f32.mxu1 %vm9852_vm1, %v12183_v36 }
0x179a   :  { %9264 = vmatmul.mubr.msk.f32.vlgmr.msra.gmra.mrb[64].mxu0 %vm88_vm0, %v4955_v58  ;;  %9266 = vmatprep.subr.mxu1 %v12183_v36 }
0x179b   :  { %9272 = vmatpush3.msra.mxu0 %v11093_v6  ;;  %9259 = vmatmul.mubr.msk.f32.vlgmr.msra.gmra.mrb[62].mxu1 %vm88_vm0, %v4954_v26 }
0x179c   :  { %9267 = vmatpush3.msra.mxu1 %v11095_v25  ;;  %9273 = vmatprep.mubr.msk.f32.mxu0 %vm9852_vm1, %v12183_v36 }
0x179d   :  { %9268 = vmatprep.mubr.msk.f32.mxu1 %vm9852_vm1, %v12183_v36  ;;  %9342 = vmatprep.subr.bf16.mxu1 %v9341_v38 }
0x1869   :  { %v4939_v52 = vpop.f32.mrb[62].mxu0 }
0x186a   :  { %v4944_v28 = vmul.f32 %v11139_v44, %v4939_v52  ;;  %v4866_v40 = vpop.f32.mrb[60].mxu1  ;;  %v9255_v14 = vpop.f32.mrb[63].mxu0 }
0x186b   :  { %v4943_v9 = vmul.f32 %v11139_v44, %v4866_v40  ;;  %v9250_v48 = vpop.f32.mrb[61].mxu1 }
0x186c   :  { %v4946_v4 = vadd.f32 %v4944_v28, %v4617_v12 }
0x186d   :  { %v4945_v6 = vadd.f32 %v4943_v9, %v4616_v33  ;;  %v5098_v1 = vpop.f32.mrb[64].mxu0 }
0x186e   :  { %v5103_v24 = vmul.f32 0.35355338, %v5098_v1  ;;  %v5025_v37 = vpop.f32.mrb[62].mxu1  ;;  %v9265_v25 = vpop.f32.mrb[65].mxu0 }
0x186f   :  { %v5102_v34 = vmul.f32 0.35355338, %v5025_v37  ;;  %v9260_v22 = vpop.f32.mrb[63].mxu1 }
0x1870   :  { %v5107_v0 = vsel %vm337_vm2, %v5103_v24, -inf  ;;  %v8169_v22 = vld [vmem:[%s12122_s10 + $0x180] sm:$0xff] }
0x1871   :  { %5108 = vmax.xlane.f32.xlu1 %v5107_v0  ;;  %v5104_v36 = vsel %vm337_vm2, %v5102_v34, -inf  ;;  %v8177_v0 = vld [vmem:[%s12122_s10 + $0x1c0] sm:$0xff] }
0x1872   :  { %5105 = vmax.xlane.f32.xlu0 %v5104_v36  ;;  %v8170_v36 = vld [vmem:[%s12122_s10 + $0x188] sm:$0xff] }
0x18fe   :  { %v5109_v59 = vpop.xlane.xlu1 %5108 }
0x18ff   :  { %v5111_v8 = vsub.f32 %v5103_v24, %v5109_v59  ;;  %v5106_v3 = vpop.xlane.xlu0 %5105  ;;  %v8162_v24 = vld [vmem:[%s12122_s10 + $0x148] sm:$0xff]  ;;  %v8204_v59 = vcombine.high %v8169_v22, %v8177_v0 }
0x1900   :  { %v5110_v39 = vsub.f32 %v5102_v34, %v5106_v3  ;;  %v8203_v3 = vcombine.low %v8169_v22, %v8177_v0 }
0x1901   :  { %v5114_v44 = vmul.f32 1.442695, %v5111_v8  ;;  %v8178_v8 = vld [vmem:[%s12122_s10 + $0x1c8] sm:$0xff] }
0x1902   :  { %v5112_v30 = vmul.f32 1.442695, %v5110_v39  ;;  %v8205_v39 = vcombine.low %v8170_v36, %v8178_v8 }
0x1903   :  { %9763 = vpow2.f32 %v5114_v44  ;;  %v8206_v44 = vcombine.high %v8170_v36, %v8178_v8  ;;  %v8183_v8 = vld [vmem:[%s12122_s10 + $0x1f0] sm:$0xff] }
0x1904   :  { %9765 = vpow2.f32 %v5112_v30  ;;  %v8155_v30 = vld [vmem:[%s12122_s10 + $0x110] sm:$0xff] }
0x190d   :  { %v9764_v10 = vpop.eup %9763 }
0x190e   :  { %v9766_v29 = vpop.eup %9765  ;;  %v5119_v53 = vsel %vm337_vm2, %v9764_v10, 0.0 }
0x190f   :  { %5120 = vadd.xlane.f32.xlu1 %v5119_v53  ;;  %v5116_v43 = vsel %vm337_vm2, %v9766_v29, 0.0 }
0x1910   :  { %5117 = vadd.xlane.f32.xlu0 %v5116_v43 }
0x199c   :  { %v5121_v31 = vpop.xlane.xlu1 %5120 }
0x199d   :  { %9767 = vrcp.f32 %v5121_v31  ;;  %v5118_v12 = vpop.xlane.xlu0 %5117 }
0x199e   :  { %9769 = vrcp.f32 %v5118_v12 }
0x19a7   :  { %v9768_v33 = vpop.eup %9767 }
0x19a8   :  { %v9770_v47 = vpop.eup %9769  ;;  %v5125_v46 = vmul.f32 %v9768_v33, %v9764_v10  ;;  %v8163_v10 = vld [vmem:[%s12122_s10 + $0x150] sm:$0xff] }
0x19a9   :  { %v5123_v57 = vmul.f32 %v9770_v47, %v9766_v29  ;;  %v8156_v29 = vld [vmem:[%s12122_s10 + $0x118] sm:$0xff]  ;;  %v8191_v53 = vcombine.low %v8155_v30, %v8163_v10  ;;  %v8192_v43 = vcombine.high %v8155_v30, %v8163_v10 }
0x19aa   :  { %9274 = vmatmul.mubr.msk.f32.vlgmr.msra.gmra.mrb[66].mxu0 %vm337_vm2, %v5125_v46  ;;  %v8193_v60 = vcombine.low %v8156_v29, %v8164_v13 }
0x19ab   :  { %9269 = vmatmul.mubr.msk.f32.vlgmr.msra.gmra.mrb[64].mxu1 %vm337_vm2, %v5123_v57  ;;  %5732 = vmatprep.mubr.bf16.mxu0 %v12186_v51 }
0x19ac   :  { %9344 = vmatpush3.bf16.msra.mxu1 %v9341_v38  ;;  %v8194_v38 = vcombine.high %v8156_v29, %v8164_v13  ;;  %v9507_v13 = vld [vmem:[%s12123_s12 + $0x440] sm:$0xff]  }
0x19ad   :  { %9346 = vmatprep.subr.bf16.mxu1 %v9345_v19 }
0x19b0   :  { %9348 = vmatpush3.bf16.msra.mxu1 %v9345_v19 }
0x1a7d   :  { %v5268_v17 = vpop.f32.mrb[66].mxu0 }
0x1a7e   :  { %v5273_v50 = vmul.f32 %v11178_v32, %v5268_v17  ;;  %v5195_v23 = vpop.f32.mrb[64].mxu1  ;;  %v9275_v41 = vpop.f32.mrb[67].mxu0 }
0x1a7f   :  { %v5272_v49 = vmul.f32 %v11178_v32, %v5195_v23  ;;  %v9270_v2 = vpop.f32.mrb[65].mxu1 }
0x1a80   :  { %v5275_v27 = vadd.f32 %v5273_v50, %v4946_v4  ;;  %v8161_v4 = vld [vmem:[%s12122_s10 + $0x140] sm:$0xff]  ;;  %v8171_v2 = vld [vmem:[%s12122_s10 + $0x190] sm:$0xff] }
0x1a81   :  { %v5274_v54 = vadd.f32 %v5272_v49, %v4945_v6  ;;  %v8154_v6 = vld [vmem:[%s12122_s10 + $0x108] sm:$0xff]  ;;  %v8152_v50 = vld [vmem:[%s12125_s9 + $0x1] ss:$0 sm:$0xff] }
0x1a82   :  { %v8189_v25 = vcombine.low %v8154_v6, %v8162_v24  ;;  %v8190_v34 = vcombine.high %v8154_v6, %v8162_v24  ;;  %v8167_v24 = vld [vmem:[%s12122_s10 + $0x170] sm:$0xff] }
0x1a83   :  { %9284 = vmatprep.mubr.msk.f32.mxu1 %vm88_vm0, %v5274_v54  ;;  %v8179_v54 = vld [vmem:[%s12122_s10 + $0x1d0] sm:$0xff] }
0x1a84   :  { %9285 = vmatmul.mubr.msk.f32.vlgmr.msra.gmra.mrb[66].mxu1 %vm88_vm0, %v5275_v27  ;;  %5743 = vmatprep.subr.bf16.mxu1 %v8190_v34 }
0x1a85   :  { %5775 = vmatprep.mubr.bf16.mxu1 %v12186_v51  ;;  %5744 = vmatpush1.bf16.msra.mxu1 %v8189_v25  ;;  %v8168_v25 = vld [vmem:[%s12122_s10 + $0x178] sm:$0xff] }
0x1a86   :  { %5745 = vmatprep.subr.bf16.mxu1 %v8206_v44 }
0x1a89   :  { %5746 = vmatpush1.bf16.msra.mxu1 %v8205_v39  ;;  %v8184_v39 = vld [vmem:[%s12122_s10 + $0x1f8] sm:$0xff] }
0x1a8a   :  { %5829 = vmatprep.subr.bf16.mxu1 %v8194_v38  ;;  %v9509_v38 = vld [vmem:[%s12123_s12 + $0x400] sm:$0xff]  }
0x1b57   :  { %v9286_v56 = vpop.f32.mrb[66].mxu1 }
0x1b58   :  { %v5367_v62 = vadd.f32 %v9286_v56, %v8146_v5  ;;  %v5361_v45 = vpop.f32.mrb[67].mxu1  ;;  %v8180_v56 = vld [vmem:[%s12122_s10 + $0x1d8] sm:$0xff] }
0x1b59   :  { %v5362_v16 = vadd.f32 %v8146_v5, %v5361_v45  ;;  %v8172_v5 = vld [vmem:[%s12122_s10 + $0x198] sm:$0xff] }
0x1b5a   :  { %v5371_v7 = vadd.f32 %v5367_v62, %v11041_v61 }
0x1b5b   :  { %v5370_v55 = vadd.f32 %v5362_v16, %v11039_v35  ;;  %v8153_v35 = vld [vmem:[%s12122_s10 + $0x100] sm:$0xff]  ;;  %v8208_v16 = vcombine.high %v8171_v2, %v8179_v54 }
0x1b5c   :  { %v5379_v21 = vsel %vm88_vm0, %v5371_v7, 0.0  ;;  %v8188_v1 = vcombine.high %v8153_v35, %v8161_v4  ;;  %v8187_v37 = vcombine.low %v8153_v35, %v8161_v4 }
0x1b5d   :  { %5380 = vadd.xlane.f32.xlu1 %v5379_v21  ;;  %v5376_v63 = vsel %vm88_vm0, %v5370_v55, 0.0  ;;  %v8165_v21 = vld [vmem:[%s12122_s10 + $0x160] sm:$0xff] }
0x1b5e   :  { %5377 = vadd.xlane.f32.xlu0 %v5376_v63  ;;  %5700 = vmatprep.subr.bf16.mxu0 %v8188_v1  ;;  %v8158_v63 = vld [vmem:[%s12122_s10 + $0x128] sm:$0xff]  ;;  %v8159_v1 = vld [vmem:[%s12122_s10 + $0x130] sm:$0xff] }
0x1b5f   :  { %5701 = vmatpush1.bf16.msra.mxu0 %v8187_v37  ;;  %v8160_v37 = vld [vmem:[%s12122_s10 + $0x138] sm:$0xff]  ;;  %v8200_v0 = vcombine.high %v8159_v1, %v8167_v24  ;;  %v8199_v44 = vcombine.low %v8159_v1, %v8167_v24 }
0x1b60   :  { %5702 = vmatprep.subr.bf16.mxu0 %v8204_v59  ;;  %v8202_v36 = vcombine.high %v8160_v37, %v8168_v25  ;;  %v8175_v59 = vld [vmem:[%s12122_s10 + $0x1b0] sm:$0xff]  ;;  %v8201_v30 = vcombine.low %v8160_v37, %v8168_v25 }
0x1b61   :  { %v8216_v10 = vcombine.high %v8175_v59, %v8183_v8 }
0x1b63   :  { %5703 = vmatpush1.bf16.msra.mxu0 %v8203_v3  ;;  %v8176_v3 = vld [vmem:[%s12122_s10 + $0x1b8] sm:$0xff] }
0x1b64   :  { %5786 = vmatprep.subr.bf16.mxu0 %v8192_v43  ;;  %v8218_v29 = vcombine.high %v8176_v3, %v8184_v39  ;;  %v8217_v43 = vcombine.low %v8176_v3, %v8184_v39 }
0x1bea   :  { %v5381_v32 = vpop.xlane.xlu1 %5380 }
0x1beb   :  { %v5383_v58 = vmul.f32 0.03125, %v5381_v32  ;;  %v5378_v26 = vpop.xlane.xlu0 %5377  ;;  %v8166_v32 = vld [vmem:[%s12122_s10 + $0x168] sm:$0xff] }
0x1bec   :  { %v5382_v52 = vmul.f32 0.03125, %v5378_v26  ;;  %v8209_v26 = vcombine.low %v8172_v5, %v8180_v56  ;;  %v8197_v35 = vcombine.low %v8158_v63, %v8166_v32 }
0x1bed   :  { %v5385_v28 = vsub.f32 %v5371_v7, %v5383_v58  ;;  %v8210_v7 = vcombine.high %v8172_v5, %v8180_v56  ;;  %v8207_v58 = vcombine.low %v8171_v2, %v8179_v54  ;;  %v9525_v2 = vld [vmem:[%s12123_s12 + $0x420] sm:$0xff]   ;;  %v9527_v5 = vld [vmem:[%s12123_s12 + $0x468] sm:$0xff]  }
0x1bee   :  { %v5384_v40 = vsub.f32 %v5370_v55, %v5382_v52  ;;  %v8157_v55 = vld [vmem:[%s12122_s10 + $0x120] sm:$0xff]  ;;  %v9528_v56 = vld [vmem:[%s12123_s12 + $0x4e8] sm:$0xff]  }
0x1bef   :  { %v5387_v14 = vmul.f32 %v5385_v28, %v5385_v28  ;;  %v8196_v52 = vcombine.high %v8157_v55, %v8165_v21  ;;  %v9526_v54 = vld [vmem:[%s12123_s12 + $0x4a0] sm:$0xff]  }
0x1bf0   :  { %v5386_v9 = vmul.f32 %v5384_v40, %v5384_v40 }
0x1bf1   :  { %v5391_v48 = vsel %vm88_vm0, %v5387_v14, 0.0  ;;  %v8181_v14 = vld [vmem:[%s12122_s10 + $0x1e0] sm:$0xff] }
0x1bf2   :  { %5392 = vadd.xlane.f32.xlu1 %v5391_v48  ;;  %v5388_v61 = vsel %vm88_vm0, %v5386_v9, 0.0  ;;  %v8174_v9 = vld [vmem:[%s12122_s10 + $0x1a8] sm:$0xff] }
0x1bf3   :  { %5389 = vadd.xlane.f32.xlu0 %v5388_v61  ;;  %v8182_v48 = vld [vmem:[%s12122_s10 + $0x1e8] sm:$0xff]  ;;  %v8195_v61 = vcombine.low %v8157_v55, %v8165_v21  ;;  %v9532_v55 = vld [vmem:[%s12123_s12 + $0x4f0] sm:$0xff]  }
0x1bf4   :  { %v8214_v6 = vcombine.high %v8174_v9, %v8182_v48  ;;  %v8213_v22 = vcombine.low %v8174_v9, %v8182_v48  ;;  %v9533_v21 = vld [vmem:[%s12123_s12 + $0x430] sm:$0xff]  }
0x1c7f   :  { %v5393_v31 = vpop.xlane.xlu1 %5392 }
0x1c80   :  { %v5395_v12 = vmul.f32 0.03125, %v5393_v31  ;;  %v5390_v33 = vpop.xlane.xlu0 %5389  ;;  %v9510_v31 = vld [vmem:[%s12123_s12 + $0x480] sm:$0xff]  }
0x1c81   :  { %v5394_v47 = vmul.f32 0.03125, %v5390_v33  ;;  %v9513_v33 = vld [vmem:[%s12123_s12 + $0x408] sm:$0xff]  }
0x1c82   :  { %v5397_v46 = vadd.f32 1e-05, %v5395_v12  ;;  %v9511_v12 = vld [vmem:[%s12123_s12 + $0x448] sm:$0xff]  }
0x1c83   :  { %v5396_v57 = vadd.f32 1e-05, %v5394_v47  ;;  %v9514_v47 = vld [vmem:[%s12123_s12 + $0x488] sm:$0xff]  }
0x1c84   :  { %9771 = vrsqrt.f32 %v5397_v46  ;;  %v9515_v46 = vld [vmem:[%s12123_s12 + $0x450] sm:$0xff]  }
0x1c85   :  { %9773 = vrsqrt.f32 %v5396_v57  ;;  %v9516_v57 = vld [vmem:[%s12123_s12 + $0x4d0] sm:$0xff]  }
0x1c8e   :  { %v9772_v11 = vpop.eup %9771 }
0x1c8f   :  { %v9774_v19 = vpop.eup %9773  ;;  %v5401_v17 = vmul.f32 %v9772_v11, %v5385_v28  ;;  %v8198_v28 = vcombine.high %v8158_v63, %v8166_v32  ;;  %v9517_v11 = vld [vmem:[%s12123_s12 + $0x410] sm:$0xff]   ;;  %v9535_v32 = vld [vmem:[%s12123_s12 + $0x478] sm:$0xff]  }
0x1c90   :  { %v5400_v23 = vmul.f32 %v9774_v19, %v5384_v40  ;;  %v8173_v40 = vld [vmem:[%s12122_s10 + $0x1a0] sm:$0xff]  ;;  %v9519_v19 = vld [vmem:[%s12123_s12 + $0x458] sm:$0xff]   ;;  %v9534_v63 = vld [vmem:[%s12123_s12 + $0x4b0] sm:$0xff]  }
0x1c91   :  { %v5409_v41 = vmul.f32 %v8151_v20, %v5401_v17  ;;  %v8212_v4 = vcombine.high %v8173_v40, %v8181_v14  ;;  %v8211_v34 = vcombine.low %v8173_v40, %v8181_v14  ;;  %v9520_v17 = vld [vmem:[%s12123_s12 + $0x4d8] sm:$0xff]   ;;  %v9540_v40 = vld [vmem:[%s12123_s12 + $0x5c0] sm:$0xff]   ;;  %v8185_v14 = vld [vmem:[%s12126_s11 + $0x10] sm:$0xff] }
0x1c92   :  { %v5408_v49 = vmul.f32 %v8151_v20, %v5400_v23  ;;  %v9518_v20 = vld [vmem:[%s12123_s12 + $0x490] sm:$0xff]   ;;  %v9522_v23 = vld [vmem:[%s12123_s12 + $0x498] sm:$0xff]   ;;  %v5460_v9 = vrot.slane %v8185_v14, %v10431_v18  ;;  %v5468_v48 = vrot.slane %v8185_v14, %v10433_v15 }
0x1c93   :  { %v11284_v27 = vadd.f32 %v8152_v50, %v5409_v41  ;;  %v9523_v41 = vld [vmem:[%s12123_s12 + $0x460] sm:$0xff]  }
0x1c94   :  { %v11295_v62 = vadd.f32 %v8152_v50, %v5408_v49  ;;  %v9521_v50 = vld [vmem:[%s12123_s12 + $0x418] sm:$0xff]   ;;  %v9524_v49 = vld [vmem:[%s12123_s12 + $0x4e0] sm:$0xff]  }
0x1c96   :  { %v11299_v45 = vpack.c.bf16 %v11284_v27, %v11295_v62 }
0x1c98   :  { %8219 = vmatmul.mubr.msk.bf16.vlgmr.msra.gmra.mrb[68].mxu0 %vm88_vm0, %v11299_v45  ;;  %8220 = vmatmul.mubr.msk.bf16.vlgmr.msra.gmra.mrb[68].mxu1 %vm88_vm0, %v11299_v45 }
0x1c99   :  { %5787 = vmatpush1.bf16.msra.mxu0 %v8191_v53  ;;  %5830 = vmatpush1.bf16.msra.mxu1 %v8193_v60  ;;  %v8215_v53 = vcombine.low %v8175_v59, %v8183_v8  ;;  %v9508_v60 = vld [vmem:[%s12123_s12 + $0x4c0] sm:$0xff]  }
0x1c9a   :  { %5788 = vmatprep.subr.bf16.mxu0 %v8208_v16  ;;  %5831 = vmatprep.subr.bf16.mxu1 %v8210_v7  ;;  %v9530_v16 = vld [vmem:[%s12123_s12 + $0x4a8] sm:$0xff]   ;;  %v9531_v7 = vld [vmem:[%s12123_s12 + $0x470] sm:$0xff]  }
0x1c9b   :  { %5818 = vmatprep.mubr.bf16.mxu0 %v12186_v51  ;;  %5861 = vmatprep.mubr.bf16.mxu1 %v12186_v51 }
0x1c9d   :  { %5789 = vmatpush1.bf16.msra.mxu0 %v8207_v58  ;;  %5832 = vmatpush1.bf16.msra.mxu1 %v8209_v26  ;;  %v9536_v58 = vld [vmem:[%s12123_s12 + $0x4f8] sm:$0xff]  }
0x1c9e   :  { %5872 = vmatprep.subr.bf16.mxu0 %v8196_v52  ;;  %5915 = vmatprep.subr.bf16.mxu1 %v8198_v28  ;;  %v9537_v26 = vld [vmem:[%s12123_s12 + $0x438] sm:$0xff]   ;;  %v9539_v28 = vld [vmem:[%s12123_s12 + $0x540] sm:$0xff]  }
0x1c9f   :  { %v9538_v52 = vld [vmem:[%s12123_s12 + $0x4b8] sm:$0xff]  }
0x1ca0   :  { %8221 = vmatmul.mubr.msk.bf16.vlgmr.msra.gmra.mrb[72].mxu0 %vm88_vm0, %v11299_v45  ;;  %8222 = vmatmul.mubr.msk.bf16.vlgmr.msra.gmra.mrb[72].mxu1 %vm88_vm0, %v11299_v45 }
0x1ca1   :  { %5873 = vmatpush1.bf16.msra.mxu0 %v8195_v61  ;;  %5916 = vmatpush1.bf16.msra.mxu1 %v8197_v35  ;;  %v5464_v61 = vrot.slane %v8185_v14, %v10438_v42  ;;  %v12187_v35 = vld [vmem:[#allocation2_spill] sm:$0xff] }
0x1ca2   :  { %5874 = vmatprep.subr.bf16.mxu0 %v8212_v4  ;;  %5917 = vmatprep.subr.bf16.mxu1 %v8214_v6  ;;  %v5472_v4 = vrot.slane %v8185_v14, %v12187_v35 }
0x1ca3   :  { %5904 = vmatprep.mubr.bf16.mxu0 %v12186_v51  ;;  %5947 = vmatprep.mubr.bf16.mxu1 %v12186_v51 }
0x1ca5   :  { %5875 = vmatpush1.bf16.msra.mxu0 %v8211_v34  ;;  %5918 = vmatpush1.bf16.msra.mxu1 %v8213_v22 }
0x1ca6   :  { %5958 = vmatprep.subr.bf16.mxu0 %v8200_v0  ;;  %6001 = vmatprep.subr.bf16.mxu1 %v8202_v36 }
0x1ca8   :  { %8223 = vmatmul.mubr.msk.bf16.vlgmr.msra.gmra.mrb[76].mxu0 %vm88_vm0, %v11299_v45  ;;  %8224 = vmatmul.mubr.msk.bf16.vlgmr.msra.gmra.mrb[76].mxu1 %vm88_vm0, %v11299_v45 }
0x1ca9   :  { %5959 = vmatpush1.bf16.msra.mxu0 %v8199_v44  ;;  %6002 = vmatpush1.bf16.msra.mxu1 %v8201_v30  ;;  %v12188_v30 = vld [vmem:[#allocation3_spill] sm:$0xff] }
0x1caa   :  { %5960 = vmatprep.subr.bf16.mxu0 %v8216_v10  ;;  %6003 = vmatprep.subr.bf16.mxu1 %v8218_v29  ;;  %v5476_v10 = vrot.slane %v8185_v14, %v12188_v30  ;;  %v8186_v29 = vld [vmem:[%s12126_s11 + $0x18] sm:$0xff] }
0x1cab   :  { %5990 = vmatprep.mubr.bf16.mxu0 %v12186_v51  ;;  %6033 = vmatprep.mubr.bf16.mxu1 %v12186_v51  ;;  %v9512_v51 = vld [vmem:[%s12123_s12 + $0x4c8] sm:$0xff]  }
0x1cad   :  { %5961 = vmatpush1.bf16.msra.mxu0 %v8215_v53  ;;  %6004 = vmatpush1.bf16.msra.mxu1 %v8217_v43 }
0x1cae   :  { %8891 = vmatprep.subr.bf16.mxu0 %v9507_v13  ;;  %8913 = vmatprep.subr.bf16.mxu1 %v9508_v60 }
0x1cb0   :  { %8225 = vmatmul.mubr.msk.bf16.vlgmr.msra.gmra.mrb[80].mxu0 %vm88_vm0, %v11299_v45  ;;  %8226 = vmatmul.mubr.msk.bf16.vlgmr.msra.gmra.mrb[80].mxu1 %vm88_vm0, %v11299_v45  ;;  %v9529_v45 = vld [vmem:[%s12123_s12 + $0x428] sm:$0xff]  }
0x1cb1   :  { %8892 = vmatpush3.bf16.msra.mxu0 %v9509_v38  ;;  %8914 = vmatpush3.bf16.msra.mxu1 %v9510_v31  ;;  %v12189_v38 = vld [vmem:[#allocation4_spill] sm:$0xff] }
0x1cb2   :  { %8893 = vmatprep.subr.bf16.mxu0 %v9511_v12  ;;  %8915 = vmatprep.subr.bf16.mxu1 %v9512_v51  ;;  %v5484_v31 = vrot.slane %v8185_v14, %v12189_v38  ;;  %v12190_v51 = vld [vmem:[#allocation5_spill] sm:$0xff] }
0x1cb5   :  { %8894 = vmatpush3.bf16.msra.mxu0 %v9513_v33  ;;  %8916 = vmatpush3.bf16.msra.mxu1 %v9514_v47  ;;  %v5480_v33 = vrot.slane %v8185_v14, %v12190_v51  ;;  %v12191_v47 = vld [vmem:[#allocation6_spill] sm:$0xff] }
0x1cb6   :  { %8895 = vmatprep.subr.bf16.mxu0 %v9515_v46  ;;  %8917 = vmatprep.subr.bf16.mxu1 %v9516_v57  ;;  %v5488_v46 = vrot.slane %v8185_v14, %v12191_v47 }
0x1cb9   :  { %8896 = vmatpush3.bf16.msra.mxu0 %v9517_v11  ;;  %8918 = vmatpush3.bf16.msra.mxu1 %v9518_v20  ;;  %v11488_v20 = vrot.slane %v8186_v29, %v10431_v18 }
0x1cba   :  { %8897 = vmatprep.subr.bf16.mxu0 %v9519_v19  ;;  %8919 = vmatprep.subr.bf16.mxu1 %v9520_v17 }
0x1cbd   :  { %8898 = vmatpush3.bf16.msra.mxu0 %v9521_v50  ;;  %8920 = vmatpush3.bf16.msra.mxu1 %v9522_v23  ;;  %v11491_v23 = vrot.slane %v8186_v29, %v10433_v15 }
0x1cbe   :  { %8899 = vmatprep.subr.bf16.mxu0 %v9523_v41  ;;  %8921 = vmatprep.subr.bf16.mxu1 %v9524_v49 }
0x1cc1   :  { %8900 = vmatpush3.bf16.msra.mxu0 %v9525_v2  ;;  %8922 = vmatpush3.bf16.msra.mxu1 %v9526_v54  ;;  %v11494_v54 = vrot.slane %v8186_v29, %v10438_v42  ;;  %v11505_v42 = vrot.slane %v8186_v29, %v12189_v38 }
0x1cc2   :  { %8901 = vmatprep.subr.bf16.mxu0 %v9527_v5  ;;  %8923 = vmatprep.subr.bf16.mxu1 %v9528_v56  ;;  %v11497_v5 = vrot.slane %v8186_v29, %v12187_v35 }
0x1cc5   :  { %8902 = vmatpush3.bf16.msra.mxu0 %v9529_v45  ;;  %8924 = vmatpush3.bf16.msra.mxu1 %v9530_v16 }
0x1cc6   :  { %8903 = vmatprep.subr.bf16.mxu0 %v9531_v7  ;;  %8925 = vmatprep.subr.bf16.mxu1 %v9532_v55  ;;  %v11500_v7 = vrot.slane %v8186_v29, %v12188_v30 }
0x1cc9   :  { %8904 = vmatpush3.bf16.msra.mxu0 %v9533_v21  ;;  %8926 = vmatpush3.bf16.msra.mxu1 %v9534_v63 }
0x1cca   :  { %8905 = vmatprep.subr.bf16.mxu0 %v9535_v32  ;;  %8927 = vmatprep.subr.bf16.mxu1 %v9536_v58 }
0x1ccd   :  { %8906 = vmatpush3.bf16.msra.mxu0 %v9537_v26  ;;  %8928 = vmatpush3.bf16.msra.mxu1 %v9538_v52  ;;  %v11508_v52 = vrot.slane %v8186_v29, %v12190_v51 }
0x1cce   :  { %8935 = vmatprep.subr.bf16.mxu0 %v9539_v28  ;;  %8957 = vmatprep.subr.bf16.mxu1 %v9540_v40  ;;  %v11511_v28 = vrot.slane %v8186_v29, %v12191_v47 }
0x1d6b   :  { %v5734_v6 = vpop.f32.mrb[68].mxu0  ;;  %v5777_v1 = vpop.f32.mrb[68].mxu1 }
0x1d6c   :  { %v5735_v24 = vadd.f32 %v5734_v6, %v5460_v9  ;;  %v5778_v37 = vadd.f32 %v5777_v1, %v5468_v48  ;;  %v5736_v25 = vpop.f32.mrb[69].mxu0  ;;  %v5779_v34 = vpop.f32.mrb[69].mxu1 }
0x1d6d   :  { %v5737_v22 = vadd.f32 %v5736_v25, %v5464_v61  ;;  %v5780_v0 = vadd.f32 %v5779_v34, %v5472_v4  ;;  %v5738_v36 = vpop.f32.mrb[70].mxu0  ;;  %v5781_v59 = vpop.f32.mrb[70].mxu1 }
0x1d6e   :  { %v6076_v8 = vmul.f32 0.70710677, %v5735_v24  ;;  %v6078_v3 = vmul.f32 0.70710677, %v5778_v37  ;;  %v5739_v53 = vadd.f32 %v5738_v36, %v5460_v9  ;;  %v5782_v43 = vadd.f32 %v5781_v59, %v5468_v48  ;;  %v5740_v13 = vpop.f32.mrb[71].mxu0  ;;  %v5783_v60 = vpop.f32.mrb[71].mxu1 }
0x1d6f   :  { %v6077_v39 = vmul.f32 0.70710677, %v5737_v22  ;;  %v6079_v44 = vmul.f32 0.70710677, %v5780_v0  ;;  %v5741_v12 = vadd.f32 %v5740_v13, %v5464_v61  ;;  %v5784_v11 = vadd.f32 %v5783_v60, %v5472_v4 }
0x1d70   :  { %9775 = verf.f32 %v6076_v8  ;;  %v6092_v57 = vmul.f32 0.70710677, %v5739_v53  ;;  %v6094_v19 = vmul.f32 0.70710677, %v5782_v43  ;;  %v6044_v40 = vmul.f32 0.5, %v5735_v24 }
0x1d71   :  { %9777 = verf.f32 %v6078_v3  ;;  %v6093_v17 = vmul.f32 0.70710677, %v5741_v12  ;;  %v6095_v15 = vmul.f32 0.70710677, %v5784_v11  ;;  %v6046_v14 = vmul.f32 0.5, %v5778_v37 }
0x1d72   :  { %9779 = verf.f32 %v6077_v39  ;;  %v11513_v6 = vmul.f32 0.5, %v5737_v22  ;;  %v11515_v1 = vmul.f32 0.5, %v5780_v0  ;;  %v6060_v59 = vmul.f32 0.5, %v5739_v53 }
0x1d73   :  { %9781 = verf.f32 %v6079_v44  ;;  %v5820_v50 = vpop.f32.mrb[72].mxu0  ;;  %v5863_v49 = vpop.f32.mrb[72].mxu1  ;;  %v6062_v30 = vmul.f32 0.5, %v5782_v43  ;;  %v11518_v13 = vmul.f32 0.5, %v5741_v12  ;;  %v11520_v0 = vmul.f32 0.5, %v5784_v11 }
0x1d74   :  { %9783 = verf.f32 %v6092_v57  ;;  %v5821_v41 = vadd.f32 %v5820_v50, %v5476_v10  ;;  %v5822_v2 = vpop.f32.mrb[73].mxu0  ;;  %v5864_v18 = vadd.f32 %v5863_v49, %v5484_v31  ;;  %v5865_v45 = vpop.f32.mrb[73].mxu1 }
0x1d75   :  { %9785 = verf.f32 %v6094_v19  ;;  %v5823_v56 = vadd.f32 %v5822_v2, %v5480_v33  ;;  %v5824_v16 = vpop.f32.mrb[74].mxu0  ;;  %v11502_v21 = vadd.f32 %v5865_v45, %v5488_v46  ;;  %v5867_v63 = vpop.f32.mrb[74].mxu1 }
0x1d76   :  { %v6080_v55 = vmul.f32 0.70710677, %v5821_v41  ;;  %v5826_v32 = vpop.f32.mrb[75].mxu0  ;;  %9787 = verf.f32 %v6093_v17  ;;  %v6082_v58 = vmul.f32 0.70710677, %v5864_v18  ;;  %v5869_v26 = vpop.f32.mrb[75].mxu1  ;;  %v5825_v48 = vadd.f32 %v5824_v16, %v5476_v10 }
0x1d77   :  { %v6081_v9 = vmul.f32 0.70710677, %v5823_v56  ;;  %v5868_v61 = vadd.f32 %v5867_v63, %v5484_v31  ;;  %v5827_v35 = vadd.f32 %v5826_v32, %v5480_v33  ;;  %v6083_v25 = vmul.f32 0.70710677, %v11502_v21 }
0x1d78   :  { %9789 = verf.f32 %v6080_v55  ;;  %v6096_v8 = vmul.f32 0.70710677, %v5825_v48  ;;  %v5870_v24 = vadd.f32 %v5869_v26, %v5488_v46  ;;  %v11522_v51 = vmul.f32 0.5, %v5821_v41 }
0x1d79   :  { %9791 = verf.f32 %v6082_v58  ;;  %v6098_v10 = vmul.f32 0.70710677, %v5868_v61  ;;  %v6097_v60 = vmul.f32 0.70710677, %v5827_v35  ;;  %v11524_v33 = vmul.f32 0.5, %v5864_v18 }
0x1d7a   :  { %v9776_v4 = vpop.eup %9775  ;;  %9793 = verf.f32 %v6095_v15  ;;  %v11526_v47 = vmul.f32 0.5, %v5823_v56  ;;  %v6099_v19 = vmul.f32 0.70710677, %v5870_v24 }
0x1d7b   :  { %v9778_v34 = vpop.eup %9777  ;;  %v6140_v36 = vadd.f32 1.0, %v9776_v4  ;;  %v5906_v37 = vpop.f32.mrb[76].mxu0  ;;  %9795 = verf.f32 %v6081_v9  ;;  %v6066_v9 = vmul.f32 0.5, %v5868_v61 }
0x1d7c   :  { %v5949_v3 = vpop.f32.mrb[76].mxu1  ;;  %v9780_v39 = vpop.eup %9779  ;;  %v6142_v44 = vadd.f32 1.0, %v9778_v34  ;;  %9797 = verf.f32 %v6096_v8  ;;  %v5907_v2 = vadd.f32 %v5906_v37, %v11488_v20  ;;  %v11550_v8 = vmul.f32 0.5, %v5827_v35 }
0x1d7d   :  { %v5908_v29 = vpop.f32.mrb[77].mxu0  ;;  %v9782_v22 = vpop.eup %9781  ;;  %9799 = verf.f32 %v6098_v10  ;;  %v11530_v12 = vmul.f32 %v6140_v36, %v6044_v40  ;;  %v6141_v41 = vadd.f32 1.0, %v9780_v39  ;;  %v5950_v16 = vadd.f32 %v5949_v3, %v11491_v23 }
0x1d7e   :  { %v5951_v38 = vpop.f32.mrb[77].mxu1  ;;  %v5910_v31 = vpop.f32.mrb[78].mxu0  ;;  %9801 = verf.f32 %v6083_v25  ;;  %v11534_v50 = vmul.f32 %v6142_v44, %v6046_v14  ;;  %v6143_v56 = vadd.f32 1.0, %v9782_v22  ;;  %v6084_v63 = vmul.f32 0.70710677, %v5907_v2 }
0x1d7f   :  { %v9784_v53 = vpop.eup %9783  ;;  %v5953_v43 = vpop.f32.mrb[78].mxu1  ;;  %9803 = verf.f32 %v6097_v60  ;;  %v5909_v32 = vadd.f32 %v5908_v29, %v11494_v54  ;;  %v11546_v40 = vmul.f32 0.5, %v11502_v21  ;;  %v6064_v14 = vmul.f32 0.5, %v5825_v48 }
0x1d80   :  { %v11528_v46 = vpop.f32.mrb[79].mxu0  ;;  %v9786_v57 = vpop.eup %9785  ;;  %v6156_v11 = vadd.f32 1.0, %v9784_v53  ;;  %9805 = verf.f32 %v6099_v19  ;;  %v11552_v37 = vmul.f32 0.5, %v5870_v24  ;;  %v11555_v44 = vmul.f32 %v6141_v41, %v11513_v6 }
0x1d81   :  { %v11532_v17 = vpop.f32.mrb[79].mxu1  ;;  %v6158_v49 = vadd.f32 1.0, %v9786_v57  ;;  %v9788_v18 = vpop.eup %9787  ;;  %9807 = verf.f32 %v6084_v63  ;;  %v6086_v48 = vmul.f32 0.70710677, %v5950_v16  ;;  %v11562_v29 = vmul.f32 %v6143_v56, %v11515_v1 }
0x1d82   :  { %v11537_v45 = vmul.f32 %v6156_v11, %v6060_v59  ;;  %v9790_v15 = vpop.eup %9789  ;;  %v6157_v59 = vadd.f32 1.0, %v9788_v18  ;;  %v6085_v22 = vmul.f32 0.70710677, %v5909_v32  ;;  %v5952_v24 = vadd.f32 %v5951_v38, %v11497_v5 }
0x1d83   :  { %v11540_v55 = vmul.f32 %v6158_v49, %v6062_v30  ;;  %v9792_v58 = vpop.eup %9791  ;;  %v5992_v4 = vpop.f32.mrb[80].mxu0  ;;  %v6144_v21 = vadd.f32 1.0, %v9790_v15  ;;  %9809 = verf.f32 %v6086_v48  ;;  %v5911_v11 = vadd.f32 %v5910_v31, %v11488_v20 }
0x1d84   :  { %v6204_v26 = vpack.c.bf16 %v11537_v45, %v11530_v12  ;;  %v6035_v25 = vpop.f32.mrb[80].mxu1  ;;  %v9794_v34 = vpop.eup %9793  ;;  %v6146_v35 = vadd.f32 1.0, %v9792_v58  ;;  %v5954_v19 = vadd.f32 %v5953_v43, %v11491_v23  ;;  %v11572_v49 = vmul.f32 %v6157_v59, %v11518_v13  ;;  %v9545_v12 = vld [vmem:[%s12123_s12 + $0x508] sm:$0xff]  }
0x1d85   :  { %v6206_v36 = vpack.c.bf16 %v11540_v55, %v11534_v50  ;;  %v5994_v3 = vpop.f32.mrb[81].mxu0  ;;  %v6037_v39 = vpop.f32.mrb[81].mxu1  ;;  %v6159_v57 = vadd.f32 1.0, %v9794_v34  ;;  %v11574_v18 = vmul.f32 0.5, %v5907_v2  ;;  %v11576_v56 = vmul.f32 0.5, %v5950_v16  ;;  %v9547_v50 = vld [vmem:[%s12123_s12 + $0x550] sm:$0xff]  }
0x1d86   :  { %v11557_v61 = vpop.f32.mrb[82].mxu0  ;;  %v11559_v30 = vpop.f32.mrb[82].mxu1  ;;  %v11579_v15 = vmul.f32 %v6144_v21, %v11522_v51  ;;  %v6087_v58 = vmul.f32 0.70710677, %v5952_v24  ;;  %v6100_v34 = vmul.f32 0.70710677, %v5911_v11  ;;  %v11582_v20 = vmul.f32 %v6146_v35, %v11524_v33 }
0x1d87   :  { %v9796_v10 = vpop.eup %9795  ;;  %v11565_v60 = vpop.f32.mrb[83].mxu0  ;;  %9811 = verf.f32 %v6085_v22  ;;  %v6102_v13 = vmul.f32 0.70710677, %v5954_v19  ;;  %v5913_v2 = vadd.f32 %v11528_v46, %v11494_v54  ;;  %v5956_v51 = vadd.f32 %v11532_v17, %v11497_v5 }
0x1d88   :  { %v11567_v53 = vpop.f32.mrb[83].mxu1  ;;  %v9798_v6 = vpop.eup %9797  ;;  %9813 = verf.f32 %v6087_v58  ;;  %v6191_v59 = vmul.f32 %v6159_v57, %v11520_v0  ;;  %v6145_v21 = vadd.f32 1.0, %v9796_v10  ;;  %v11597_v22 = vmul.f32 0.5, %v5909_v32 }
0x1d89   :  { %v9800_v41 = vpop.eup %9799  ;;  %v6160_v1 = vadd.f32 1.0, %v9798_v6  ;;  %9815 = verf.f32 %v6100_v34  ;;  %v6101_v48 = vmul.f32 0.70710677, %v5913_v2  ;;  %v6103_v54 = vmul.f32 0.70710677, %v5956_v51 }
0x1d8a   :  { %v9802_v38 = vpop.eup %9801  ;;  %v6162_v63 = vadd.f32 1.0, %v9800_v41  ;;  %9817 = verf.f32 %v6102_v13  ;;  %v11600_v5 = vadd.f32 %v5992_v4, %v11500_v7  ;;  %v11603_v17 = vadd.f32 %v6035_v25, %v11505_v42 }
0x1d8b   :  { %v11584_v23 = vmul.f32 %v6160_v1, %v6064_v14  ;;  %v9804_v31 = vpop.eup %9803  ;;  %v6147_v14 = vadd.f32 1.0, %v9802_v38  ;;  %9819 = verf.f32 %v6101_v48  ;;  %v11606_v10 = vadd.f32 %v5994_v3, %v11508_v52 }
0x1d8c   :  { %v11586_v43 = vmul.f32 %v6162_v63, %v6066_v9  ;;  %v9806_v16 = vpop.eup %9805  ;;  %v6161_v35 = vadd.f32 1.0, %v9804_v31  ;;  %v11609_v6 = vmul.f32 %v6145_v21, %v11526_v47  ;;  %9821 = verf.f32 %v6103_v54 }
0x1d8d   :  { %v6208_v33 = vpack.c.bf16 %v11584_v23, %v11579_v15  ;;  %v9808_v46 = vpop.eup %9807  ;;  %v6163_v0 = vadd.f32 1.0, %v9806_v16  ;;  %v6088_v32 = vmul.f32 0.70710677, %v11600_v5  ;;  %v11613_v57 = vadd.f32 %v6037_v39, %v11511_v28  ;;  %v9578_v15 = vld [vmem:[%s12123_s12 + $0x688] sm:$0xff]   ;;  %v9579_v23 = vld [vmem:[%s12123_s12 + $0x650] sm:$0xff]  }
0x1d8e   :  { %v6210_v9 = vpack.c.bf16 %v11586_v43, %v11582_v20  ;;  %v9810_v4 = vpop.eup %9809  ;;  %v11616_v41 = vmul.f32 %v6147_v14, %v11546_v40  ;;  %v11618_v1 = vmul.f32 0.5, %v5952_v24  ;;  %v6068_v25 = vmul.f32 0.5, %v5911_v11  ;;  %v9541_v24 = vld [vmem:[%s12123_s12 + $0x500] sm:$0xff]   ;;  %v9548_v14 = vld [vmem:[%s12123_s12 + $0x5d0] sm:$0xff]  }
0x1d8f   :  { %v6090_v38 = vmul.f32 0.70710677, %v11603_v17  ;;  %v11622_v3 = vmul.f32 %v6161_v35, %v11550_v8  ;;  %v6148_v47 = vadd.f32 1.0, %v9808_v46  ;;  %v6070_v63 = vmul.f32 0.5, %v5954_v19  ;;  %v9580_v20 = vld [vmem:[%s12123_s12 + $0x6d0] sm:$0xff]  }
0x1d90   :  { %v6089_v58 = vmul.f32 0.70710677, %v11606_v10  ;;  %v11626_v34 = vmul.f32 %v6163_v0, %v11552_v37  ;;  %v6069_v39 = vmul.f32 0.5, %v5913_v2  ;;  %v6091_v13 = vmul.f32 0.70710677, %v11613_v57  ;;  %v9542_v37 = vld [vmem:[%s12123_s12 + $0x580] sm:$0xff]  }
0x1d91   :  { %v6205_v40 = vpack.c.bf16 %v11572_v49, %v11555_v44  ;;  %v9812_v11 = vpop.eup %9811  ;;  %v6150_v8 = vadd.f32 1.0, %v9810_v4  ;;  %9823 = verf.f32 %v6088_v32  ;;  %v6207_v19 = vpack.c.bf16 %v6191_v59, %v11562_v29  ;;  %v9543_v44 = vld [vmem:[%s12123_s12 + $0x548] sm:$0xff]   ;;  %v9581_v43 = vld [vmem:[%s12123_s12 + $0x610] sm:$0xff]  }
0x1d92   :  { %v11637_v31 = vadd.f32 %v11557_v61, %v11500_v7  ;;  %v9814_v49 = vpop.eup %9813  ;;  %v6071_v2 = vmul.f32 0.5, %v5956_v51  ;;  %9825 = verf.f32 %v6090_v38  ;;  %v11647_v16 = vadd.f32 %v11559_v30, %v11505_v42  ;;  %v9544_v61 = vld [vmem:[%s12123_s12 + $0x5c8] sm:$0xff]  }
0x1d93   :  { %7285 = vmatprep.mubr.bf16.mxu0 %v6205_v40  ;;  %v11651_v7 = vadd.f32 %v11565_v60, %v11508_v52  ;;  %v9816_v29 = vpop.eup %9815  ;;  %v11657_v59 = vmul.f32 %v6148_v47, %v11574_v18  ;;  %9827 = verf.f32 %v6089_v58  ;;  %7326 = vmatprep.mubr.bf16.mxu1 %v6207_v19  ;;  %v11665_v42 = vadd.f32 %v11567_v53, %v11511_v28  ;;  %v9546_v53 = vld [vmem:[%s12123_s12 + $0x588] sm:$0xff]   ;;  %v9552_v58 = vld [vmem:[%s12123_s12 + $0x5d8] sm:$0xff]  }
0x1d94   :  { %v6104_v51 = vmul.f32 0.70710677, %v11637_v31  ;;  %7286 = vmatmul.mubr.bf16.vlgmr.msra.gmra.mrb[84].mxu0 %v6204_v26  ;;  %v9818_v52 = vpop.eup %9817  ;;  %v6149_v30 = vadd.f32 1.0, %v9812_v11  ;;  %v6164_v60 = vadd.f32 1.0, %v9816_v29  ;;  %9829 = verf.f32 %v6091_v13  ;;  %7327 = vmatmul.mubr.bf16.vlgmr.msra.gmra.mrb[84].mxu1 %v6206_v36  ;;  %v9554_v11 = vld [vmem:[%s12123_s12 + $0x598] sm:$0xff]  }
0x1d95   :  { %v6106_v21 = vmul.f32 0.70710677, %v11647_v16  ;;  %8936 = vmatpush3.bf16.msra.mxu0 %v9541_v24  ;;  %v11675_v45 = vmul.f32 %v6150_v8, %v11576_v56  ;;  %v6166_v28 = vadd.f32 1.0, %v9818_v52  ;;  %8958 = vmatpush3.bf16.msra.mxu1 %v9542_v37  ;;  %v6105_v26 = vmul.f32 0.70710677, %v11651_v7  ;;  %v9820_v55 = vpop.eup %9819  ;;  %v9555_v8 = vld [vmem:[%s12123_s12 + $0x560] sm:$0xff]  }
0x1d96   :  { %9831 = verf.f32 %v6104_v51  ;;  %8937 = vmatprep.subr.bf16.mxu0 %v9543_v44  ;;  %v6151_v36 = vadd.f32 1.0, %v9814_v49  ;;  %v11684_v18 = vmul.f32 %v6164_v60, %v6068_v25  ;;  %v6107_v56 = vmul.f32 0.70710677, %v11665_v42  ;;  %8959 = vmatprep.subr.bf16.mxu1 %v9544_v61  ;;  %v9822_v48 = vpop.eup %9821  ;;  %v9549_v25 = vld [vmem:[%s12123_s12 + $0x510] sm:$0xff]   ;;  %v9556_v44 = vld [vmem:[%s12123_s12 + $0x5e0] sm:$0xff]  }
0x1d97   :  { %9833 = verf.f32 %v6106_v21  ;;  %v11690_v35 = vmul.f32 %v6166_v28, %v6070_v63  ;;  %v6165_v54 = vadd.f32 1.0, %v9820_v55  ;;  %v6209_v46 = vpack.c.bf16 %v11622_v3, %v11609_v6  ;;  %v9550_v3 = vld [vmem:[%s12123_s12 + $0x590] sm:$0xff]  }
0x1d98   :  { %9835 = verf.f32 %v6105_v26  ;;  %v6212_v0 = vpack.c.bf16 %v11684_v18, %v11657_v59  ;;  %v6167_v32 = vadd.f32 1.0, %v9822_v48  ;;  %v6211_v4 = vpack.c.bf16 %v11626_v34, %v11616_v41  ;;  %v9551_v41 = vld [vmem:[%s12123_s12 + $0x558] sm:$0xff]   ;;  %v9610_v59 = vld [vmem:[%s12123_s12 + $0x788] sm:$0xff]   ;;  %v9611_v18 = vld [vmem:[%s12123_s12 + $0x750] sm:$0xff]  }
0x1d99   :  { %9837 = verf.f32 %v6107_v56  ;;  %8938 = vmatpush3.bf16.msra.mxu0 %v9545_v12  ;;  %v11702_v38 = vmul.f32 %v6149_v30, %v11597_v22  ;;  %v6214_v47 = vpack.c.bf16 %v11690_v35, %v11675_v45  ;;  %v11706_v6 = vmul.f32 %v6165_v54, %v6069_v39  ;;  %8960 = vmatpush3.bf16.msra.mxu1 %v9546_v53  ;;  %v9557_v12 = vld [vmem:[%s12123_s12 + $0x520] sm:$0xff]   ;;  %v9612_v45 = vld [vmem:[%s12123_s12 + $0x7d0] sm:$0xff]  }
0x1d9a   :  { %8939 = vmatprep.subr.bf16.mxu0 %v9547_v50  ;;  %v11715_v63 = vmul.f32 %v6151_v36, %v11618_v1  ;;  %v11717_v22 = vmul.f32 %v6167_v32, %v6071_v2  ;;  %7367 = vmatprep.mubr.bf16.mxu0 %v6209_v46  ;;  %v9553_v1 = vld [vmem:[%s12123_s12 + $0x518] sm:$0xff]   ;;  %v6056_v2 = vmul.f32 0.5, %v11600_v5  ;;  %v6058_v61 = vmul.f32 0.5, %v11603_v17  ;;  %v9613_v35 = vld [vmem:[%s12123_s12 + $0x710] sm:$0xff]  }
0x1d9b   :  { %8961 = vmatprep.subr.bf16.mxu1 %v9548_v14  ;;  %v9824_v34 = vpop.eup %9823  ;;  %7408 = vmatprep.mubr.bf16.mxu1 %v6211_v4  ;;  %v6213_v39 = vpack.c.bf16 %v11706_v6, %v11702_v38  ;;  %v6057_v52 = vmul.f32 0.5, %v11606_v10  ;;  %v6072_v60 = vmul.f32 0.5, %v11637_v31  ;;  %v6059_v26 = vmul.f32 0.5, %v11613_v57  ;;  %v9558_v10 = vld [vmem:[%s12123_s12 + $0x5a0] sm:$0xff]   ;;  %v9559_v31 = vld [vmem:[%s12123_s12 + $0x568] sm:$0xff]   ;;  %v9584_v38 = vld [vmem:[%s12123_s12 + $0x6d8] sm:$0xff]  }
0x1d9c   :  { %v9826_v13 = vpop.eup %9825  ;;  %v6215_v40 = vpack.c.bf16 %v11717_v22, %v11715_v63  ;;  %v6152_v37 = vadd.f32 1.0, %v9824_v34  ;;  %v6074_v5 = vmul.f32 0.5, %v11647_v16  ;;  %v6073_v57 = vmul.f32 0.5, %v11651_v7  ;;  %v9560_v16 = vld [vmem:[%s12123_s12 + $0x5e8] sm:$0xff]   ;;  %v9563_v34 = vld [vmem:[%s12123_s12 + $0x570] sm:$0xff]   ;;  %v9585_v6 = vld [vmem:[%s12123_s12 + $0x618] sm:$0xff]  }
0x1d9d   :  { %8940 = vmatpush3.bf16.msra.mxu0 %v9549_v25  ;;  %v9828_v24 = vpop.eup %9827  ;;  %8962 = vmatpush3.bf16.msra.mxu1 %v9550_v3  ;;  %v6154_v29 = vadd.f32 1.0, %v9826_v13  ;;  %v6075_v54 = vmul.f32 0.5, %v11665_v42  ;;  %v9561_v7 = vld [vmem:[%s12123_s12 + $0x528] sm:$0xff]   ;;  %v9564_v13 = vld [vmem:[%s12123_s12 + $0x5f0] sm:$0xff]   ;;  %v9586_v63 = vld [vmem:[%s12123_s12 + $0x698] sm:$0xff]  }
0x1d9e   :  { %8941 = vmatprep.subr.bf16.mxu0 %v9551_v41  ;;  %v9830_v19 = vpop.eup %9829  ;;  %8963 = vmatprep.subr.bf16.mxu1 %v9552_v58  ;;  %v6153_v30 = vadd.f32 1.0, %v9828_v24  ;;  %v11753_v55 = vmul.f32 %v6152_v37, %v6056_v2  ;;  %v9562_v42 = vld [vmem:[%s12123_s12 + $0x5a8] sm:$0xff]   ;;  %v9568_v37 = vld [vmem:[%s12123_s12 + $0x5f8] sm:$0xff]   ;;  %v9571_v2 = vld [vmem:[%s12123_s12 + $0x640] sm:$0xff]  }
0x1d9f   :  { %v6155_v53 = vadd.f32 1.0, %v9830_v19  ;;  %v11761_v14 = vmul.f32 %v6154_v29, %v6058_v61  ;;  %v9567_v19 = vld [vmem:[%s12123_s12 + $0x578] sm:$0xff]   ;;  %v9572_v61 = vld [vmem:[%s12123_s12 + $0x6c0] sm:$0xff]  }
0x1da0   :  { %v9832_v49 = vpop.eup %9831  ;;  %v11766_v32 = vmul.f32 %v6153_v30, %v6057_v52  ;;  %v9573_v29 = vld [vmem:[%s12123_s12 + $0x600] sm:$0xff]   ;;  %v9575_v52 = vld [vmem:[%s12123_s12 + $0x648] sm:$0xff]  }
0x1da1   :  { %v9834_v51 = vpop.eup %9833  ;;  %v6168_v21 = vadd.f32 1.0, %v9832_v49  ;;  %8942 = vmatpush3.bf16.msra.mxu0 %v9553_v1  ;;  %8964 = vmatpush3.bf16.msra.mxu1 %v9554_v11  ;;  %v11775_v3 = vmul.f32 %v6155_v53, %v6059_v26  ;;  %v9565_v11 = vld [vmem:[%s12123_s12 + $0x530] sm:$0xff]   ;;  %v9570_v49 = vld [vmem:[%s12123_s12 + $0x5b8] sm:$0xff]   ;;  %v9576_v30 = vld [vmem:[%s12123_s12 + $0x6c8] sm:$0xff]  }
0x1da2   :  { %v9836_v28 = vpop.eup %9835  ;;  %v6170_v17 = vadd.f32 1.0, %v9834_v51  ;;  %8943 = vmatprep.subr.bf16.mxu0 %v9555_v8  ;;  %8965 = vmatprep.subr.bf16.mxu1 %v9556_v44  ;;  %v9566_v8 = vld [vmem:[%s12123_s12 + $0x5b0] sm:$0xff]   ;;  %v9569_v44 = vld [vmem:[%s12123_s12 + $0x538] sm:$0xff]   ;;  %v9574_v51 = vld [vmem:[%s12123_s12 + $0x680] sm:$0xff]  }
0x1da3   :  { %v9838_v50 = vpop.eup %9837  ;;  %v11755_v36 = vmul.f32 %v6168_v21, %v6072_v60  ;;  %v6169_v56 = vadd.f32 1.0, %v9836_v28  ;;  %v9577_v60 = vld [vmem:[%s12123_s12 + $0x608] sm:$0xff]   ;;  %v9587_v22 = vld [vmem:[%s12123_s12 + $0x660] sm:$0xff]  }
0x1da4   :  { %v11763_v48 = vmul.f32 %v6170_v17, %v6074_v5  ;;  %v6171_v46 = vadd.f32 1.0, %v9838_v50  ;;  %v9590_v21 = vld [vmem:[%s12123_s12 + $0x6a0] sm:$0xff]   ;;  %v9592_v28 = vld [vmem:[%s12123_s12 + $0x6e8] sm:$0xff]   ;;  %v9595_v5 = vld [vmem:[%s12123_s12 + $0x670] sm:$0xff]  }
0x1da5   :  { %v6216_v4 = vpack.c.bf16 %v11755_v36, %v11753_v55  ;;  %v11770_v25 = vmul.f32 %v6169_v56, %v6073_v57  ;;  %8944 = vmatpush3.bf16.msra.mxu0 %v9557_v12  ;;  %8966 = vmatpush3.bf16.msra.mxu1 %v9558_v10  ;;  %v9591_v12 = vld [vmem:[%s12123_s12 + $0x668] sm:$0xff]   ;;  %v9596_v17 = vld [vmem:[%s12123_s12 + $0x6f0] sm:$0xff]   ;;  %v9599_v50 = vld [vmem:[%s12123_s12 + $0x678] sm:$0xff]  }
0x1da6   :  { %v6218_v41 = vpack.c.bf16 %v11763_v48, %v11761_v14  ;;  %v11779_v58 = vmul.f32 %v6171_v46, %v6075_v54  ;;  %8945 = vmatprep.subr.bf16.mxu0 %v9559_v31  ;;  %8967 = vmatprep.subr.bf16.mxu1 %v9560_v16  ;;  %v9593_v26 = vld [vmem:[%s12123_s12 + $0x628] sm:$0xff]   ;;  %v9597_v10 = vld [vmem:[%s12123_s12 + $0x630] sm:$0xff]   ;;  %v9600_v57 = vld [vmem:[%s12123_s12 + $0x6f8] sm:$0xff]  }
0x1da7   :  { %v6217_v1 = vpack.c.bf16 %v11770_v25, %v11766_v32  ;;  %v9594_v53 = vld [vmem:[%s12123_s12 + $0x6a8] sm:$0xff]   ;;  %v9598_v31 = vld [vmem:[%s12123_s12 + $0x6b0] sm:$0xff]   ;;  %v9601_v56 = vld [vmem:[%s12123_s12 + $0x638] sm:$0xff]  }
0x1da8   :  { %v6219_v24 = vpack.c.bf16 %v11779_v58, %v11775_v3  ;;  %v9602_v16 = vld [vmem:[%s12123_s12 + $0x6b8] sm:$0xff]   ;;  %v9603_v54 = vld [vmem:[%s12123_s12 + $0x740] sm:$0xff]  }
0x1da9   :  { %8946 = vmatpush3.bf16.msra.mxu0 %v9561_v7  ;;  %8968 = vmatpush3.bf16.msra.mxu1 %v9562_v42  ;;  %v9604_v46 = vld [vmem:[%s12123_s12 + $0x7c0] sm:$0xff]   ;;  %v9616_v32 = vld [vmem:[%s12123_s12 + $0x7d8] sm:$0xff]  }
0x1daa   :  { %8947 = vmatprep.subr.bf16.mxu0 %v9563_v34  ;;  %8969 = vmatprep.subr.bf16.mxu1 %v9564_v13  ;;  %v9605_v7 = vld [vmem:[%s12123_s12 + $0x700] sm:$0xff]   ;;  %v9607_v34 = vld [vmem:[%s12123_s12 + $0x748] sm:$0xff]   ;;  %v9617_v25 = vld [vmem:[%s12123_s12 + $0x718] sm:$0xff]  }
0x1dab   :  { %v9606_v42 = vld [vmem:[%s12123_s12 + $0x780] sm:$0xff]   ;;  %v9608_v13 = vld [vmem:[%s12123_s12 + $0x7c8] sm:$0xff]   ;;  %v9618_v3 = vld [vmem:[%s12123_s12 + $0x798] sm:$0xff]  }
0x1dac   :  { %v9619_v58 = vld [vmem:[%s12123_s12 + $0x760] sm:$0xff]  }
0x1dad   :  { %8948 = vmatpush3.bf16.msra.mxu0 %v9565_v11  ;;  %8970 = vmatpush3.bf16.msra.mxu1 %v9566_v8  ;;  %v9609_v11 = vld [vmem:[%s12123_s12 + $0x708] sm:$0xff]   ;;  %v9622_v8 = vld [vmem:[%s12123_s12 + $0x7a0] sm:$0xff]  }
0x1dae   :  { %8949 = vmatprep.subr.bf16.mxu0 %v9567_v19  ;;  %8971 = vmatprep.subr.bf16.mxu1 %v9568_v37  ;;  %v9623_v19 = vld [vmem:[%s12123_s12 + $0x768] sm:$0xff]  }
0x1daf   :  { %v9624_v37 = vld [vmem:[%s12123_s12 + $0x7e8] sm:$0xff]  }
0x1db1   :  { %8950 = vmatpush3.bf16.msra.mxu0 %v9569_v44  ;;  %8972 = vmatpush3.bf16.msra.mxu1 %v9570_v49  ;;  %v9625_v44 = vld [vmem:[%s12123_s12 + $0x728] sm:$0xff]  }
0x1db2   :  { %8979 = vmatprep.subr.bf16.mxu0 %v9571_v2  ;;  %9001 = vmatprep.subr.bf16.mxu1 %v9572_v61  ;;  %v9626_v49 = vld [vmem:[%s12123_s12 + $0x7a8] sm:$0xff]   ;;  %v9627_v2 = vld [vmem:[%s12123_s12 + $0x770] sm:$0xff]  }
0x1db3   :  { %v9628_v61 = vld [vmem:[%s12123_s12 + $0x7f0] sm:$0xff]  }
0x1db4   :  { %7368 = vmatmul.mubr.bf16.vlgmr.msra.gmra.mrb[88].mxu0 %v6208_v33  ;;  %7409 = vmatmul.mubr.bf16.vlgmr.msra.gmra.mrb[88].mxu1 %v6210_v9  ;;  %v9582_v33 = vld [vmem:[%s12123_s12 + $0x690] sm:$0xff]   ;;  %v9583_v9 = vld [vmem:[%s12123_s12 + $0x658] sm:$0xff]  }
0x1db5   :  { %8980 = vmatpush3.bf16.msra.mxu0 %v9573_v29  ;;  %7449 = vmatprep.mubr.bf16.mxu0 %v6213_v39  ;;  %v9588_v39 = vld [vmem:[%s12123_s12 + $0x6e0] sm:$0xff]   ;;  %v9629_v29 = vld [vmem:[%s12123_s12 + $0x730] sm:$0xff]  }
0x1db6   :  { %9002 = vmatpush3.bf16.msra.mxu1 %v9574_v51  ;;  %7490 = vmatprep.mubr.bf16.mxu1 %v6215_v40  ;;  %v9589_v40 = vld [vmem:[%s12123_s12 + $0x620] sm:$0xff]   ;;  %v9630_v51 = vld [vmem:[%s12123_s12 + $0x7b0] sm:$0xff]  }
0x1db7   :  { %8981 = vmatprep.subr.bf16.mxu0 %v9575_v52  ;;  %9003 = vmatprep.subr.bf16.mxu1 %v9576_v30  ;;  %v9631_v52 = vld [vmem:[%s12123_s12 + $0x778] sm:$0xff]  }
0x1db8   :  { %v9632_v30 = vld [vmem:[%s12123_s12 + $0x7f8] sm:$0xff]  }
0x1db9   :  { %8982 = vmatpush3.bf16.msra.mxu0 %v9577_v60  ;;  %v9633_v60 = vld [vmem:[%s12123_s12 + $0x738] sm:$0xff]  }
0x1dba   :  { %9004 = vmatpush3.bf16.msra.mxu1 %v9578_v15  ;;  %8983 = vmatprep.subr.bf16.mxu0 %v9579_v23  ;;  %v9634_v15 = vld [vmem:[%s12123_s12 + $0x7b8] sm:$0xff]  }
0x1dbb   :  { %9005 = vmatprep.subr.bf16.mxu1 %v9580_v20 }
0x1dbd   :  { %8984 = vmatpush3.bf16.msra.mxu0 %v9581_v43  ;;  %v8484_v43 = vld [vmem:[%s12127_s13 + $0x1] ss:$0 sm:$0xff] }
0x1dbe   :  { %9006 = vmatpush3.bf16.msra.mxu1 %v9582_v33  ;;  %8985 = vmatprep.subr.bf16.mxu0 %v9583_v9 }
0x1dbf   :  { %9007 = vmatprep.subr.bf16.mxu1 %v9584_v38 }
0x1dc1   :  { %8986 = vmatpush3.bf16.msra.mxu0 %v9585_v6 }
0x1dc2   :  { %9008 = vmatpush3.bf16.msra.mxu1 %v9586_v63  ;;  %8987 = vmatprep.subr.bf16.mxu0 %v9587_v22 }
0x1dc3   :  { %9009 = vmatprep.subr.bf16.mxu1 %v9588_v39 }
0x1dc5   :  { %8988 = vmatpush3.bf16.msra.mxu0 %v9589_v40 }
0x1dc6   :  { %9010 = vmatpush3.bf16.msra.mxu1 %v9590_v21  ;;  %8989 = vmatprep.subr.bf16.mxu0 %v9591_v12 }
0x1dc7   :  { %9011 = vmatprep.subr.bf16.mxu1 %v9592_v28 }
0x1dc9   :  { %8990 = vmatpush3.bf16.msra.mxu0 %v9593_v26 }
0x1dca   :  { %9012 = vmatpush3.bf16.msra.mxu1 %v9594_v53  ;;  %8991 = vmatprep.subr.bf16.mxu0 %v9595_v5 }
0x1dcb   :  { %9013 = vmatprep.subr.bf16.mxu1 %v9596_v17 }
0x1dcd   :  { %8992 = vmatpush3.bf16.msra.mxu0 %v9597_v10 }
0x1dce   :  { %9014 = vmatpush3.bf16.msra.mxu1 %v9598_v31  ;;  %8993 = vmatprep.subr.bf16.mxu0 %v9599_v50 }
0x1dcf   :  { %9015 = vmatprep.subr.bf16.mxu1 %v9600_v57 }
0x1dd1   :  { %8994 = vmatpush3.bf16.msra.mxu0 %v9601_v56 }
0x1dd2   :  { %9016 = vmatpush3.bf16.msra.mxu1 %v9602_v16  ;;  %9023 = vmatprep.subr.bf16.mxu0 %v9603_v54 }
0x1dd3   :  { %9045 = vmatprep.subr.bf16.mxu1 %v9604_v46 }
0x1dd4   :  { %7450 = vmatmul.mubr.bf16.vlgmr.msra.gmra.mrb[92].mxu0 %v6212_v0  ;;  %v9614_v0 = vld [vmem:[%s12123_s12 + $0x790] sm:$0xff]  }
0x1dd5   :  { %7491 = vmatmul.mubr.bf16.vlgmr.msra.gmra.mrb[92].mxu1 %v6214_v47  ;;  %9024 = vmatpush3.bf16.msra.mxu0 %v9605_v7  ;;  %v9615_v47 = vld [vmem:[%s12123_s12 + $0x758] sm:$0xff]  }
0x1dd6   :  { %7531 = vmatprep.mubr.bf16.mxu0 %v6217_v1  ;;  %9046 = vmatpush3.bf16.msra.mxu1 %v9606_v42  ;;  %v9620_v1 = vld [vmem:[%s12123_s12 + $0x7e0] sm:$0xff]  }
0x1dd7   :  { %7572 = vmatprep.mubr.bf16.mxu1 %v6219_v24  ;;  %9025 = vmatprep.subr.bf16.mxu0 %v9607_v34  ;;  %v9621_v24 = vld [vmem:[%s12123_s12 + $0x720] sm:$0xff]  }
0x1dd8   :  { %9047 = vmatprep.subr.bf16.mxu1 %v9608_v13 }
0x1dd9   :  { %9026 = vmatpush3.bf16.msra.mxu0 %v9609_v11 }
0x1dda   :  { %9048 = vmatpush3.bf16.msra.mxu1 %v9610_v59  ;;  %9027 = vmatprep.subr.bf16.mxu0 %v9611_v18 }
0x1ddb   :  { %9049 = vmatprep.subr.bf16.mxu1 %v9612_v45 }
0x1ddd   :  { %9028 = vmatpush3.bf16.msra.mxu0 %v9613_v35 }
0x1dde   :  { %9050 = vmatpush3.bf16.msra.mxu1 %v9614_v0  ;;  %9029 = vmatprep.subr.bf16.mxu0 %v9615_v47 }
0x1ddf   :  { %9051 = vmatprep.subr.bf16.mxu1 %v9616_v32 }
0x1de1   :  { %9030 = vmatpush3.bf16.msra.mxu0 %v9617_v25 }
0x1de2   :  { %9052 = vmatpush3.bf16.msra.mxu1 %v9618_v3  ;;  %9031 = vmatprep.subr.bf16.mxu0 %v9619_v58 }
0x1de3   :  { %9053 = vmatprep.subr.bf16.mxu1 %v9620_v1 }
0x1de5   :  { %9032 = vmatpush3.bf16.msra.mxu0 %v9621_v24 }
0x1de6   :  { %9054 = vmatpush3.bf16.msra.mxu1 %v9622_v8  ;;  %9033 = vmatprep.subr.bf16.mxu0 %v9623_v19 }
0x1de7   :  { %9055 = vmatprep.subr.bf16.mxu1 %v9624_v37 }
0x1de9   :  { %9034 = vmatpush3.bf16.msra.mxu0 %v9625_v44 }
0x1dea   :  { %9056 = vmatpush3.bf16.msra.mxu1 %v9626_v49  ;;  %9035 = vmatprep.subr.bf16.mxu0 %v9627_v2 }
0x1deb   :  { %9057 = vmatprep.subr.bf16.mxu1 %v9628_v61 }
0x1ded   :  { %9036 = vmatpush3.bf16.msra.mxu0 %v9629_v29 }
0x1dee   :  { %9058 = vmatpush3.bf16.msra.mxu1 %v9630_v51  ;;  %9037 = vmatprep.subr.bf16.mxu0 %v9631_v52 }
0x1def   :  { %9059 = vmatprep.subr.bf16.mxu1 %v9632_v30 }
0x1df1   :  { %9038 = vmatpush3.bf16.msra.mxu0 %v9633_v60 }
0x1df2   :  { %9060 = vmatpush3.bf16.msra.mxu1 %v9634_v15 }
0x1df4   :  { %7532 = vmatmul.mubr.bf16.vlgmr.msra.gmra.mrb[96].mxu0 %v6216_v4 }
0x1df5   :  { %7573 = vmatmul.mubr.bf16.vlgmr.msra.gmra.mrb[96].mxu1 %v6218_v41 }
0x1e67   :  { %v8907_v23 = vpop.f32.mrb[84].mxu0  ;;  %v8929_v20 = vpop.f32.mrb[84].mxu1 }
0x1e68   :  { %v8908_v33 = vpop.f32.mrb[85].mxu0  ;;  %v8930_v38 = vpop.f32.mrb[85].mxu1 }
0x1e69   :  { %v8909_v9 = vadd.f32 %v8908_v33, %v8907_v23  ;;  %v8910_v6 = vpop.f32.mrb[86].mxu0  ;;  %v8931_v63 = vadd.f32 %v8930_v38, %v8929_v20  ;;  %v8932_v22 = vpop.f32.mrb[86].mxu1 }
0x1e6a   :  { %v8911_v39 = vpop.f32.mrb[87].mxu0  ;;  %v8933_v36 = vpop.f32.mrb[87].mxu1 }
0x1e6b   :  { %v7288_v40 = vadd.f32 %v8909_v9, %v8484_v43  ;;  %v8912_v55 = vadd.f32 %v8911_v39, %v8910_v6  ;;  %v8934_v4 = vadd.f32 %v8933_v36, %v8932_v22 }
0x1e6d   :  { %v7329_v21 = vadd.f32 %v8931_v63, %v7288_v40  ;;  %v7291_v14 = vadd.f32 %v8912_v55, %v8484_v43 }
0x1e6f   :  { %v7332_v48 = vadd.f32 %v8934_v4, %v7291_v14 }
0x1e87   :  { %v8951_v41 = vpop.f32.mrb[88].mxu0  ;;  %v8973_v12 = vpop.f32.mrb[88].mxu1 }
0x1e88   :  { %v8952_v28 = vpop.f32.mrb[89].mxu0  ;;  %v8974_v53 = vpop.f32.mrb[89].mxu1 }
0x1e89   :  { %v8953_v26 = vadd.f32 %v8952_v28, %v8951_v41  ;;  %v8954_v5 = vpop.f32.mrb[90].mxu0  ;;  %v8975_v17 = vadd.f32 %v8974_v53, %v8973_v12  ;;  %v8976_v10 = vpop.f32.mrb[90].mxu1 }
0x1e8a   :  { %v8955_v31 = vpop.f32.mrb[91].mxu0  ;;  %v8977_v56 = vpop.f32.mrb[91].mxu1 }
0x1e8b   :  { %v7370_v50 = vadd.f32 %v8953_v26, %v7329_v21  ;;  %v8956_v57 = vadd.f32 %v8955_v31, %v8954_v5  ;;  %v8978_v16 = vadd.f32 %v8977_v56, %v8976_v10  ;;  %v8615_v5 = vld [vmem:[%s12128_s14 + $0x1] ss:$0 sm:$0xff] }
0x1e8c   :  { %v8616_v31 = vld [vmem:[%s12129_s15 + $0x1] ss:$0 sm:$0xff] }
0x1e8d   :  { %v7411_v54 = vadd.f32 %v8975_v17, %v7370_v50  ;;  %v7373_v46 = vadd.f32 %v8956_v57, %v7332_v48 }
0x1e8f   :  { %v7414_v7 = vadd.f32 %v8978_v16, %v7373_v46 }
0x1ea7   :  { %v8995_v42 = vpop.f32.mrb[92].mxu0 }
0x1ea8   :  { %v9017_v34 = vpop.f32.mrb[92].mxu1  ;;  %v8996_v13 = vpop.f32.mrb[93].mxu0 }
0x1ea9   :  { %v8997_v11 = vadd.f32 %v8996_v13, %v8995_v42  ;;  %v9018_v59 = vpop.f32.mrb[93].mxu1  ;;  %v8998_v18 = vpop.f32.mrb[94].mxu0 }
0x1eaa   :  { %v9019_v45 = vadd.f32 %v9018_v59, %v9017_v34  ;;  %v9020_v35 = vpop.f32.mrb[94].mxu1  ;;  %v8999_v0 = vpop.f32.mrb[95].mxu0 }
0x1eab   :  { %v7452_v47 = vadd.f32 %v8997_v11, %v7411_v54  ;;  %v9000_v32 = vadd.f32 %v8999_v0, %v8998_v18  ;;  %v9021_v25 = vpop.f32.mrb[95].mxu1 }
0x1eac   :  { %v9022_v3 = vadd.f32 %v9021_v25, %v9020_v35  ;;  %v7674_v25 = vld [vmem:[%s12130_s18 + $0x8] sm:$0xff] }
0x1ead   :  { %v7493_v58 = vadd.f32 %v9019_v45, %v7452_v47  ;;  %v7455_v1 = vadd.f32 %v9000_v32, %v7414_v7  ;;  %v7673_v32 = vld [vmem:[%s12130_s18] sm:$0xff] }
0x1eaf   :  { %v7496_v24 = vadd.f32 %v9022_v3, %v7455_v1  ;;  %v9349_v3 = vpack.c.bf16 %v7674_v25, %v7673_v32  ;;  %v7676_v1 = vld [vmem:[%s12130_s18 + $0x18] sm:$0xff] }
0x1eb1   :  { %9350 = vmatprep.subr.bf16.mxu0 %v9349_v3 }
0x1eb2   :  { %9352 = vmatpush3.bf16.msra.mxu0 %v9349_v3 }
0x1ec7   :  { %v9039_v8 = vpop.f32.mrb[96].mxu0 }
0x1ec8   :  { %v9061_v19 = vpop.f32.mrb[96].mxu1  ;;  %v9040_v37 = vpop.f32.mrb[97].mxu0 }
0x1ec9   :  { %v9041_v44 = vadd.f32 %v9040_v37, %v9039_v8  ;;  %v9062_v49 = vpop.f32.mrb[97].mxu1  ;;  %v9042_v2 = vpop.f32.mrb[98].mxu0 }
0x1eca   :  { %v9063_v61 = vadd.f32 %v9062_v49, %v9061_v19  ;;  %v9064_v29 = vpop.f32.mrb[98].mxu1  ;;  %v9043_v51 = vpop.f32.mrb[99].mxu0 }
0x1ecb   :  { %v7534_v52 = vadd.f32 %v9041_v44, %v7493_v58  ;;  %v9044_v30 = vadd.f32 %v9043_v51, %v9042_v2  ;;  %v9065_v60 = vpop.f32.mrb[99].mxu1  ;;  %v7675_v58 = vld [vmem:[%s12130_s18 + $0x10] sm:$0xff] }
0x1ecc   :  { %v9066_v15 = vadd.f32 %v9065_v60, %v9064_v29  ;;  %v8617_v29 = vld [vmem:[%s12131_s16] ss:$0 sm:$0xff] }
0x1ecd   :  { %v7575_v23 = vadd.f32 %v9063_v61, %v7534_v52  ;;  %v7537_v20 = vadd.f32 %v9044_v30, %v7496_v24  ;;  %v9353_v24 = vpack.c.bf16 %v7676_v1, %v7675_v58  ;;  %v8618_v30 = vld [vmem:[%s12132_s17] ss:$0 sm:$0xff] }
0x1ecf   :  { %v7578_v43 = vadd.f32 %v9066_v15, %v7537_v20  ;;  %v7581_v33 = vadd.f32 %v7575_v23, %v11295_v62  ;;  %9354 = vmatprep.subr.bf16.mxu0 %v9353_v24 }
0x1ed0   :  { %9356 = vmatpush3.bf16.msra.mxu0 %v9353_v24 }
0x1ed1   :  { %v7587_v9 = vsel %vm88_vm0, %v7581_v33, 0.0  ;;  %v7582_v38 = vadd.f32 %v7578_v43, %v11284_v27 }
0x1ed2   :  { %7588 = vadd.xlane.f32.xlu0 %v7587_v9  ;;  %v7768_v9 = vld [vmem:[%s12133_s20 + $0x8] sm:$0xff] }
0x1ed3   :  { %v7590_v6 = vsel %vm88_vm0, %v7582_v38, 0.0 }
0x1ed4   :  { %7591 = vadd.xlane.f32.xlu1 %v7590_v6  ;;  %v7769_v6 = vld [vmem:[%s12133_s20 + $0x10] sm:$0xff] }
0x1f5f   :  { %v7589_v63 = vpop.xlane.xlu0 %7588 }
0x1f60   :  { %v7593_v22 = vmul.f32 0.03125, %v7589_v63  ;;  %v7770_v63 = vld [vmem:[%s12133_s20 + $0x18] sm:$0xff] }
0x1f61   :  { %v7592_v39 = vpop.xlane.xlu1 %7591 }
0x1f62   :  { %v7595_v40 = vsub.f32 %v7581_v33, %v7593_v22  ;;  %v7594_v55 = vmul.f32 0.03125, %v7592_v39  ;;  %v7767_v33 = vld [vmem:[%s12133_s20] sm:$0xff]  ;;  %v9361_v22 = vpack.c.bf16 %v7770_v63, %v7769_v6 }
0x1f63   :  { %v7771_v39 = vld [vmem:[%s12133_s20 + $0x20] sm:$0xff] }
0x1f64   :  { %v7596_v36 = vsub.f32 %v7582_v38, %v7594_v55  ;;  %v7597_v4 = vmul.f32 %v7595_v40, %v7595_v40  ;;  %v9357_v38 = vpack.c.bf16 %v7768_v9, %v7767_v33 }
0x1f66   :  { %v7599_v21 = vsel %vm88_vm0, %v7597_v4, 0.0  ;;  %v7598_v14 = vmul.f32 %v7596_v36, %v7596_v36  ;;  %9358 = vmatprep.subr.bf16.mxu1 %v9357_v38  ;;  %v7774_v4 = vld [vmem:[%s12133_s20 + $0x38] sm:$0xff] }
0x1f67   :  { %7600 = vadd.xlane.f32.xlu0 %v7599_v21  ;;  %9360 = vmatpush3.bf16.msra.mxu1 %v9357_v38 }
0x1f68   :  { %v7602_v62 = vsel %vm88_vm0, %v7598_v14, 0.0  ;;  %9362 = vmatprep.subr.bf16.mxu1 %v9361_v22  ;;  %v7865_v14 = vld [vmem:[%s12134_s2 + $0x8] sm:$0xff] }
0x1f69   :  { %7603 = vadd.xlane.f32.xlu1 %v7602_v62  ;;  %v7864_v62 = vld [vmem:[%s12134_s2] sm:$0xff] }
0x1f6b   :  { %9364 = vmatpush3.bf16.msra.mxu1 %v9361_v22 }
0x1ff4   :  { %v7601_v48 = vpop.xlane.xlu0 %7600 }
0x1ff5   :  { %v7605_v27 = vmul.f32 0.03125, %v7601_v48  ;;  %v8619_v48 = vld [vmem:[%s12135_s19] ss:$0 sm:$0xff] }
0x1ff6   :  { %v7604_v41 = vpop.xlane.xlu1 %7603 }
0x1ff7   :  { %v7607_v12 = vadd.f32 1e-05, %v7605_v27  ;;  %v7606_v28 = vmul.f32 0.03125, %v7604_v41 }
0x1ff9   :  { %9839 = vrsqrt.f32 %v7607_v12  ;;  %v7608_v26 = vadd.f32 1e-05, %v7606_v28 }
0x1ffb   :  { %9841 = vrsqrt.f32 %v7608_v26 }
0x2003   :  { %v9840_v53 = vpop.eup %9839 }
0x2004   :  { %v7611_v17 = vmul.f32 %v9840_v53, %v7595_v40  ;;  %v7772_v40 = vld [vmem:[%s12133_s20 + $0x28] sm:$0xff] }
0x2005   :  { %v9842_v10 = vpop.eup %9841  ;;  %v9365_v55 = vpack.c.bf16 %v7772_v40, %v7771_v39 }
0x2006   :  { %v7619_v50 = vmul.f32 %v8615_v5, %v7611_v17  ;;  %v7612_v57 = vmul.f32 %v9842_v10, %v7596_v36  ;;  %v7773_v36 = vld [vmem:[%s12133_s20 + $0x30] sm:$0xff]  ;;  %v8625_v17 = vadd.f32 -1.0, %v7864_v62  ;;  %v8622_v10 = vld [vmem:[%s12136_s21] ss:$0 sm:$0xff] }
0x2007   :  { %9366 = vmatprep.subr.bf16.mxu1 %v9365_v55  ;;  %v9369_v21 = vpack.c.bf16 %v7774_v4, %v7773_v36 }
0x2008   :  { %v7627_v56 = vadd.f32 %v8616_v31, %v7619_v50  ;;  %v7620_v16 = vmul.f32 %v8615_v5, %v7612_v57  ;;  %9368 = vmatpush3.bf16.msra.mxu1 %v9365_v55  ;;  %v8626_v5 = vadd.f32 -1.0, %v7865_v14  ;;  %v7868_v50 = vmul.f32 10000.0, %v8625_v17 }
0x2009   :  { %9370 = vmatprep.subr.bf16.mxu1 %v9369_v21 }
0x200a   :  { %v7631_v54 = vsel %vm88_vm0, %v7627_v56, 0.0  ;;  %v7628_v46 = vadd.f32 %v8616_v31, %v7620_v16  ;;  %v7869_v31 = vmul.f32 10000.0, %v8626_v5 }
0x200b   :  { %7632 = vadd.xlane.f32.xlu0 %v7631_v54 }
0x200c   :  { %v7634_v7 = vsel %vm88_vm0, %v7628_v46, 0.0  ;;  %9372 = vmatpush3.bf16.msra.mxu1 %v9369_v21 }
0x200d   :  { %7635 = vadd.xlane.f32.xlu1 %v7634_v7 }
0x2098   :  { %v7633_v42 = vpop.xlane.xlu0 %7632 }
0x2099   :  { %v7637_v34 = vmul.f32 0.03125, %v7633_v42 }
0x209a   :  { %v7636_v13 = vpop.xlane.xlu1 %7635 }
0x209b   :  { %v7639_v11 = vsub.f32 %v7627_v56, %v7637_v34  ;;  %v7638_v59 = vmul.f32 0.03125, %v7636_v13 }
0x209d   :  { %v7640_v18 = vsub.f32 %v7628_v46, %v7638_v59  ;;  %v7641_v45 = vmul.f32 %v7639_v11, %v7639_v11 }
0x209f   :  { %v7643_v35 = vsel %vm88_vm0, %v7641_v45, 0.0  ;;  %v7642_v0 = vmul.f32 %v7640_v18, %v7640_v18 }
0x20a0   :  { %7644 = vadd.xlane.f32.xlu0 %v7643_v35 }
0x20a1   :  { %v7646_v47 = vsel %vm88_vm0, %v7642_v0, 0.0 }
0x20a2   :  { %7647 = vadd.xlane.f32.xlu1 %v7646_v47 }
0x20b3   :  { %7876 = vrot.lane.b32.xlu1 %v7865_v14, %s9856_s7 }
0x20b6   :  { %7874 = vrot.lane.b32.xlu0 %v7864_v62, %s9856_s7 }
0x212d   :  { %v7645_v8 = vpop.xlane.xlu0 %7644 }
0x212e   :  { %v7649_v19 = vmul.f32 0.03125, %v7645_v8 }
0x212f   :  { %v7648_v37 = vpop.xlane.xlu1 %7647 }
0x2130   :  { %v7651_v44 = vadd.f32 1e-05, %v7649_v19  ;;  %v7650_v49 = vmul.f32 0.03125, %v7648_v37 }
0x2131   :  { %v7875_v46 = vpop.permute.xlu0 %7874 }
0x2132   :  { %9843 = vrsqrt.f32 %v7651_v44  ;;  %v7652_v2 = vadd.f32 1e-05, %v7650_v49 }
0x2133   :  { %v7877_v56 = vpop.permute.xlu1 %7876 }
0x2134   :  { %9845 = vrsqrt.f32 %v7652_v2 }
0x213c   :  { %v9844_v61 = vpop.eup %9843 }
0x213d   :  { %v7655_v51 = vmul.f32 %v9844_v61, %v7639_v11 }
0x213e   :  { %v9846_v52 = vpop.eup %9845 }
0x213f   :  { %v7656_v60 = vmul.f32 %v9846_v52, %v7640_v18  ;;  %v7663_v15 = vmul.f32 %v8617_v29, %v7655_v51 }
0x2141   :  { %v7664_v23 = vmul.f32 %v8617_v29, %v7656_v60  ;;  %v7671_v20 = vadd.f32 %v8618_v30, %v7663_v15 }
0x2143   :  { %v7672_v43 = vadd.f32 %v8618_v30, %v7664_v23  ;;  %9295 = vmatprep.mubr.msk.f32.mxu0 %vm88_vm0, %v7671_v20 }
0x2145   :  { %9296 = vmatmul.mubr.msk.f32.vlgmr.msra.gmra.mrb[100].mxu0 %vm88_vm0, %v7672_v43 }
0x2218   :  { %v9297_v27 = vpop.f32.mrb[100].mxu0 }
0x2219   :  { %v7762_v41 = vadd.f32 %v9297_v27, %v8619_v48  ;;  %v7756_v12 = vpop.f32.mrb[101].mxu0 }
0x221a   :  { %v7757_v28 = vadd.f32 %v8619_v48, %v7756_v12 }
0x221c   :  { %9847 = vtanh.f32 %v7757_v28 }
0x221d   :  { %9849 = vtanh.f32 %v7762_v41 }
0x2226   :  { %v9848_v26 = vpop.eup %9847 }
0x2227   :  { %v9850_v53 = vpop.eup %9849  ;;  %9314 = vmatprep.mubr.msk.f32.mxu1 %vm7782_vm3, %v9848_v26 }
0x2228   :  { %9315 = vmatmul.mubr.msk.f32.vlgmr.msra.gmra.mrb[100].mxu1 %vm7782_vm3, %v9850_v53 }
0x22fb   :  { %v9316_v57 = vpop.f32.mrb[100].mxu1 }
0x22fc   :  { %v7861_v16 = vadd.f32 %v9316_v57, %v8622_v10  ;;  %v7855_v54 = vpop.f32.mrb[101].mxu1 }
0x22fd   :  { %v7856_v7 = vadd.f32 %v8622_v10, %v7855_v54 }
0x22fe   :  { %v7871_v42 = vadd.f32 %v7869_v31, %v7861_v16  ;;  %v7881_v34 = vmul.f32 %v7877_v56, %v7861_v16 }
0x22ff   :  { %v7870_v13 = vadd.f32 %v7868_v50, %v7856_v7  ;;  %v7880_v11 = vmul.f32 %v7875_v46, %v7856_v7 }
0x2300   :  { %v7884_v59 = vsel %vm7882_vm4, %v7871_v42, %v7881_v34 }
0x2301   :  { %7887 = vst.msk [vmem:[%s12137_s22 + $0x8] sm:$0xff] %vm7885_vm5, %v7884_v59  ;;  %v7883_v18 = vsel %vm7882_vm4, %v7870_v13, %v7880_v11 }
0x2302   :  { %7886 = vst.msk [vmem:[%s12137_s22] sm:$0xff] %vm7885_vm5, %v7883_v18 }

</bundles_post_ra>
